<compile_context>
chip_gen: v7x
topology: tpu7x:2x2x1
jax: 0.10.0
libtpu: 0.0.40
codegen_flags: <defaults>
</compile_context>

<pallas_src>
import jax
import jax.numpy as jnp
from jax.experimental import pallas as pl
from jax.experimental.pallas import tpu as pltpu

D_IN = 64 * 64 * 3      # 12288
H = 100                 # fc1 out features
H_PAD = 128             # padded hidden (lane-aligned)
OUT_PAD = 128           # padded output width (lane-dense store; col 0 is the real output)
TM_MAX = 256            # max batch tile (bf16 w1 + <=256-row x tiles stay well under 64 MiB VMEM)


def scalar_model_kernel(x_ref, w1_ref, b1_ref, w2_ref, b2_ref, o_ref):
    # fc1: one full-K bf16 MXU matmul per batch tile; w1 is VMEM-resident (one DMA/call).
    x = x_ref[...].astype(jnp.bfloat16)        # no-op copy if x already arrived as bf16
    h = jnp.dot(x, w1_ref[...], preferred_element_type=jnp.float32)
    h = jnp.maximum(h + b1_ref[...], 0.0)                       # f32 bias + ReLU
    # fc2: single output column -> VPU multiply + cross-lane sum (no wasted MXU push).
    s = jnp.sum(h * w2_ref[...], axis=-1, keepdims=True) + b2_ref[0, 0]
    # Broadcast across 128 lanes so the store stays lane-dense / unmasked.
    o_ref[...] = jnp.broadcast_to(s, o_ref.shape).astype(o_ref.dtype)


def prepare_params(w1, b1, w2, b2):
    """Pad / re-layout / quantize the weights ONCE (hoisted out of the forward path).

    w1: (D_IN, H), b1: (H,), w2: (H, 1), b2: (1,) -> layout-ready arrays.
    w1 is stored in bf16 (single-pass MXU, half the resident VMEM / HBM traffic);
    b1 / w2 / b2 stay f32 (tiny, and keep the post-accumulation math exact).
    """
    w1_p = (jnp.zeros((D_IN, H_PAD), jnp.float32)
            .at[:, :H].set(jnp.asarray(w1, jnp.float32))
            .astype(jnp.bfloat16))
    b1_p = jnp.zeros((1, H_PAD), jnp.float32).at[:, :H].set(
        jnp.asarray(b1, jnp.float32).reshape(1, H))
    # fc2 weight stored as a padded row vector (zeros beyond H -> exact result).
    w2_p = jnp.zeros((1, H_PAD), jnp.float32).at[:, :H].set(
        jnp.asarray(w2, jnp.float32).reshape(1, H))
    b2_p = jnp.asarray(b2, jnp.float32).reshape(1, 1)
    return w1_p, b1_p, w2_p, b2_p


def _choose_tile(n):
    """Batch-tile rows: multiple of 8, <= TM_MAX, >=2 tiles once the batch is big
    enough to feed both v7x TensorCores."""
    n8 = ((n + 7) // 8) * 8
    if n8 <= 128:
        return n8                              # one tile for small batches
    if n8 <= 2 * TM_MAX:
        return ((n8 // 2 + 7) // 8) * 8        # two roughly equal tiles (both TCs busy)
    return TM_MAX


def scalar_model_forward(x, params):
    """x: (N, 12288) f32 or bf16, params from prepare_params(). Returns (N, 1) f32."""
    w1_p, b1_p, w2_p, b2_p = params
    x = jnp.asarray(x)
    if x.dtype != jnp.bfloat16:
        x = x.astype(jnp.float32)              # kernel casts to bf16 tile-by-tile in VMEM
    N = x.shape[0]
    TM = _choose_tile(N)

    # Only a tiny single-tile batch (TM > N) gets padded (cheap, <=128 rows); all other
    # ragged batches rely on Pallas' partial-last-block masking -> no extra HBM pass.
    if TM > N:
        x = jnp.zeros((TM, D_IN), x.dtype).at[:N].set(x)
    n_rows = x.shape[0]
    grid = (pl.cdiv(n_rows, TM),)

    out_padded = pl.pallas_call(
        scalar_model_kernel,
        out_shape=jax.ShapeDtypeStruct((n_rows, OUT_PAD), jnp.float32),
        grid_spec=pltpu.PrefetchScalarGridSpec(
            num_scalar_prefetch=0,
            grid=grid,
            in_specs=[
                # x batch tile: streamed (double-buffered by default).
                pl.BlockSpec((TM, D_IN), lambda i: (i, 0)),
                # Constant-index (resident) operands: one DMA, single buffer.
                pl.BlockSpec((D_IN, H_PAD), lambda i: (0, 0),
                             pipeline_mode=pl.Buffered(1)),   # w1 (bf16)
                pl.BlockSpec((1, H_PAD), lambda i: (0, 0),
                             pipeline_mode=pl.Buffered(1)),   # b1
                pl.BlockSpec((1, H_PAD), lambda i: (0, 0),
                             pipeline_mode=pl.Buffered(1)),   # w2 (row)
                pl.BlockSpec((1, 1), lambda i: (0, 0),
                             pipeline_mode=pl.Buffered(1)),   # b2 scalar
            ],
            out_specs=pl.BlockSpec((TM, OUT_PAD), lambda i: (i, 0)),
        ),
        compiler_params=pltpu.CompilerParams(
            dimension_semantics=("parallel",),        # shard batch tiles across TCs
            vmem_limit_bytes=48 * 1024 * 1024,        # fits TM=256 f32 x tiles; < 64 MiB (v7x)
        ),
    )(x, w1_p, b1_p, w2_p, b2_p)

    return out_padded[:N, :1]


if __name__ == "__main__":
    key = jax.random.PRNGKey(0)
    k_x, k_w1, k_b1, k_w2, k_b2 = jax.random.split(key, 5)

    N = 2
    x = jax.random.normal(k_x, (N, D_IN), jnp.float32)

    # --- Case 1: PyTorch default init (fc2 weight/bias = 0, as in the module) ---
    bound1 = 1.0 / jnp.sqrt(jnp.float32(D_IN))
    w1 = jax.random.uniform(k_w1, (D_IN, H), jnp.float32, -bound1, bound1)
    b1 = jax.random.uniform(k_b1, (H,), jnp.float32, -bound1, bound1)
    w2 = jnp.zeros((H, 1), jnp.float32)
    b2 = jnp.zeros((1,), jnp.float32)

    params = prepare_params(w1, b1, w2, b2)   # padded / bf16-cast once, outside forward
    out = jax.block_until_ready(scalar_model_forward(x, params))
    ref = jnp.maximum(x @ w1 + b1, 0.0) @ w2 + b2
    assert out.shape == (N, 1)
    assert jnp.allclose(out, ref, atol=5e-2, rtol=5e-2), "mismatch vs f32 reference (zero fc2)"

    # --- Case 2: random fc2 so the fc2 path is actually exercised ---
    bound2 = 1.0 / jnp.sqrt(jnp.float32(H))
    w2r = jax.random.uniform(k_w2, (H, 1), jnp.float32, -bound2, bound2)
    b2r = jax.random.uniform(k_b2, (1,), jnp.float32, -bound2, bound2)
    params_r = prepare_params(w1, b1, w2r, b2r)
    out_r = jax.block_until_ready(scalar_model_forward(x, params_r))

    # Loose check vs the pure-f32 reference (kernel multiplies in bf16, accumulates f32).
    ref_f32 = jnp.maximum(x @ w1 + b1, 0.0) @ w2r + b2r
    assert out_r.shape == (N, 1)
    assert jnp.allclose(out_r, ref_f32, atol=5e-2, rtol=5e-2), "mismatch vs f32 reference"

    # Tight check vs a bf16-matched reference (same rounding of x / w1 as the kernel).
    x_bf = x.astype(jnp.bfloat16).astype(jnp.float32)
    w1_bf = w1.astype(jnp.bfloat16).astype(jnp.float32)
    ref_bf = jnp.maximum(x_bf @ w1_bf + b1, 0.0) @ w2r + b2r
    assert jnp.allclose(out_r, ref_bf, atol=1e-2, rtol=1e-2), "mismatch vs bf16-matched reference"

    print("KERNEL_OK")
</pallas_src>

<mosaic_0001>
module attributes {stable_mosaic.version = 11 : i64} {
  func.func @scalar_model_kernel(%arg0: i32, %arg1: memref<8x12288xf32, #tpu.memory_space<vmem>>, %arg2: memref<12288x128xbf16, #tpu.memory_space<vmem>>, %arg3: memref<1x128xf32, #tpu.memory_space<vmem>>, %arg4: memref<1x128xf32, #tpu.memory_space<vmem>>, %arg5: memref<1x1xf32, #tpu.memory_space<vmem>>, %arg6: memref<8x128xf32, #tpu.memory_space<vmem>>) attributes {dimension_semantics = [#tpu.dimension_semantics<parallel>], iteration_bounds = array<i64: 1>, scalar_prefetch = 0 : i64, scratch_operands = 0 : i64, tpu.core_type = #tpu.core_type<tc>, window_params = [{transform_indices = @transform_0, window_bounds = array<i64: 8, 12288>}, {pipeline_mode = #tpu.pipeline_mode<synchronous>, transform_indices = @transform_1, window_bounds = array<i64: 12288, 128>}, {pipeline_mode = #tpu.pipeline_mode<synchronous>, transform_indices = @transform_2, window_bounds = array<i64: 1, 128>}, {pipeline_mode = #tpu.pipeline_mode<synchronous>, transform_indices = @transform_3, window_bounds = array<i64: 1, 128>}, {pipeline_mode = #tpu.pipeline_mode<synchronous>, transform_indices = @transform_4, window_bounds = array<i64: 1, 1>}, {transform_indices = @transform_5, window_bounds = array<i64: 8, 128>}]} {
    %c0 = arith.constant 0 : index
    %c0_0 = arith.constant 0 : index
    %0 = vector.load %arg1[%c0, %c0_0] : memref<8x12288xf32, #tpu.memory_space<vmem>>, vector<8x12288xf32>
    %1 = arith.truncf %0 : vector<8x12288xf32> to vector<8x12288xbf16>
    %c0_1 = arith.constant 0 : index
    %c0_2 = arith.constant 0 : index
    %2 = vector.load %arg2[%c0_1, %c0_2] : memref<12288x128xbf16, #tpu.memory_space<vmem>>, vector<12288x128xbf16>
    %cst = arith.constant dense<0.000000e+00> : vector<8x128xf32>
    %3 = tpu.matmul %1, %2, %cst {dimension_numbers = #tpu.dot_dimension_numbers<[1], [0], [0], [1], [0, 0, 1, 1], [], []>} : vector<8x12288xbf16>, vector<12288x128xbf16>, vector<8x128xf32> -> vector<8x128xf32>
    %c0_3 = arith.constant 0 : index
    %c0_4 = arith.constant 0 : index
    %4 = vector.load %arg3[%c0_3, %c0_4] : memref<1x128xf32, #tpu.memory_space<vmem>>, vector<1x128xf32>
    %5 = vector.broadcast %4 : vector<1x128xf32> to vector<8x128xf32>
    %6 = arith.addf %3, %5 : vector<8x128xf32>
    %cst_5 = arith.constant 0.000000e+00 : f32
    %7 = vector.broadcast %cst_5 : f32 to vector<8x128xf32>
    %8 = arith.maximumf %6, %7 : vector<8x128xf32>
    %c0_6 = arith.constant 0 : index
    %c0_7 = arith.constant 0 : index
    %9 = vector.load %arg4[%c0_6, %c0_7] : memref<1x128xf32, #tpu.memory_space<vmem>>, vector<1x128xf32>
    %10 = vector.broadcast %9 : vector<1x128xf32> to vector<8x128xf32>
    %11 = arith.mulf %8, %10 : vector<8x128xf32>
    %cst_8 = arith.constant dense<0.000000e+00> : vector<8xf32>
    %12 = vector.multi_reduction <add>, %11, %cst_8 [1] : vector<8x128xf32> to vector<8xf32>
    %13 = vector.shape_cast %12 : vector<8xf32> to vector<8x1xf32>
    %c0_9 = arith.constant 0 : index
    %c0_10 = arith.constant 0 : index
    %14 = vector.load %arg5[%c0_9, %c0_10] : memref<1x1xf32, #tpu.memory_space<vmem>>, vector<1x1xf32>
    %15 = vector.extract %14[0, 0] : f32 from vector<1x1xf32>
    %16 = vector.broadcast %15 : f32 to vector<8x1xf32>
    %17 = arith.addf %13, %16 : vector<8x1xf32>
    %18 = vector.shape_cast %17 : vector<8x1xf32> to vector<8x1xf32>
    %19 = vector.broadcast %18 : vector<8x1xf32> to vector<8x128xf32>
    %c0_11 = arith.constant 0 : index
    %c0_12 = arith.constant 0 : index
    %20 = vector.load %arg6[%c0_11, %c0_12] : memref<8x128xf32, #tpu.memory_space<vmem>>, vector<8x128xf32>
    tpu.vector_store %arg6[%c0_11, %c0_12], %19 {strides = array<i32>} : memref<8x128xf32, #tpu.memory_space<vmem>>, vector<8x128xf32>,
    return
  }
  func.func @transform_0(%arg0: i32) -> (i32, i32) {
    %c0_i32 = arith.constant 0 : i32
    %c0_i32_0 = arith.constant 0 : i32
    return %arg0, %c0_i32 : i32, i32
  }
  func.func @transform_1(%arg0: i32) -> (i32, i32) {
    %c0_i32 = arith.constant 0 : i32
    %c0_i32_0 = arith.constant 0 : i32
    %c0_i32_1 = arith.constant 0 : i32
    return %c0_i32, %c0_i32_0 : i32, i32
  }
  func.func @transform_2(%arg0: i32) -> (i32, i32) {
    %c0_i32 = arith.constant 0 : i32
    %c0_i32_0 = arith.constant 0 : i32
    %c0_i32_1 = arith.constant 0 : i32
    return %c0_i32, %c0_i32_0 : i32, i32
  }
  func.func @transform_3(%arg0: i32) -> (i32, i32) {
    %c0_i32 = arith.constant 0 : i32
    %c0_i32_0 = arith.constant 0 : i32
    %c0_i32_1 = arith.constant 0 : i32
    return %c0_i32, %c0_i32_0 : i32, i32
  }
  func.func @transform_4(%arg0: i32) -> (i32, i32) {
    %c0_i32 = arith.constant 0 : i32
    %c0_i32_0 = arith.constant 0 : i32
    %c0_i32_1 = arith.constant 0 : i32
    return %c0_i32, %c0_i32_0 : i32, i32
  }
  func.func @transform_5(%arg0: i32) -> (i32, i32) {
    %c0_i32 = arith.constant 0 : i32
    %c0_i32_0 = arith.constant 0 : i32
    return %arg0, %c0_i32 : i32, i32
  }
}

</mosaic_0001>

<bundles_post_ra>
// kernel: tpu_custom_call.1
= control target key start
LH: loop header
LB: loop body
LE: loop exit
PB: predicated region body
PF: predicated region fallthrough
CT: control target
= control target key end

     0   :  { %s11238_s0 = inlined_call_operand.hbm [shape: f32[8,12288], index: 0, kind: input, shape index: {}]   ;;  %s11239_s1 = inlined_call_operand.hbm [shape: bf16[12288,128], index: 1, kind: input, shape index: {}]   ;;  %s11240_s2 = inlined_call_operand.hbm [shape: f32[1,128], index: 2, kind: input, shape index: {}]   ;;  %s11241_s3 = inlined_call_operand.hbm [shape: f32[1,128], index: 3, kind: input, shape index: {}]   ;;  %s11242_s4 = inlined_call_operand.<no memory space> [shape: f32[1,1], index: 4, kind: input, shape index: {}]   ;;  %s11243_s5 = inlined_call_operand.hbm [shape: f32[8,128], index: 5, kind: output, shape index: {}]  }
   0x1   :  { %v10_v0 = vstv %s11242_s4 }
   0x2   :  { %11 = vst [vmem:[#allocation2] sm:$0x1] %v10_v0 }
   0x3   :  { %12 = vsyncpa [#allocation4], 0 }
   0x4   :  { %13 = vsyncpa [#allocation7], 0 }
   0x5   :  { %14 = vsyncpa [#allocation10], 0 }
   0x6   :  { %15 = vsyncpa [#allocation5], 0  ;;  %s11090_s20 = smov [#allocation6]   ;;  %s10972_s24 = scalar_lea.hbm %s11239_s1, 98304 }
   0x7   :  { %s31_s21 = sshll.u32 %s11090_s20, 4  ;;  %p10973_p0 = scmp.ne.s32.totalorder %s11239_s1, %s10972_s24  ;;  %s32_s21 = int_to_ptr.vmem [resolvable:$true] %s31_s21 }
   0x8   :  { %p10976_p1 = scmp.lt.u32.totalorder %s10972_s24, %s11239_s1 }
   0xa   :  { %p10978_p2 = pnand %p10976_p1, %p10973_p0 }
   0xc   :  { %10981 = shalt.err (!%p10978_p2)
}
   0xd   :  { %s10982_s4 = scalar_lea.vmem %s32_s21, 98304  ;;  %p10987_p4 = scmp.lt.s32.totalorder %s32_s21, %s32_s21 }
   0xe   :  { %p10983_p3 = scmp.ne.s32.totalorder %s32_s21, %s10982_s4  ;;  %p10988_p5 = scmp.lt.s32.totalorder %s10982_s4, %s10982_s4 }
  0x10   :  { %p10989_p6 = por %p10988_p5, %p10987_p4 }
  0x12   :  { %p10990_p7 = pnand %p10989_p6, %p10983_p3 }
  0x14   :  { %10993 = shalt.err (!%p10990_p7)
}
  0x15   :  { %s11091_s29 = smov 64   ;;  %s11092_s30 = smov 4  }
  0x16   :  { %37 = dma.hbm_to_vmem [thread:$0]  %s11239_s1, 98304, %s32_s21, [#allocation7], %s11091_s29, %s11091_s29, %s11092_s30  }
  0x17   :  { %s11093_s8 = smov [#allocation3]   ;;  %s11094_s10 = smov [#allocation8]  }
  0x18   :  { %s22_s9 = sshll.u32 %s11093_s8, 4  ;;  %s44_s11 = sshll.u32 %s11094_s10, 4  ;;  %s23_s9 = int_to_ptr.vmem [resolvable:$true] %s22_s9  ;;  %s45_s11 = int_to_ptr.vmem [resolvable:$true] %s44_s11 }
  0x19   :  { %s10994_s14 = scalar_lea.hbm %s11238_s0, 12288 }
  0x1a   :  { %p10995_p8 = scmp.ne.s32.totalorder %s11238_s0, %s10994_s14  ;;  %p10998_p9 = scmp.lt.u32.totalorder %s10994_s14, %s11238_s0 }
  0x1c   :  { %p11000_p10 = pnand %p10998_p9, %p10995_p8 }
  0x1e   :  { %11003 = shalt.err (!%p11000_p10)
}
  0x1f   :  { %s11004_s1 = scalar_lea.vmem %s23_s9, 12288  ;;  %p11009_p12 = scmp.lt.s32.totalorder %s23_s9, %s23_s9 }
  0x20   :  { %p11005_p11 = scmp.ne.s32.totalorder %s23_s9, %s11004_s1  ;;  %p11010_p13 = scmp.lt.s32.totalorder %s11004_s1, %s11004_s1 }
  0x22   :  { %p11011_p0 = por %p11010_p13, %p11009_p12 }
  0x24   :  { %p11012_p1 = pnand %p11011_p0, %p11005_p11 }
  0x26   :  { %11015 = shalt.err (!%p11012_p1)
}
  0x27   :  { %25 = dma.hbm_to_vmem [thread:$0]  %s11238_s0, 12288, %s23_s9, [#allocation4]  }
  0x28   :  { %s11016_s23 = scalar_lea.hbm %s11240_s2, 16 }
  0x29   :  { %p11017_p2 = scmp.ne.s32.totalorder %s11240_s2, %s11016_s23  ;;  %p11020_p3 = scmp.lt.u32.totalorder %s11016_s23, %s11240_s2 }
  0x2b   :  { %p11022_p4 = pnand %p11020_p3, %p11017_p2 }
  0x2d   :  { %11025 = shalt.err (!%p11022_p4)
}
  0x2e   :  { %s11026_s28 = scalar_lea.vmem %s45_s11, 16  ;;  %s11030_s4 = scalar_lea.vmem %s45_s11, 32 }
  0x2f   :  { %p11027_p5 = scmp.ne.s32.totalorder %s45_s11, %s11026_s28  ;;  %p11031_p6 = scmp.lt.s32.totalorder %s45_s11, %s45_s11 }
  0x30   :  { %p11032_p7 = scmp.lt.s32.totalorder %s11030_s4, %s11026_s28 }
  0x32   :  { %p11033_p8 = por %p11032_p7, %p11031_p6 }
  0x34   :  { %p11034_p9 = pnand %p11033_p8, %p11027_p5 }
  0x36   :  { %11037 = shalt.err (!%p11034_p9)
}
  0x37   :  { %47 = dma.hbm_to_vmem [thread:$0]  %s11240_s2, 16, %s45_s11, [#allocation7]  }
  0x38   :  { %s11095_s30 = smov [#allocation9]   ;;  %s11038_s9 = scalar_lea.hbm %s11241_s3, 16 }
  0x39   :  { %s54_s6 = sshll.u32 %s11095_s30, 4  ;;  %p11039_p10 = scmp.ne.s32.totalorder %s11241_s3, %s11038_s9  ;;  %s55_s6 = int_to_ptr.vmem [resolvable:$true] %s54_s6 }
  0x3a   :  { %p11042_p11 = scmp.lt.u32.totalorder %s11038_s9, %s11241_s3 }
  0x3c   :  { %p11044_p12 = pnand %p11042_p11, %p11039_p10 }
  0x3e   :  { %11047 = shalt.err (!%p11044_p12)
}
  0x3f   :  { %s11048_s15 = scalar_lea.vmem %s55_s6, 16  ;;  %s11052_s2 = scalar_lea.vmem %s55_s6, 32 }
  0x40   :  { %p11049_p13 = scmp.ne.s32.totalorder %s55_s6, %s11048_s15  ;;  %p11053_p0 = scmp.lt.s32.totalorder %s55_s6, %s55_s6 }
  0x41   :  { %p11054_p1 = scmp.lt.s32.totalorder %s11052_s2, %s11048_s15 }
  0x43   :  { %p11055_p2 = por %p11054_p1, %p11053_p0 }
  0x45   :  { %p11056_p3 = pnand %p11055_p2, %p11049_p13 }
  0x47   :  { %11059 = shalt.err (!%p11056_p3)
}
  0x48   :  { %57 = dma.hbm_to_vmem [thread:$0]  %s11241_s3, 16, %s55_s6, [#allocation10]  }
  0x49   :  { %11082 = dma.done.wait [#allocation4], 12288  }
  0x4a   :  { %11083 = vsyncadd [#allocation4], 4294955008 }
  0x4b   :  { %11084 = dma.done.wait [#allocation7], 98320  }
  0x4c   :  { %11085 = vsyncadd [#allocation7], 4294868976 }
  0x4d   :  { %11086 = dma.done.wait [#allocation10], 16  }
  0x4e   :  { %11087 = vsyncadd [#allocation10], 4294967280  ;;  %v10204_v1 = vld [vmem:[#allocation6 + $0x40] sm:$0xff]   ;;  %v10208_v5 = vld [vmem:[#allocation6 + $0x48] sm:$0xff]   ;;  %s11096_s17 = smov [#allocation11]  }
  0x4f   :  { %v10205_v2 = vld [vmem:[#allocation6 + $0xc0] sm:$0xff]   ;;  %9139 = vmatprep.subr.bf16.mxu0 %v10204_v1  ;;  %v10209_v6 = vld [vmem:[#allocation6 + $0xc8] sm:$0xff]   ;;  %v10212_v9 = vld [vmem:[#allocation6 + $0x50] sm:$0xff]   ;;  %s8358_s18 = sshll.u32 %s11096_s17, 4  ;;  %s8359_s18 = int_to_ptr.vmem [resolvable:$true] %s8358_s18 }
  0x50   :  { %v10206_v3 = vld [vmem:[#allocation6] sm:$0xff]   ;;  %9161 = vmatprep.subr.bf16.mxu1 %v10205_v2  ;;  %v10210_v7 = vld [vmem:[#allocation6 + $0x8] sm:$0xff]   ;;  %v10213_v10 = vld [vmem:[#allocation6 + $0xd0] sm:$0xff]   ;;  %s11060_s1 = scalar_lea.vmem %s8359_s18, 128  ;;  %p11065_p5 = scmp.lt.s32.totalorder %s8359_s18, %s8359_s18 }
  0x51   :  { %v10207_v4 = vld [vmem:[#allocation6 + $0x80] sm:$0xff]   ;;  %9140 = vmatpush3.bf16.msra.mxu0 %v10206_v3  ;;  %v10211_v8 = vld [vmem:[#allocation6 + $0x88] sm:$0xff]   ;;  %v10214_v11 = vld [vmem:[#allocation6 + $0x10] sm:$0xff]   ;;  %p11061_p4 = scmp.ne.s32.totalorder %s8359_s18, %s11060_s1  ;;  %p11066_p6 = scmp.lt.s32.totalorder %s11060_s1, %s11060_s1 }
  0x52   :  { %9162 = vmatpush3.bf16.msra.mxu1 %v10207_v4  ;;  %9141 = vmatprep.subr.bf16.mxu0 %v10208_v5  ;;  %v10215_v12 = vld [vmem:[#allocation6 + $0x90] sm:$0xff]   ;;  %v10216_v13 = vld [vmem:[#allocation6 + $0x58] sm:$0xff]   ;;  %v10220_v17 = vld [vmem:[#allocation6 + $0x60] sm:$0xff]  }
  0x53   :  { %9163 = vmatprep.subr.bf16.mxu1 %v10209_v6  ;;  %v10217_v14 = vld [vmem:[#allocation6 + $0xd8] sm:$0xff]   ;;  %v10221_v18 = vld [vmem:[#allocation6 + $0xe0] sm:$0xff]   ;;  %v10224_v21 = vld [vmem:[#allocation6 + $0x68] sm:$0xff]   ;;  %p11067_p7 = por %p11066_p6, %p11065_p5 }
  0x54   :  { %v10218_v15 = vld [vmem:[#allocation6 + $0x18] sm:$0xff]   ;;  %v10222_v19 = vld [vmem:[#allocation6 + $0x20] sm:$0xff]   ;;  %v10225_v22 = vld [vmem:[#allocation6 + $0xe8] sm:$0xff]  }
  0x55   :  { %9142 = vmatpush3.bf16.msra.mxu0 %v10210_v7  ;;  %v10219_v16 = vld [vmem:[#allocation6 + $0x98] sm:$0xff]   ;;  %v10223_v20 = vld [vmem:[#allocation6 + $0xa0] sm:$0xff]   ;;  %v10226_v23 = vld [vmem:[#allocation6 + $0x28] sm:$0xff]   ;;  %p11068_p8 = pnand %p11067_p7, %p11061_p4 }
  0x56   :  { %9164 = vmatpush3.bf16.msra.mxu1 %v10211_v8  ;;  %9143 = vmatprep.subr.bf16.mxu0 %v10212_v9  ;;  %v10227_v24 = vld [vmem:[#allocation6 + $0xa8] sm:$0xff]   ;;  %v10228_v25 = vld [vmem:[#allocation6 + $0x70] sm:$0xff]   ;;  %v10232_v29 = vld [vmem:[#allocation6 + $0x78] sm:$0xff]  }
  0x57   :  { %9165 = vmatprep.subr.bf16.mxu1 %v10213_v10  ;;  %v10229_v26 = vld [vmem:[#allocation6 + $0xf0] sm:$0xff]   ;;  %v10233_v30 = vld [vmem:[#allocation6 + $0xf8] sm:$0xff]   ;;  %v74_v33 = vld [vmem:[#allocation3 + $0x8] sm:$0xff] }
  0x58   :  { %v10230_v27 = vld [vmem:[#allocation6 + $0x30] sm:$0xff]   ;;  %v10234_v31 = vld [vmem:[#allocation6 + $0x38] sm:$0xff]   ;;  %v73_v35 = vld [vmem:[#allocation3] sm:$0xff]  ;;  %v170_v36 = vpack.c.bf16 %v74_v33, %v74_v33 }
  0x59   :  { %9144 = vmatpush3.bf16.msra.mxu0 %v10214_v11  ;;  %v10231_v28 = vld [vmem:[#allocation6 + $0xb0] sm:$0xff]   ;;  %v10235_v32 = vld [vmem:[#allocation6 + $0xb8] sm:$0xff]   ;;  %v169_v38 = vpack.c.bf16 %v73_v35, %v73_v35  ;;  %v10236_v41 = vld [vmem:[#allocation6 + $0x140] sm:$0xff]  }
  0x5a   :  { %9166 = vmatpush3.bf16.msra.mxu1 %v10215_v12  ;;  %9145 = vmatprep.subr.bf16.mxu0 %v10216_v13  ;;  %v76_v34 = vld [vmem:[#allocation3 + $0x18] sm:$0xff]  ;;  %v75_v39 = vld [vmem:[#allocation3 + $0x10] sm:$0xff]  ;;  %v10237_v42 = vld [vmem:[#allocation6 + $0x1c0] sm:$0xff]  }
  0x5b   :  { %9167 = vmatprep.subr.bf16.mxu1 %v10217_v14  ;;  %v172_v37 = vpack.c.bf16 %v76_v34, %v76_v34  ;;  %v171_v40 = vpack.c.bf16 %v75_v39, %v75_v39  ;;  %6448 = vmatprep.mubr.bf16.mxu0 %v170_v36  ;;  %v10238_v43 = vld [vmem:[#allocation6 + $0x100] sm:$0xff]   ;;  %v10240_v45 = vld [vmem:[#allocation6 + $0x148] sm:$0xff]   ;;  %v10244_v49 = vld [vmem:[#allocation6 + $0x150] sm:$0xff]  }
  0x5c   :  { %v10239_v44 = vld [vmem:[#allocation6 + $0x180] sm:$0xff]   ;;  %v10241_v46 = vld [vmem:[#allocation6 + $0x1c8] sm:$0xff]   ;;  %v10245_v50 = vld [vmem:[#allocation6 + $0x1d0] sm:$0xff]  }
  0x5d   :  { %9146 = vmatpush3.bf16.msra.mxu0 %v10218_v15  ;;  %6488 = vmatprep.mubr.bf16.mxu1 %v172_v37  ;;  %v10242_v47 = vld [vmem:[#allocation6 + $0x108] sm:$0xff]   ;;  %v10246_v51 = vld [vmem:[#allocation6 + $0x110] sm:$0xff]   ;;  %v10248_v53 = vld [vmem:[#allocation6 + $0x158] sm:$0xff]  }
  0x5e   :  { %9168 = vmatpush3.bf16.msra.mxu1 %v10219_v16  ;;  %9147 = vmatprep.subr.bf16.mxu0 %v10220_v17  ;;  %v10243_v48 = vld [vmem:[#allocation6 + $0x188] sm:$0xff]   ;;  %v10247_v52 = vld [vmem:[#allocation6 + $0x190] sm:$0xff]   ;;  %v10249_v54 = vld [vmem:[#allocation6 + $0x1d8] sm:$0xff]  }
  0x5f   :  { %9169 = vmatprep.subr.bf16.mxu1 %v10221_v18  ;;  %v10250_v55 = vld [vmem:[#allocation6 + $0x118] sm:$0xff]   ;;  %v10252_v57 = vld [vmem:[#allocation6 + $0x160] sm:$0xff]   ;;  %v10256_v61 = vld [vmem:[#allocation6 + $0x168] sm:$0xff]  }
  0x60   :  { %v10251_v56 = vld [vmem:[#allocation6 + $0x198] sm:$0xff]   ;;  %v10253_v58 = vld [vmem:[#allocation6 + $0x1e0] sm:$0xff]   ;;  %v10257_v62 = vld [vmem:[#allocation6 + $0x1e8] sm:$0xff]  }
  0x61   :  { %9148 = vmatpush3.bf16.msra.mxu0 %v10222_v19  ;;  %v10254_v59 = vld [vmem:[#allocation6 + $0x120] sm:$0xff]   ;;  %v10258_v63 = vld [vmem:[#allocation6 + $0x128] sm:$0xff]   ;;  %v10260_v1 = vld [vmem:[#allocation6 + $0x170] sm:$0xff]  }
  0x62   :  { %9170 = vmatpush3.bf16.msra.mxu1 %v10223_v20  ;;  %9149 = vmatprep.subr.bf16.mxu0 %v10224_v21  ;;  %v10255_v60 = vld [vmem:[#allocation6 + $0x1a0] sm:$0xff]   ;;  %v10259_v0 = vld [vmem:[#allocation6 + $0x1a8] sm:$0xff]   ;;  %v10261_v2 = vld [vmem:[#allocation6 + $0x1f0] sm:$0xff]  }
  0x63   :  { %9171 = vmatprep.subr.bf16.mxu1 %v10225_v22  ;;  %v10262_v3 = vld [vmem:[#allocation6 + $0x130] sm:$0xff]   ;;  %v10264_v5 = vld [vmem:[#allocation6 + $0x178] sm:$0xff]   ;;  %v78_v9 = vld [vmem:[#allocation3 + $0x28] sm:$0xff] }
  0x64   :  { %v10263_v4 = vld [vmem:[#allocation6 + $0x1b0] sm:$0xff]   ;;  %v10265_v6 = vld [vmem:[#allocation6 + $0x1f8] sm:$0xff]   ;;  %v174_v11 = vpack.c.bf16 %v78_v9, %v78_v9  ;;  %v77_v13 = vld [vmem:[#allocation3 + $0x20] sm:$0xff] }
  0x65   :  { %9150 = vmatpush3.bf16.msra.mxu0 %v10226_v23  ;;  %v10266_v7 = vld [vmem:[#allocation6 + $0x138] sm:$0xff]   ;;  %v79_v14 = vld [vmem:[#allocation3 + $0x30] sm:$0xff]  ;;  %v173_v15 = vpack.c.bf16 %v77_v13, %v77_v13  ;;  %v10268_v17 = vld [vmem:[#allocation6 + $0x240] sm:$0xff]  }
  0x66   :  { %9172 = vmatpush3.bf16.msra.mxu1 %v10227_v24  ;;  %9151 = vmatprep.subr.bf16.mxu0 %v10228_v25  ;;  %v10267_v8 = vld [vmem:[#allocation6 + $0x1b8] sm:$0xff]   ;;  %v175_v16 = vpack.c.bf16 %v79_v14, %v79_v14  ;;  %v10269_v18 = vld [vmem:[#allocation6 + $0x2c0] sm:$0xff]   ;;  %v10272_v21 = vld [vmem:[#allocation6 + $0x248] sm:$0xff]  }
  0x67   :  { %9173 = vmatprep.subr.bf16.mxu1 %v10229_v26  ;;  %v80_v10 = vld [vmem:[#allocation3 + $0x38] sm:$0xff]  ;;  %v10270_v19 = vld [vmem:[#allocation6 + $0x200] sm:$0xff]   ;;  %v10273_v22 = vld [vmem:[#allocation6 + $0x2c8] sm:$0xff]  }
  0x68   :  { %v176_v12 = vpack.c.bf16 %v80_v10, %v80_v10  ;;  %v10271_v20 = vld [vmem:[#allocation6 + $0x280] sm:$0xff]   ;;  %v10274_v23 = vld [vmem:[#allocation6 + $0x208] sm:$0xff]   ;;  %v10276_v25 = vld [vmem:[#allocation6 + $0x250] sm:$0xff]  }
  0x69   :  { %9152 = vmatpush3.bf16.msra.mxu0 %v10230_v27  ;;  %v10275_v24 = vld [vmem:[#allocation6 + $0x288] sm:$0xff]   ;;  %v10277_v26 = vld [vmem:[#allocation6 + $0x2d0] sm:$0xff]   ;;  %v10284_v33 = vld [vmem:[#allocation6 + $0x260] sm:$0xff]  }
  0x6a   :  { %9174 = vmatpush3.bf16.msra.mxu1 %v10231_v28  ;;  %9153 = vmatprep.subr.bf16.mxu0 %v10232_v29  ;;  %v10278_v27 = vld [vmem:[#allocation6 + $0x210] sm:$0xff]   ;;  %v10280_v29 = vld [vmem:[#allocation6 + $0x258] sm:$0xff]   ;;  %v10285_v34 = vld [vmem:[#allocation6 + $0x2e0] sm:$0xff]  }
  0x6b   :  { %9175 = vmatprep.subr.bf16.mxu1 %v10233_v30  ;;  %v10279_v28 = vld [vmem:[#allocation6 + $0x290] sm:$0xff]   ;;  %v10281_v30 = vld [vmem:[#allocation6 + $0x2d8] sm:$0xff]   ;;  %v10286_v35 = vld [vmem:[#allocation6 + $0x220] sm:$0xff]  }
  0x6c   :  { %v10287_v36 = vld [vmem:[#allocation6 + $0x2a0] sm:$0xff]   ;;  %v10288_v37 = vld [vmem:[#allocation6 + $0x268] sm:$0xff]  }
  0x6d   :  { %9154 = vmatpush3.bf16.msra.mxu0 %v10234_v31  ;;  %v10282_v31 = vld [vmem:[#allocation6 + $0x218] sm:$0xff]   ;;  %v10290_v39 = vld [vmem:[#allocation6 + $0x228] sm:$0xff]   ;;  %v10316_v9 = vld [vmem:[#allocation6 + $0x360] sm:$0xff]  }
  0x6e   :  { %9176 = vmatpush3.bf16.msra.mxu1 %v10235_v32  ;;  %9183 = vmatprep.subr.bf16.mxu0 %v10236_v41  ;;  %v10283_v32 = vld [vmem:[#allocation6 + $0x298] sm:$0xff]   ;;  %v10292_v41 = vld [vmem:[#allocation6 + $0x270] sm:$0xff]   ;;  %v10317_v10 = vld [vmem:[#allocation6 + $0x3e0] sm:$0xff]  }
  0x6f   :  { %9205 = vmatprep.subr.bf16.mxu1 %v10237_v42  ;;  %v10293_v42 = vld [vmem:[#allocation6 + $0x2f0] sm:$0xff]   ;;  %v10320_v13 = vld [vmem:[#allocation6 + $0x368] sm:$0xff]  }
  0x70   :  { %6449 = vmatmul.mubr.bf16.vlgmr.msra.gmra.mrb[0].mxu0 %v169_v38  ;;  %v10289_v38 = vld [vmem:[#allocation6 + $0x2e8] sm:$0xff]  }
  0x71   :  { %6489 = vmatmul.mubr.bf16.vlgmr.msra.gmra.mrb[0].mxu1 %v171_v40  ;;  %9184 = vmatpush3.bf16.msra.mxu0 %v10238_v43  ;;  %v10291_v40 = vld [vmem:[#allocation6 + $0x2a8] sm:$0xff]   ;;  %v10294_v43 = vld [vmem:[#allocation6 + $0x230] sm:$0xff]  }
  0x72   :  { %9206 = vmatpush3.bf16.msra.mxu1 %v10239_v44  ;;  %9185 = vmatprep.subr.bf16.mxu0 %v10240_v45  ;;  %v10295_v44 = vld [vmem:[#allocation6 + $0x2b0] sm:$0xff]   ;;  %v10296_v45 = vld [vmem:[#allocation6 + $0x278] sm:$0xff]   ;;  %v10321_v14 = vld [vmem:[#allocation6 + $0x3e8] sm:$0xff]  }
  0x73   :  { %9207 = vmatprep.subr.bf16.mxu1 %v10241_v46  ;;  %6528 = vmatprep.mubr.bf16.mxu0 %v174_v11  ;;  %v10297_v46 = vld [vmem:[#allocation6 + $0x2f8] sm:$0xff]   ;;  %v10318_v11 = vld [vmem:[#allocation6 + $0x320] sm:$0xff]  }
  0x74   :  { %6568 = vmatprep.mubr.bf16.mxu1 %v176_v12  ;;  %v10319_v12 = vld [vmem:[#allocation6 + $0x3a0] sm:$0xff]  }
  0x75   :  { %9186 = vmatpush3.bf16.msra.mxu0 %v10242_v47  ;;  %v10298_v47 = vld [vmem:[#allocation6 + $0x238] sm:$0xff]  }
  0x76   :  { %9208 = vmatpush3.bf16.msra.mxu1 %v10243_v48  ;;  %9187 = vmatprep.subr.bf16.mxu0 %v10244_v49  ;;  %v10299_v48 = vld [vmem:[#allocation6 + $0x2b8] sm:$0xff]   ;;  %v82_v49 = vld [vmem:[#allocation3 + $0x48] sm:$0xff] }
  0x77   :  { %9209 = vmatprep.subr.bf16.mxu1 %v10245_v50  ;;  %v178_v50 = vpack.c.bf16 %v82_v49, %v82_v49  ;;  %v10348_v49 = vld [vmem:[#allocation6 + $0x460] sm:$0xff]  }
  0x79   :  { %9188 = vmatpush3.bf16.msra.mxu0 %v10246_v51  ;;  %v84_v51 = vld [vmem:[#allocation3 + $0x58] sm:$0xff] }
  0x7a   :  { %9210 = vmatpush3.bf16.msra.mxu1 %v10247_v52  ;;  %9189 = vmatprep.subr.bf16.mxu0 %v10248_v53  ;;  %v81_v52 = vld [vmem:[#allocation3 + $0x40] sm:$0xff]  ;;  %v83_v53 = vld [vmem:[#allocation3 + $0x50] sm:$0xff] }
  0x7b   :  { %9211 = vmatprep.subr.bf16.mxu1 %v10249_v54  ;;  %v180_v54 = vpack.c.bf16 %v84_v51, %v84_v51  ;;  %v10350_v51 = vld [vmem:[#allocation6 + $0x420] sm:$0xff]  }
  0x7d   :  { %9190 = vmatpush3.bf16.msra.mxu0 %v10250_v55  ;;  %v177_v55 = vpack.c.bf16 %v81_v52, %v81_v52  ;;  %v10351_v52 = vld [vmem:[#allocation6 + $0x4a0] sm:$0xff]  }
  0x7e   :  { %9212 = vmatpush3.bf16.msra.mxu1 %v10251_v56  ;;  %9191 = vmatprep.subr.bf16.mxu0 %v10252_v57  ;;  %v179_v56 = vpack.c.bf16 %v83_v53, %v83_v53  ;;  %v10300_v57 = vld [vmem:[#allocation6 + $0x340] sm:$0xff]   ;;  %v10352_v53 = vld [vmem:[#allocation6 + $0x468] sm:$0xff]  }
  0x7f   :  { %9213 = vmatprep.subr.bf16.mxu1 %v10253_v58  ;;  %v10301_v58 = vld [vmem:[#allocation6 + $0x3c0] sm:$0xff]  }
  0x81   :  { %9192 = vmatpush3.bf16.msra.mxu0 %v10254_v59  ;;  %v10302_v59 = vld [vmem:[#allocation6 + $0x300] sm:$0xff]  }
  0x82   :  { %9214 = vmatpush3.bf16.msra.mxu1 %v10255_v60  ;;  %9193 = vmatprep.subr.bf16.mxu0 %v10256_v61  ;;  %v10303_v60 = vld [vmem:[#allocation6 + $0x380] sm:$0xff]   ;;  %v10304_v61 = vld [vmem:[#allocation6 + $0x348] sm:$0xff]  }
  0x83   :  { %9215 = vmatprep.subr.bf16.mxu1 %v10257_v62  ;;  %v10305_v62 = vld [vmem:[#allocation6 + $0x3c8] sm:$0xff]  }
  0x85   :  { %9194 = vmatpush3.bf16.msra.mxu0 %v10258_v63  ;;  %v10306_v63 = vld [vmem:[#allocation6 + $0x308] sm:$0xff]  }
  0x86   :  { %9216 = vmatpush3.bf16.msra.mxu1 %v10259_v0  ;;  %9195 = vmatprep.subr.bf16.mxu0 %v10260_v1  ;;  %v10307_v0 = vld [vmem:[#allocation6 + $0x388] sm:$0xff]   ;;  %v10308_v1 = vld [vmem:[#allocation6 + $0x350] sm:$0xff]  }
  0x87   :  { %9217 = vmatprep.subr.bf16.mxu1 %v10261_v2  ;;  %v10309_v2 = vld [vmem:[#allocation6 + $0x3d0] sm:$0xff]  }
  0x89   :  { %9196 = vmatpush3.bf16.msra.mxu0 %v10262_v3  ;;  %v10310_v3 = vld [vmem:[#allocation6 + $0x310] sm:$0xff]  }
  0x8a   :  { %9218 = vmatpush3.bf16.msra.mxu1 %v10263_v4  ;;  %9197 = vmatprep.subr.bf16.mxu0 %v10264_v5  ;;  %v10311_v4 = vld [vmem:[#allocation6 + $0x390] sm:$0xff]   ;;  %v10312_v5 = vld [vmem:[#allocation6 + $0x358] sm:$0xff]  }
  0x8b   :  { %9219 = vmatprep.subr.bf16.mxu1 %v10265_v6  ;;  %v10313_v6 = vld [vmem:[#allocation6 + $0x3d8] sm:$0xff]  }
  0x8d   :  { %9198 = vmatpush3.bf16.msra.mxu0 %v10266_v7  ;;  %v10314_v7 = vld [vmem:[#allocation6 + $0x318] sm:$0xff]  }
  0x8e   :  { %9220 = vmatpush3.bf16.msra.mxu1 %v10267_v8  ;;  %9227 = vmatprep.subr.bf16.mxu0 %v10268_v17  ;;  %v10315_v8 = vld [vmem:[#allocation6 + $0x398] sm:$0xff]   ;;  %v10324_v17 = vld [vmem:[#allocation6 + $0x370] sm:$0xff]  }
  0x8f   :  { %9249 = vmatprep.subr.bf16.mxu1 %v10269_v18  ;;  %v10325_v18 = vld [vmem:[#allocation6 + $0x3f0] sm:$0xff]  }
  0x90   :  { %6529 = vmatmul.mubr.bf16.vlgmr.msra.gmra.mrb[4].mxu0 %v173_v15  ;;  %v10322_v15 = vld [vmem:[#allocation6 + $0x328] sm:$0xff]  }
  0x91   :  { %6569 = vmatmul.mubr.bf16.vlgmr.msra.gmra.mrb[4].mxu1 %v175_v16  ;;  %9228 = vmatpush3.bf16.msra.mxu0 %v10270_v19  ;;  %v10323_v16 = vld [vmem:[#allocation6 + $0x3a8] sm:$0xff]   ;;  %v10326_v19 = vld [vmem:[#allocation6 + $0x330] sm:$0xff]  }
  0x92   :  { %9250 = vmatpush3.bf16.msra.mxu1 %v10271_v20  ;;  %9229 = vmatprep.subr.bf16.mxu0 %v10272_v21  ;;  %v10327_v20 = vld [vmem:[#allocation6 + $0x3b0] sm:$0xff]   ;;  %v10328_v21 = vld [vmem:[#allocation6 + $0x378] sm:$0xff]  }
  0x93   :  { %9251 = vmatprep.subr.bf16.mxu1 %v10273_v22  ;;  %6608 = vmatprep.mubr.bf16.mxu0 %v178_v50  ;;  %v10329_v22 = vld [vmem:[#allocation6 + $0x3f8] sm:$0xff]   ;;  %v10349_v50 = vld [vmem:[#allocation6 + $0x4e0] sm:$0xff]  }
  0x94   :  { %6648 = vmatprep.mubr.bf16.mxu1 %v180_v54  ;;  %v10353_v54 = vld [vmem:[#allocation6 + $0x4e8] sm:$0xff]  }
  0x95   :  { %9230 = vmatpush3.bf16.msra.mxu0 %v10274_v23  ;;  %v10330_v23 = vld [vmem:[#allocation6 + $0x338] sm:$0xff]  }
  0x96   :  { %9252 = vmatpush3.bf16.msra.mxu1 %v10275_v24  ;;  %9231 = vmatprep.subr.bf16.mxu0 %v10276_v25  ;;  %v10331_v24 = vld [vmem:[#allocation6 + $0x3b8] sm:$0xff]   ;;  %v86_v25 = vld [vmem:[#allocation3 + $0x68] sm:$0xff] }
  0x97   :  { %9253 = vmatprep.subr.bf16.mxu1 %v10277_v26  ;;  %v88_v26 = vld [vmem:[#allocation3 + $0x78] sm:$0xff] }
  0x99   :  { %9232 = vmatpush3.bf16.msra.mxu0 %v10278_v27  ;;  %v85_v27 = vld [vmem:[#allocation3 + $0x60] sm:$0xff] }
  0x9a   :  { %9254 = vmatpush3.bf16.msra.mxu1 %v10279_v28  ;;  %9233 = vmatprep.subr.bf16.mxu0 %v10280_v29  ;;  %v182_v28 = vpack.c.bf16 %v86_v25, %v86_v25  ;;  %v184_v29 = vpack.c.bf16 %v88_v26, %v88_v26  ;;  %v10380_v25 = vld [vmem:[#allocation6 + $0x560] sm:$0xff]  }
  0x9b   :  { %9255 = vmatprep.subr.bf16.mxu1 %v10281_v30  ;;  %v181_v30 = vpack.c.bf16 %v85_v27, %v85_v27  ;;  %v10381_v26 = vld [vmem:[#allocation6 + $0x5e0] sm:$0xff]  }
  0x9c   :  { %v10382_v27 = vld [vmem:[#allocation6 + $0x520] sm:$0xff]  }
  0x9d   :  { %9234 = vmatpush3.bf16.msra.mxu0 %v10282_v31  ;;  %v87_v31 = vld [vmem:[#allocation3 + $0x70] sm:$0xff] }
  0x9e   :  { %9256 = vmatpush3.bf16.msra.mxu1 %v10283_v32  ;;  %9235 = vmatprep.subr.bf16.mxu0 %v10284_v33  ;;  %v183_v32 = vpack.c.bf16 %v87_v31, %v87_v31  ;;  %v10332_v33 = vld [vmem:[#allocation6 + $0x440] sm:$0xff]   ;;  %v10386_v31 = vld [vmem:[#allocation6 + $0x528] sm:$0xff]  }
  0x9f   :  { %9257 = vmatprep.subr.bf16.mxu1 %v10285_v34  ;;  %v10333_v34 = vld [vmem:[#allocation6 + $0x4c0] sm:$0xff]  }
  0xa1   :  { %9236 = vmatpush3.bf16.msra.mxu0 %v10286_v35  ;;  %v10334_v35 = vld [vmem:[#allocation6 + $0x400] sm:$0xff]  }
  0xa2   :  { %9258 = vmatpush3.bf16.msra.mxu1 %v10287_v36  ;;  %9237 = vmatprep.subr.bf16.mxu0 %v10288_v37  ;;  %v10335_v36 = vld [vmem:[#allocation6 + $0x480] sm:$0xff]   ;;  %v10336_v37 = vld [vmem:[#allocation6 + $0x448] sm:$0xff]  }
  0xa3   :  { %9259 = vmatprep.subr.bf16.mxu1 %v10289_v38  ;;  %v10337_v38 = vld [vmem:[#allocation6 + $0x4c8] sm:$0xff]  }
  0xa5   :  { %9238 = vmatpush3.bf16.msra.mxu0 %v10290_v39  ;;  %v10338_v39 = vld [vmem:[#allocation6 + $0x408] sm:$0xff]  }
  0xa6   :  { %9260 = vmatpush3.bf16.msra.mxu1 %v10291_v40  ;;  %9239 = vmatprep.subr.bf16.mxu0 %v10292_v41  ;;  %v10339_v40 = vld [vmem:[#allocation6 + $0x488] sm:$0xff]   ;;  %v10340_v41 = vld [vmem:[#allocation6 + $0x450] sm:$0xff]  }
  0xa7   :  { %9261 = vmatprep.subr.bf16.mxu1 %v10293_v42  ;;  %v10341_v42 = vld [vmem:[#allocation6 + $0x4d0] sm:$0xff]  }
  0xa9   :  { %9240 = vmatpush3.bf16.msra.mxu0 %v10294_v43  ;;  %v10342_v43 = vld [vmem:[#allocation6 + $0x410] sm:$0xff]  }
  0xaa   :  { %9262 = vmatpush3.bf16.msra.mxu1 %v10295_v44  ;;  %9241 = vmatprep.subr.bf16.mxu0 %v10296_v45  ;;  %v10343_v44 = vld [vmem:[#allocation6 + $0x490] sm:$0xff]   ;;  %v10344_v45 = vld [vmem:[#allocation6 + $0x458] sm:$0xff]  }
  0xab   :  { %9263 = vmatprep.subr.bf16.mxu1 %v10297_v46  ;;  %v10345_v46 = vld [vmem:[#allocation6 + $0x4d8] sm:$0xff]  }
  0xad   :  { %9242 = vmatpush3.bf16.msra.mxu0 %v10298_v47  ;;  %v10346_v47 = vld [vmem:[#allocation6 + $0x418] sm:$0xff]  }
  0xae   :  { %9264 = vmatpush3.bf16.msra.mxu1 %v10299_v48  ;;  %9271 = vmatprep.subr.bf16.mxu0 %v10300_v57  ;;  %v10347_v48 = vld [vmem:[#allocation6 + $0x498] sm:$0xff]   ;;  %v10356_v57 = vld [vmem:[#allocation6 + $0x470] sm:$0xff]  }
  0xaf   :  { %9293 = vmatprep.subr.bf16.mxu1 %v10301_v58  ;;  %v10357_v58 = vld [vmem:[#allocation6 + $0x4f0] sm:$0xff]  }
  0xb0   :  { %6609 = vmatmul.mubr.bf16.vlgmr.msra.gmra.mrb[8].mxu0 %v177_v55  ;;  %v10354_v55 = vld [vmem:[#allocation6 + $0x428] sm:$0xff]  }
  0xb1   :  { %6649 = vmatmul.mubr.bf16.vlgmr.msra.gmra.mrb[8].mxu1 %v179_v56  ;;  %9272 = vmatpush3.bf16.msra.mxu0 %v10302_v59  ;;  %v10355_v56 = vld [vmem:[#allocation6 + $0x4a8] sm:$0xff]   ;;  %v10358_v59 = vld [vmem:[#allocation6 + $0x430] sm:$0xff]  }
  0xb2   :  { %9294 = vmatpush3.bf16.msra.mxu1 %v10303_v60  ;;  %9273 = vmatprep.subr.bf16.mxu0 %v10304_v61  ;;  %v10359_v60 = vld [vmem:[#allocation6 + $0x4b0] sm:$0xff]   ;;  %v10360_v61 = vld [vmem:[#allocation6 + $0x478] sm:$0xff]  }
  0xb3   :  { %9295 = vmatprep.subr.bf16.mxu1 %v10305_v62  ;;  %6688 = vmatprep.mubr.bf16.mxu0 %v182_v28  ;;  %v10361_v62 = vld [vmem:[#allocation6 + $0x4f8] sm:$0xff]   ;;  %v10383_v28 = vld [vmem:[#allocation6 + $0x5a0] sm:$0xff]  }
  0xb4   :  { %6728 = vmatprep.mubr.bf16.mxu1 %v184_v29  ;;  %v10384_v29 = vld [vmem:[#allocation6 + $0x568] sm:$0xff]  }
  0xb5   :  { %9274 = vmatpush3.bf16.msra.mxu0 %v10306_v63  ;;  %v10362_v63 = vld [vmem:[#allocation6 + $0x438] sm:$0xff]  }
  0xb6   :  { %9296 = vmatpush3.bf16.msra.mxu1 %v10307_v0  ;;  %9275 = vmatprep.subr.bf16.mxu0 %v10308_v1  ;;  %v10363_v0 = vld [vmem:[#allocation6 + $0x4b8] sm:$0xff]   ;;  %v90_v1 = vld [vmem:[#allocation3 + $0x88] sm:$0xff] }
  0xb7   :  { %9297 = vmatprep.subr.bf16.mxu1 %v10309_v2  ;;  %v92_v2 = vld [vmem:[#allocation3 + $0x98] sm:$0xff] }
  0xb9   :  { %9276 = vmatpush3.bf16.msra.mxu0 %v10310_v3  ;;  %v186_v3 = vpack.c.bf16 %v90_v1, %v90_v1  ;;  %v10412_v1 = vld [vmem:[#allocation6 + $0x660] sm:$0xff]  }
  0xba   :  { %9298 = vmatpush3.bf16.msra.mxu1 %v10311_v4  ;;  %9277 = vmatprep.subr.bf16.mxu0 %v10312_v5  ;;  %v188_v4 = vpack.c.bf16 %v92_v2, %v92_v2  ;;  %v89_v5 = vld [vmem:[#allocation3 + $0x80] sm:$0xff] }
  0xbb   :  { %9299 = vmatprep.subr.bf16.mxu1 %v10313_v6  ;;  %v91_v6 = vld [vmem:[#allocation3 + $0x90] sm:$0xff]  ;;  %v10413_v2 = vld [vmem:[#allocation6 + $0x6e0] sm:$0xff]  }
  0xbd   :  { %9278 = vmatpush3.bf16.msra.mxu0 %v10314_v7  ;;  %v185_v7 = vpack.c.bf16 %v89_v5, %v89_v5  ;;  %v10416_v5 = vld [vmem:[#allocation6 + $0x668] sm:$0xff]  }
  0xbe   :  { %9300 = vmatpush3.bf16.msra.mxu1 %v10315_v8  ;;  %9279 = vmatprep.subr.bf16.mxu0 %v10316_v9  ;;  %v187_v8 = vpack.c.bf16 %v91_v6, %v91_v6  ;;  %v10364_v9 = vld [vmem:[#allocation6 + $0x540] sm:$0xff]   ;;  %v10417_v6 = vld [vmem:[#allocation6 + $0x6e8] sm:$0xff]  }
  0xbf   :  { %9301 = vmatprep.subr.bf16.mxu1 %v10317_v10  ;;  %v10365_v10 = vld [vmem:[#allocation6 + $0x5c0] sm:$0xff]  }
  0xc1   :  { %9280 = vmatpush3.bf16.msra.mxu0 %v10318_v11  ;;  %v10366_v11 = vld [vmem:[#allocation6 + $0x500] sm:$0xff]  }
  0xc2   :  { %9302 = vmatpush3.bf16.msra.mxu1 %v10319_v12  ;;  %9281 = vmatprep.subr.bf16.mxu0 %v10320_v13  ;;  %v10367_v12 = vld [vmem:[#allocation6 + $0x580] sm:$0xff]   ;;  %v10368_v13 = vld [vmem:[#allocation6 + $0x548] sm:$0xff]  }
  0xc3   :  { %9303 = vmatprep.subr.bf16.mxu1 %v10321_v14  ;;  %v10369_v14 = vld [vmem:[#allocation6 + $0x5c8] sm:$0xff]  }
  0xc5   :  { %9282 = vmatpush3.bf16.msra.mxu0 %v10322_v15  ;;  %v10370_v15 = vld [vmem:[#allocation6 + $0x508] sm:$0xff]  }
  0xc6   :  { %9304 = vmatpush3.bf16.msra.mxu1 %v10323_v16  ;;  %9283 = vmatprep.subr.bf16.mxu0 %v10324_v17  ;;  %v10371_v16 = vld [vmem:[#allocation6 + $0x588] sm:$0xff]   ;;  %v10372_v17 = vld [vmem:[#allocation6 + $0x550] sm:$0xff]  }
  0xc7   :  { %9305 = vmatprep.subr.bf16.mxu1 %v10325_v18  ;;  %v10373_v18 = vld [vmem:[#allocation6 + $0x5d0] sm:$0xff]  }
  0xc9   :  { %9284 = vmatpush3.bf16.msra.mxu0 %v10326_v19  ;;  %v10374_v19 = vld [vmem:[#allocation6 + $0x510] sm:$0xff]  }
  0xca   :  { %9306 = vmatpush3.bf16.msra.mxu1 %v10327_v20  ;;  %9285 = vmatprep.subr.bf16.mxu0 %v10328_v21  ;;  %v10375_v20 = vld [vmem:[#allocation6 + $0x590] sm:$0xff]   ;;  %v10376_v21 = vld [vmem:[#allocation6 + $0x558] sm:$0xff]  }
  0xcb   :  { %9307 = vmatprep.subr.bf16.mxu1 %v10329_v22  ;;  %v10377_v22 = vld [vmem:[#allocation6 + $0x5d8] sm:$0xff]  }
  0xcd   :  { %9286 = vmatpush3.bf16.msra.mxu0 %v10330_v23  ;;  %v10378_v23 = vld [vmem:[#allocation6 + $0x518] sm:$0xff]  }
  0xce   :  { %9308 = vmatpush3.bf16.msra.mxu1 %v10331_v24  ;;  %9315 = vmatprep.subr.bf16.mxu0 %v10332_v33  ;;  %v10379_v24 = vld [vmem:[#allocation6 + $0x598] sm:$0xff]   ;;  %v10388_v33 = vld [vmem:[#allocation6 + $0x570] sm:$0xff]  }
  0xcf   :  { %9337 = vmatprep.subr.bf16.mxu1 %v10333_v34  ;;  %v10389_v34 = vld [vmem:[#allocation6 + $0x5f0] sm:$0xff]  }
  0xd0   :  { %6689 = vmatmul.mubr.bf16.vlgmr.msra.gmra.mrb[12].mxu0 %v181_v30  ;;  %v10385_v30 = vld [vmem:[#allocation6 + $0x5e8] sm:$0xff]  }
  0xd1   :  { %6729 = vmatmul.mubr.bf16.vlgmr.msra.gmra.mrb[12].mxu1 %v183_v32  ;;  %9316 = vmatpush3.bf16.msra.mxu0 %v10334_v35  ;;  %v10387_v32 = vld [vmem:[#allocation6 + $0x5a8] sm:$0xff]   ;;  %v10390_v35 = vld [vmem:[#allocation6 + $0x530] sm:$0xff]  }
  0xd2   :  { %9338 = vmatpush3.bf16.msra.mxu1 %v10335_v36  ;;  %9317 = vmatprep.subr.bf16.mxu0 %v10336_v37  ;;  %v10391_v36 = vld [vmem:[#allocation6 + $0x5b0] sm:$0xff]   ;;  %v10392_v37 = vld [vmem:[#allocation6 + $0x578] sm:$0xff]  }
  0xd3   :  { %9339 = vmatprep.subr.bf16.mxu1 %v10337_v38  ;;  %6768 = vmatprep.mubr.bf16.mxu0 %v186_v3  ;;  %v10393_v38 = vld [vmem:[#allocation6 + $0x5f8] sm:$0xff]   ;;  %v10414_v3 = vld [vmem:[#allocation6 + $0x620] sm:$0xff]  }
  0xd4   :  { %6808 = vmatprep.mubr.bf16.mxu1 %v188_v4  ;;  %v10415_v4 = vld [vmem:[#allocation6 + $0x6a0] sm:$0xff]  }
  0xd5   :  { %9318 = vmatpush3.bf16.msra.mxu0 %v10338_v39  ;;  %v10394_v39 = vld [vmem:[#allocation6 + $0x538] sm:$0xff]  }
  0xd6   :  { %9340 = vmatpush3.bf16.msra.mxu1 %v10339_v40  ;;  %9319 = vmatprep.subr.bf16.mxu0 %v10340_v41  ;;  %v10395_v40 = vld [vmem:[#allocation6 + $0x5b8] sm:$0xff]   ;;  %v94_v41 = vld [vmem:[#allocation3 + $0xa8] sm:$0xff] }
  0xd7   :  { %9341 = vmatprep.subr.bf16.mxu1 %v10341_v42  ;;  %v190_v42 = vpack.c.bf16 %v94_v41, %v94_v41 }
  0xd9   :  { %9320 = vmatpush3.bf16.msra.mxu0 %v10342_v43  ;;  %v96_v43 = vld [vmem:[#allocation3 + $0xb8] sm:$0xff] }
  0xda   :  { %9342 = vmatpush3.bf16.msra.mxu1 %v10343_v44  ;;  %9321 = vmatprep.subr.bf16.mxu0 %v10344_v45  ;;  %v93_v44 = vld [vmem:[#allocation3 + $0xa0] sm:$0xff]  ;;  %v95_v45 = vld [vmem:[#allocation3 + $0xb0] sm:$0xff] }
  0xdb   :  { %9343 = vmatprep.subr.bf16.mxu1 %v10345_v46  ;;  %v192_v46 = vpack.c.bf16 %v96_v43, %v96_v43 }
  0xdd   :  { %9322 = vmatpush3.bf16.msra.mxu0 %v10346_v47  ;;  %v189_v47 = vpack.c.bf16 %v93_v44, %v93_v44  ;;  %v10444_v44 = vld [vmem:[#allocation6 + $0x760] sm:$0xff]  }
  0xde   :  { %9344 = vmatpush3.bf16.msra.mxu1 %v10347_v48  ;;  %9323 = vmatprep.subr.bf16.mxu0 %v10348_v49  ;;  %v191_v48 = vpack.c.bf16 %v95_v45, %v95_v45  ;;  %v10396_v49 = vld [vmem:[#allocation6 + $0x640] sm:$0xff]  }
  0xdf   :  { %9345 = vmatprep.subr.bf16.mxu1 %v10349_v50  ;;  %v10397_v50 = vld [vmem:[#allocation6 + $0x6c0] sm:$0xff]  }
  0xe1   :  { %9324 = vmatpush3.bf16.msra.mxu0 %v10350_v51  ;;  %v10398_v51 = vld [vmem:[#allocation6 + $0x600] sm:$0xff]  }
  0xe2   :  { %9346 = vmatpush3.bf16.msra.mxu1 %v10351_v52  ;;  %9325 = vmatprep.subr.bf16.mxu0 %v10352_v53  ;;  %v10399_v52 = vld [vmem:[#allocation6 + $0x680] sm:$0xff]   ;;  %v10400_v53 = vld [vmem:[#allocation6 + $0x648] sm:$0xff]  }
  0xe3   :  { %9347 = vmatprep.subr.bf16.mxu1 %v10353_v54  ;;  %v10401_v54 = vld [vmem:[#allocation6 + $0x6c8] sm:$0xff]  }
  0xe5   :  { %9326 = vmatpush3.bf16.msra.mxu0 %v10354_v55  ;;  %v10402_v55 = vld [vmem:[#allocation6 + $0x608] sm:$0xff]  }
  0xe6   :  { %9348 = vmatpush3.bf16.msra.mxu1 %v10355_v56  ;;  %9327 = vmatprep.subr.bf16.mxu0 %v10356_v57  ;;  %v10403_v56 = vld [vmem:[#allocation6 + $0x688] sm:$0xff]   ;;  %v10404_v57 = vld [vmem:[#allocation6 + $0x650] sm:$0xff]  }
  0xe7   :  { %9349 = vmatprep.subr.bf16.mxu1 %v10357_v58  ;;  %v10405_v58 = vld [vmem:[#allocation6 + $0x6d0] sm:$0xff]  }
  0xe9   :  { %9328 = vmatpush3.bf16.msra.mxu0 %v10358_v59  ;;  %v10406_v59 = vld [vmem:[#allocation6 + $0x610] sm:$0xff]  }
  0xea   :  { %9350 = vmatpush3.bf16.msra.mxu1 %v10359_v60  ;;  %9329 = vmatprep.subr.bf16.mxu0 %v10360_v61  ;;  %v10407_v60 = vld [vmem:[#allocation6 + $0x690] sm:$0xff]   ;;  %v10408_v61 = vld [vmem:[#allocation6 + $0x658] sm:$0xff]  }
  0xeb   :  { %9351 = vmatprep.subr.bf16.mxu1 %v10361_v62  ;;  %v10409_v62 = vld [vmem:[#allocation6 + $0x6d8] sm:$0xff]  }
  0xed   :  { %9330 = vmatpush3.bf16.msra.mxu0 %v10362_v63  ;;  %v10410_v63 = vld [vmem:[#allocation6 + $0x618] sm:$0xff]  }
  0xee   :  { %9352 = vmatpush3.bf16.msra.mxu1 %v10363_v0  ;;  %9359 = vmatprep.subr.bf16.mxu0 %v10364_v9  ;;  %v10411_v0 = vld [vmem:[#allocation6 + $0x698] sm:$0xff]   ;;  %v10420_v9 = vld [vmem:[#allocation6 + $0x670] sm:$0xff]  }
  0xef   :  { %9381 = vmatprep.subr.bf16.mxu1 %v10365_v10  ;;  %v10421_v10 = vld [vmem:[#allocation6 + $0x6f0] sm:$0xff]  }
  0xf0   :  { %6769 = vmatmul.mubr.bf16.vlgmr.msra.gmra.mrb[16].mxu0 %v185_v7  ;;  %v10418_v7 = vld [vmem:[#allocation6 + $0x628] sm:$0xff]  }
  0xf1   :  { %6809 = vmatmul.mubr.bf16.vlgmr.msra.gmra.mrb[16].mxu1 %v187_v8  ;;  %9360 = vmatpush3.bf16.msra.mxu0 %v10366_v11  ;;  %v10419_v8 = vld [vmem:[#allocation6 + $0x6a8] sm:$0xff]   ;;  %v10422_v11 = vld [vmem:[#allocation6 + $0x630] sm:$0xff]  }
  0xf2   :  { %9382 = vmatpush3.bf16.msra.mxu1 %v10367_v12  ;;  %9361 = vmatprep.subr.bf16.mxu0 %v10368_v13  ;;  %v10423_v12 = vld [vmem:[#allocation6 + $0x6b0] sm:$0xff]   ;;  %v10424_v13 = vld [vmem:[#allocation6 + $0x678] sm:$0xff]  }
  0xf3   :  { %9383 = vmatprep.subr.bf16.mxu1 %v10369_v14  ;;  %6848 = vmatprep.mubr.bf16.mxu0 %v190_v42  ;;  %v10425_v14 = vld [vmem:[#allocation6 + $0x6f8] sm:$0xff]  }
  0xf4   :  { %6888 = vmatprep.mubr.bf16.mxu1 %v192_v46  ;;  %v10443_v42 = vld [vmem:[#allocation6 + $0x798] sm:$0xff]  }
  0xf5   :  { %9362 = vmatpush3.bf16.msra.mxu0 %v10370_v15  ;;  %v10426_v15 = vld [vmem:[#allocation6 + $0x638] sm:$0xff]  }
  0xf6   :  { %9384 = vmatpush3.bf16.msra.mxu1 %v10371_v16  ;;  %9363 = vmatprep.subr.bf16.mxu0 %v10372_v17  ;;  %v10427_v16 = vld [vmem:[#allocation6 + $0x6b8] sm:$0xff]   ;;  %v98_v17 = vld [vmem:[#allocation3 + $0xc8] sm:$0xff] }
  0xf7   :  { %9385 = vmatprep.subr.bf16.mxu1 %v10373_v18  ;;  %v100_v18 = vld [vmem:[#allocation3 + $0xd8] sm:$0xff] }
  0xf9   :  { %9364 = vmatpush3.bf16.msra.mxu0 %v10374_v19  ;;  %v97_v19 = vld [vmem:[#allocation3 + $0xc0] sm:$0xff] }
  0xfa   :  { %9386 = vmatpush3.bf16.msra.mxu1 %v10375_v20  ;;  %9365 = vmatprep.subr.bf16.mxu0 %v10376_v21  ;;  %v194_v20 = vpack.c.bf16 %v98_v17, %v98_v17  ;;  %v196_v21 = vpack.c.bf16 %v100_v18, %v100_v18  ;;  %v10463_v17 = vld [vmem:[#allocation6 + $0x880] sm:$0xff]   ;;  %v10464_v18 = vld [vmem:[#allocation6 + $0x848] sm:$0xff]  }
  0xfb   :  { %9387 = vmatprep.subr.bf16.mxu1 %v10377_v22  ;;  %v193_v22 = vpack.c.bf16 %v97_v19, %v97_v19  ;;  %v10465_v19 = vld [vmem:[#allocation6 + $0x8c8] sm:$0xff]  }
  0xfd   :  { %9366 = vmatpush3.bf16.msra.mxu0 %v10378_v23  ;;  %v99_v23 = vld [vmem:[#allocation3 + $0xd0] sm:$0xff] }
  0xfe   :  { %9388 = vmatpush3.bf16.msra.mxu1 %v10379_v24  ;;  %9367 = vmatprep.subr.bf16.mxu0 %v10380_v25  ;;  %v195_v24 = vpack.c.bf16 %v99_v23, %v99_v23  ;;  %v10428_v25 = vld [vmem:[#allocation6 + $0x740] sm:$0xff]   ;;  %v10469_v23 = vld [vmem:[#allocation6 + $0x8d0] sm:$0xff]  }
  0xff   :  { %9389 = vmatprep.subr.bf16.mxu1 %v10381_v26  ;;  %v10429_v26 = vld [vmem:[#allocation6 + $0x7c0] sm:$0xff]  }
 0x101   :  { %9368 = vmatpush3.bf16.msra.mxu0 %v10382_v27  ;;  %v10430_v27 = vld [vmem:[#allocation6 + $0x700] sm:$0xff]  }
 0x102   :  { %9390 = vmatpush3.bf16.msra.mxu1 %v10383_v28  ;;  %9369 = vmatprep.subr.bf16.mxu0 %v10384_v29  ;;  %v10431_v28 = vld [vmem:[#allocation6 + $0x780] sm:$0xff]   ;;  %v10432_v29 = vld [vmem:[#allocation6 + $0x748] sm:$0xff]  }
 0x103   :  { %9391 = vmatprep.subr.bf16.mxu1 %v10385_v30  ;;  %v10433_v30 = vld [vmem:[#allocation6 + $0x7c8] sm:$0xff]  }
 0x105   :  { %9370 = vmatpush3.bf16.msra.mxu0 %v10386_v31  ;;  %v10434_v31 = vld [vmem:[#allocation6 + $0x708] sm:$0xff]  }
 0x106   :  { %9392 = vmatpush3.bf16.msra.mxu1 %v10387_v32  ;;  %9371 = vmatprep.subr.bf16.mxu0 %v10388_v33  ;;  %v10435_v32 = vld [vmem:[#allocation6 + $0x788] sm:$0xff]   ;;  %v10436_v33 = vld [vmem:[#allocation6 + $0x750] sm:$0xff]  }
 0x107   :  { %9393 = vmatprep.subr.bf16.mxu1 %v10389_v34  ;;  %v10437_v34 = vld [vmem:[#allocation6 + $0x7d0] sm:$0xff]  }
 0x109   :  { %9372 = vmatpush3.bf16.msra.mxu0 %v10390_v35  ;;  %v10438_v35 = vld [vmem:[#allocation6 + $0x710] sm:$0xff]  }
 0x10a   :  { %9394 = vmatpush3.bf16.msra.mxu1 %v10391_v36  ;;  %9373 = vmatprep.subr.bf16.mxu0 %v10392_v37  ;;  %v10439_v36 = vld [vmem:[#allocation6 + $0x790] sm:$0xff]   ;;  %v10440_v37 = vld [vmem:[#allocation6 + $0x758] sm:$0xff]  }
 0x10b   :  { %9395 = vmatprep.subr.bf16.mxu1 %v10393_v38  ;;  %v10441_v38 = vld [vmem:[#allocation6 + $0x7d8] sm:$0xff]  }
 0x10d   :  { %9374 = vmatpush3.bf16.msra.mxu0 %v10394_v39 }
 0x10e   :  { %9396 = vmatpush3.bf16.msra.mxu1 %v10395_v40  ;;  %9403 = vmatprep.subr.bf16.mxu0 %v10396_v49  ;;  %v10442_v40 = vld [vmem:[#allocation6 + $0x718] sm:$0xff]  }
 0x10f   :  { %9425 = vmatprep.subr.bf16.mxu1 %v10397_v50  ;;  %v10446_v50 = vld [vmem:[#allocation6 + $0x720] sm:$0xff]  }
 0x110   :  { %6849 = vmatmul.mubr.bf16.vlgmr.msra.gmra.mrb[20].mxu0 %v189_v47  ;;  %v10445_v47 = vld [vmem:[#allocation6 + $0x7e0] sm:$0xff]  }
 0x111   :  { %6889 = vmatmul.mubr.bf16.vlgmr.msra.gmra.mrb[20].mxu1 %v191_v48  ;;  %9404 = vmatpush3.bf16.msra.mxu0 %v10398_v51 }
 0x112   :  { %9426 = vmatpush3.bf16.msra.mxu1 %v10399_v52  ;;  %9405 = vmatprep.subr.bf16.mxu0 %v10400_v53  ;;  %v10447_v52 = vld [vmem:[#allocation6 + $0x7a0] sm:$0xff]  }
 0x113   :  { %9427 = vmatprep.subr.bf16.mxu1 %v10401_v54  ;;  %6928 = vmatprep.mubr.bf16.mxu0 %v194_v20  ;;  %v8369_v53 = vld [vmem:[#allocation8] ss:$0 sm:$0xff]  ;;  %v10466_v20 = vld [vmem:[#allocation6 + $0x808] sm:$0xff]  }
 0x114   :  { %6968 = vmatprep.mubr.bf16.mxu1 %v196_v21  ;;  %v10467_v21 = vld [vmem:[#allocation6 + $0x888] sm:$0xff]  }
 0x115   :  { %9406 = vmatpush3.bf16.msra.mxu0 %v10402_v55 }
 0x116   :  { %9428 = vmatpush3.bf16.msra.mxu1 %v10403_v56  ;;  %9407 = vmatprep.subr.bf16.mxu0 %v10404_v57  ;;  %v10448_v56 = vld [vmem:[#allocation6 + $0x768] sm:$0xff]  }
 0x117   :  { %9429 = vmatprep.subr.bf16.mxu1 %v10405_v58  ;;  %v10449_v58 = vld [vmem:[#allocation6 + $0x7e8] sm:$0xff]  }
 0x119   :  { %9408 = vmatpush3.bf16.msra.mxu0 %v10406_v59 }
 0x11a   :  { %9430 = vmatpush3.bf16.msra.mxu1 %v10407_v60  ;;  %9409 = vmatprep.subr.bf16.mxu0 %v10408_v61  ;;  %v10450_v60 = vld [vmem:[#allocation6 + $0x728] sm:$0xff]  }
 0x11b   :  { %9431 = vmatprep.subr.bf16.mxu1 %v10409_v62  ;;  %v10451_v61 = vld [vmem:[#allocation6 + $0x7a8] sm:$0xff]   ;;  %v10452_v62 = vld [vmem:[#allocation6 + $0x770] sm:$0xff]  }
 0x11d   :  { %9410 = vmatpush3.bf16.msra.mxu0 %v10410_v63  ;;  %v10453_v63 = vld [vmem:[#allocation6 + $0x7f0] sm:$0xff]  }
 0x11e   :  { %9432 = vmatpush3.bf16.msra.mxu1 %v10411_v0  ;;  %9411 = vmatprep.subr.bf16.mxu0 %v10412_v1  ;;  %v10454_v0 = vld [vmem:[#allocation6 + $0x730] sm:$0xff]  }
 0x11f   :  { %9433 = vmatprep.subr.bf16.mxu1 %v10413_v2  ;;  %v10455_v1 = vld [vmem:[#allocation6 + $0x7b0] sm:$0xff]   ;;  %v10456_v2 = vld [vmem:[#allocation6 + $0x778] sm:$0xff]  }
 0x121   :  { %9412 = vmatpush3.bf16.msra.mxu0 %v10414_v3  ;;  %v10457_v3 = vld [vmem:[#allocation6 + $0x7f8] sm:$0xff]  }
 0x122   :  { %9434 = vmatpush3.bf16.msra.mxu1 %v10415_v4  ;;  %9413 = vmatprep.subr.bf16.mxu0 %v10416_v5  ;;  %v10458_v4 = vld [vmem:[#allocation6 + $0x738] sm:$0xff]  }
 0x123   :  { %9435 = vmatprep.subr.bf16.mxu1 %v10417_v6  ;;  %v10459_v5 = vld [vmem:[#allocation6 + $0x7b8] sm:$0xff]   ;;  %v102_v6 = vld [vmem:[#allocation3 + $0xe8] sm:$0xff] }
 0x125   :  { %9414 = vmatpush3.bf16.msra.mxu0 %v10418_v7  ;;  %v198_v7 = vpack.c.bf16 %v102_v6, %v102_v6  ;;  %v10496_v6 = vld [vmem:[#allocation6 + $0x948] sm:$0xff]  }
 0x126   :  { %9436 = vmatpush3.bf16.msra.mxu1 %v10419_v8  ;;  %9415 = vmatprep.subr.bf16.mxu0 %v10420_v9  ;;  %v104_v8 = vld [vmem:[#allocation3 + $0xf8] sm:$0xff]  ;;  %v101_v9 = vld [vmem:[#allocation3 + $0xe0] sm:$0xff] }
 0x127   :  { %9437 = vmatprep.subr.bf16.mxu1 %v10421_v10  ;;  %v103_v10 = vld [vmem:[#allocation3 + $0xf0] sm:$0xff] }
 0x129   :  { %9416 = vmatpush3.bf16.msra.mxu0 %v10422_v11  ;;  %v200_v11 = vpack.c.bf16 %v104_v8, %v104_v8  ;;  %v10498_v8 = vld [vmem:[#allocation6 + $0x908] sm:$0xff]  }
 0x12a   :  { %9438 = vmatpush3.bf16.msra.mxu1 %v10423_v12  ;;  %9417 = vmatprep.subr.bf16.mxu0 %v10424_v13  ;;  %v197_v12 = vpack.c.bf16 %v101_v9, %v101_v9  ;;  %v199_v13 = vpack.c.bf16 %v103_v10, %v103_v10  ;;  %v10499_v9 = vld [vmem:[#allocation6 + $0x988] sm:$0xff]   ;;  %v10500_v10 = vld [vmem:[#allocation6 + $0x950] sm:$0xff]  }
 0x12b   :  { %9439 = vmatprep.subr.bf16.mxu1 %v10425_v14  ;;  %v10460_v14 = vld [vmem:[#allocation6 + $0x840] sm:$0xff]  }
 0x12d   :  { %9418 = vmatpush3.bf16.msra.mxu0 %v10426_v15  ;;  %v10461_v15 = vld [vmem:[#allocation6 + $0x8c0] sm:$0xff]  }
 0x12e   :  { %9440 = vmatpush3.bf16.msra.mxu1 %v10427_v16  ;;  %9447 = vmatprep.subr.bf16.mxu0 %v10428_v25  ;;  %v10462_v16 = vld [vmem:[#allocation6 + $0x800] sm:$0xff]   ;;  %v10471_v25 = vld [vmem:[#allocation6 + $0x890] sm:$0xff]  }
 0x12f   :  { %9469 = vmatprep.subr.bf16.mxu1 %v10429_v26  ;;  %v10472_v26 = vld [vmem:[#allocation6 + $0x858] sm:$0xff]  }
 0x130   :  { %6929 = vmatmul.mubr.bf16.vlgmr.msra.gmra.mrb[24].mxu0 %v193_v22  ;;  %v10468_v22 = vld [vmem:[#allocation6 + $0x850] sm:$0xff]  }
 0x131   :  { %6969 = vmatmul.mubr.bf16.vlgmr.msra.gmra.mrb[24].mxu1 %v195_v24  ;;  %9448 = vmatpush3.bf16.msra.mxu0 %v10430_v27  ;;  %v10470_v24 = vld [vmem:[#allocation6 + $0x810] sm:$0xff]   ;;  %v10473_v27 = vld [vmem:[#allocation6 + $0x8d8] sm:$0xff]  }
 0x132   :  { %9470 = vmatpush3.bf16.msra.mxu1 %v10431_v28  ;;  %9449 = vmatprep.subr.bf16.mxu0 %v10432_v29  ;;  %v10474_v29 = vld [vmem:[#allocation6 + $0x818] sm:$0xff]  }
 0x133   :  { %9471 = vmatprep.subr.bf16.mxu1 %v10433_v30  ;;  %7008 = vmatprep.mubr.bf16.mxu0 %v198_v7  ;;  %v10497_v7 = vld [vmem:[#allocation6 + $0x9c8] sm:$0xff]  }
 0x134   :  { %7048 = vmatprep.mubr.bf16.mxu1 %v200_v11  ;;  %v10501_v11 = vld [vmem:[#allocation6 + $0x9d0] sm:$0xff]  }
 0x135   :  { %9450 = vmatpush3.bf16.msra.mxu0 %v10434_v31  ;;  %v10475_v31 = vld [vmem:[#allocation6 + $0x898] sm:$0xff]  }
 0x136   :  { %9472 = vmatpush3.bf16.msra.mxu1 %v10435_v32  ;;  %9451 = vmatprep.subr.bf16.mxu0 %v10436_v33  ;;  %v10476_v33 = vld [vmem:[#allocation6 + $0x860] sm:$0xff]  }
 0x137   :  { %9473 = vmatprep.subr.bf16.mxu1 %v10437_v34 }
 0x139   :  { %9452 = vmatpush3.bf16.msra.mxu0 %v10438_v35 }
 0x13a   :  { %9474 = vmatpush3.bf16.msra.mxu1 %v10439_v36  ;;  %9453 = vmatprep.subr.bf16.mxu0 %v10440_v37  ;;  %v10477_v36 = vld [vmem:[#allocation6 + $0x8e0] sm:$0xff]  }
 0x13b   :  { %9475 = vmatprep.subr.bf16.mxu1 %v10441_v38 }
 0x13d   :  { %9454 = vmatpush3.bf16.msra.mxu0 %v10442_v40 }
 0x13e   :  { %9476 = vmatpush3.bf16.msra.mxu1 %v10443_v42  ;;  %9455 = vmatprep.subr.bf16.mxu0 %v10444_v44  ;;  %v10479_v42 = vld [vmem:[#allocation6 + $0x8a0] sm:$0xff]  }
 0x13f   :  { %9477 = vmatprep.subr.bf16.mxu1 %v10445_v47  ;;  %v10481_v47 = vld [vmem:[#allocation6 + $0x8e8] sm:$0xff]  }
 0x141   :  { %9456 = vmatpush3.bf16.msra.mxu0 %v10446_v50  ;;  %v10484_v50 = vld [vmem:[#allocation6 + $0x870] sm:$0xff]  }
 0x142   :  { %9478 = vmatpush3.bf16.msra.mxu1 %v10447_v52  ;;  %9457 = vmatprep.subr.bf16.mxu0 %v10448_v56  ;;  %v10486_v52 = vld [vmem:[#allocation6 + $0x830] sm:$0xff]   ;;  %v10490_v56 = vld [vmem:[#allocation6 + $0x838] sm:$0xff]  }
 0x143   :  { %v9155_v39 = vpop.f32.mrb[0].mxu0  ;;  %9479 = vmatprep.subr.bf16.mxu1 %v10449_v58  ;;  %v106_v58 = vld [vmem:[#allocation3 + $0x108] sm:$0xff] }
 0x144   :  { %v9177_v41 = vpop.f32.mrb[0].mxu1  ;;  %v9156_v43 = vpop.f32.mrb[1].mxu0 }
 0x145   :  { %v9157_v45 = vadd.f32 %v9156_v43, %v9155_v39  ;;  %v9178_v46 = vpop.f32.mrb[1].mxu1  ;;  %v9158_v49 = vpop.f32.mrb[2].mxu0  ;;  %9458 = vmatpush3.bf16.msra.mxu0 %v10450_v60  ;;  %v10478_v39 = vld [vmem:[#allocation6 + $0x820] sm:$0xff]  }
 0x146   :  { %v9179_v48 = vadd.f32 %v9178_v46, %v9177_v41  ;;  %v9180_v51 = vpop.f32.mrb[2].mxu1  ;;  %v9159_v54 = vpop.f32.mrb[3].mxu0  ;;  %9480 = vmatpush3.bf16.msra.mxu1 %v10451_v61  ;;  %9459 = vmatprep.subr.bf16.mxu0 %v10452_v62  ;;  %v10483_v49 = vld [vmem:[#allocation6 + $0x8a8] sm:$0xff]   ;;  %v105_v60 = vld [vmem:[#allocation3 + $0x100] sm:$0xff]  ;;  %v202_v61 = vpack.c.bf16 %v106_v58, %v106_v58 }
 0x147   :  { %v6451_v55 = vadd.f32 %v9157_v45, %v8369_v53  ;;  %v9181_v57 = vpop.f32.mrb[3].mxu1  ;;  %9481 = vmatprep.subr.bf16.mxu1 %v10453_v63  ;;  %v10480_v45 = vld [vmem:[#allocation6 + $0x868] sm:$0xff]   ;;  %v10485_v51 = vld [vmem:[#allocation6 + $0x8f0] sm:$0xff]   ;;  %v10488_v54 = vld [vmem:[#allocation6 + $0x878] sm:$0xff]   ;;  %v201_v63 = vpack.c.bf16 %v105_v60, %v105_v60 }
 0x148   :  { %v10487_v53 = vld [vmem:[#allocation6 + $0x8b0] sm:$0xff]   ;;  %v10491_v57 = vld [vmem:[#allocation6 + $0x8b8] sm:$0xff]   ;;  %v10528_v58 = vld [vmem:[#allocation6 + $0xa48] sm:$0xff]  }
 0x149   :  { %v11178_v59 = vadd.f32 %v9179_v48, %v6451_v55  ;;  %9460 = vmatpush3.bf16.msra.mxu0 %v10454_v0  ;;  %v10482_v48 = vld [vmem:[#allocation6 + $0x828] sm:$0xff]   ;;  %v10489_v55 = vld [vmem:[#allocation6 + $0x8f8] sm:$0xff]   ;;  %v107_v0 = vld [vmem:[#allocation3 + $0x110] sm:$0xff] }
 0x14a   :  { %9482 = vmatpush3.bf16.msra.mxu1 %v10455_v1  ;;  %9461 = vmatprep.subr.bf16.mxu0 %v10456_v2  ;;  %v203_v1 = vpack.c.bf16 %v107_v0, %v107_v0  ;;  %v10492_v2 = vld [vmem:[#allocation6 + $0x940] sm:$0xff]   ;;  %v10530_v60 = vld [vmem:[#allocation6 + $0xa08] sm:$0xff]   ;;  %v10534_v0 = vld [vmem:[#allocation6 + $0xa10] sm:$0xff]  }
 0x14b   :  { %9483 = vmatprep.subr.bf16.mxu1 %v10457_v3  ;;  %v10493_v3 = vld [vmem:[#allocation6 + $0x9c0] sm:$0xff]  }
 0x14d   :  { %9462 = vmatpush3.bf16.msra.mxu0 %v10458_v4  ;;  %v10494_v4 = vld [vmem:[#allocation6 + $0x900] sm:$0xff]  }
 0x14e   :  { %9484 = vmatpush3.bf16.msra.mxu1 %v10459_v5  ;;  %9491 = vmatprep.subr.bf16.mxu0 %v10460_v14  ;;  %v10495_v5 = vld [vmem:[#allocation6 + $0x980] sm:$0xff]   ;;  %v10504_v14 = vld [vmem:[#allocation6 + $0x958] sm:$0xff]  }
 0x14f   :  { %9513 = vmatprep.subr.bf16.mxu1 %v10461_v15 }
 0x150   :  { %7009 = vmatmul.mubr.bf16.vlgmr.msra.gmra.mrb[28].mxu0 %v197_v12  ;;  %v10502_v12 = vld [vmem:[#allocation6 + $0x910] sm:$0xff]  }
 0x151   :  { %7049 = vmatmul.mubr.bf16.vlgmr.msra.gmra.mrb[28].mxu1 %v199_v13  ;;  %9492 = vmatpush3.bf16.msra.mxu0 %v10462_v16  ;;  %v10503_v13 = vld [vmem:[#allocation6 + $0x990] sm:$0xff]   ;;  %v10505_v16 = vld [vmem:[#allocation6 + $0x9d8] sm:$0xff]  }
 0x152   :  { %9514 = vmatpush3.bf16.msra.mxu1 %v10463_v17  ;;  %9493 = vmatprep.subr.bf16.mxu0 %v10464_v18  ;;  %v10506_v18 = vld [vmem:[#allocation6 + $0x918] sm:$0xff]  }
 0x153   :  { %9515 = vmatprep.subr.bf16.mxu1 %v10465_v19  ;;  %7088 = vmatprep.mubr.bf16.mxu0 %v202_v61  ;;  %v10531_v61 = vld [vmem:[#allocation6 + $0xa88] sm:$0xff]  }
 0x155   :  { %9494 = vmatpush3.bf16.msra.mxu0 %v10466_v20  ;;  %v10507_v20 = vld [vmem:[#allocation6 + $0x998] sm:$0xff]  }
 0x156   :  { %9516 = vmatpush3.bf16.msra.mxu1 %v10467_v21  ;;  %9495 = vmatprep.subr.bf16.mxu0 %v10468_v22 }
 0x157   :  { %9517 = vmatprep.subr.bf16.mxu1 %v10469_v23  ;;  %v10508_v23 = vld [vmem:[#allocation6 + $0x960] sm:$0xff]  }
 0x159   :  { %9496 = vmatpush3.bf16.msra.mxu0 %v10470_v24 }
 0x15a   :  { %9518 = vmatpush3.bf16.msra.mxu1 %v10471_v25  ;;  %9497 = vmatprep.subr.bf16.mxu0 %v10472_v26  ;;  %v10509_v26 = vld [vmem:[#allocation6 + $0x9e0] sm:$0xff]  }
 0x15b   :  { %9519 = vmatprep.subr.bf16.mxu1 %v10473_v27 }
 0x15d   :  { %9498 = vmatpush3.bf16.msra.mxu0 %v10474_v29  ;;  %v10510_v29 = vld [vmem:[#allocation6 + $0x920] sm:$0xff]  }
 0x15e   :  { %9520 = vmatpush3.bf16.msra.mxu1 %v10475_v31  ;;  %9499 = vmatprep.subr.bf16.mxu0 %v10476_v33  ;;  %v10511_v31 = vld [vmem:[#allocation6 + $0x9a0] sm:$0xff]  }
 0x15f   :  { %9521 = vmatprep.subr.bf16.mxu1 %v10477_v36  ;;  %v10514_v36 = vld [vmem:[#allocation6 + $0x928] sm:$0xff]  }
 0x161   :  { %9500 = vmatpush3.bf16.msra.mxu0 %v10478_v39  ;;  %v10517_v39 = vld [vmem:[#allocation6 + $0x9f0] sm:$0xff]  }
 0x162   :  { %9522 = vmatpush3.bf16.msra.mxu1 %v10479_v42  ;;  %9501 = vmatprep.subr.bf16.mxu0 %v10480_v45  ;;  %v10520_v42 = vld [vmem:[#allocation6 + $0x978] sm:$0xff]  }
 0x163   :  { %v9199_v28 = vpop.f32.mrb[4].mxu0  ;;  %9523 = vmatprep.subr.bf16.mxu1 %v10481_v47  ;;  %v10523_v45 = vld [vmem:[#allocation6 + $0x9b8] sm:$0xff]  }
 0x164   :  { %v9221_v30 = vpop.f32.mrb[4].mxu1  ;;  %v9200_v32 = vpop.f32.mrb[5].mxu0  ;;  %v112_v47 = vld [vmem:[#allocation3 + $0x138] sm:$0xff] }
 0x165   :  { %v9201_v34 = vadd.f32 %v9200_v32, %v9199_v28  ;;  %v9222_v35 = vpop.f32.mrb[5].mxu1  ;;  %v9202_v38 = vpop.f32.mrb[6].mxu0  ;;  %9502 = vmatpush3.bf16.msra.mxu0 %v10482_v48 }
 0x166   :  { %v9223_v37 = vadd.f32 %v9222_v35, %v9221_v30  ;;  %v9224_v41 = vpop.f32.mrb[6].mxu1  ;;  %v9203_v43 = vpop.f32.mrb[7].mxu0  ;;  %9524 = vmatpush3.bf16.msra.mxu1 %v10483_v49  ;;  %9503 = vmatprep.subr.bf16.mxu0 %v10484_v50  ;;  %v10513_v35 = vld [vmem:[#allocation6 + $0x9e8] sm:$0xff]   ;;  %v10516_v38 = vld [vmem:[#allocation6 + $0x970] sm:$0xff]   ;;  %v208_v49 = vpack.c.bf16 %v112_v47, %v112_v47  ;;  %v109_v50 = vld [vmem:[#allocation3 + $0x120] sm:$0xff] }
 0x167   :  { %v6531_v40 = vadd.f32 %v9201_v34, %v11178_v59  ;;  %v9225_v46 = vpop.f32.mrb[7].mxu1  ;;  %9525 = vmatprep.subr.bf16.mxu1 %v10485_v51  ;;  %v108_v59 = vld [vmem:[#allocation3 + $0x118] sm:$0xff]  ;;  %v10512_v34 = vld [vmem:[#allocation6 + $0x968] sm:$0xff]   ;;  %v10519_v41 = vld [vmem:[#allocation6 + $0x9b0] sm:$0xff]  }
 0x168   :  { %v204_v62 = vpack.c.bf16 %v108_v59, %v108_v59  ;;  %v10521_v43 = vld [vmem:[#allocation6 + $0x9f8] sm:$0xff]   ;;  %v110_v46 = vld [vmem:[#allocation3 + $0x128] sm:$0xff]  ;;  %v111_v51 = vld [vmem:[#allocation3 + $0x130] sm:$0xff] }
 0x169   :  { %v11181_v44 = vadd.f32 %v9223_v37, %v6531_v40  ;;  %9504 = vmatpush3.bf16.msra.mxu0 %v10486_v52  ;;  %v10515_v37 = vld [vmem:[#allocation6 + $0x9a8] sm:$0xff]   ;;  %v10518_v40 = vld [vmem:[#allocation6 + $0x930] sm:$0xff]   ;;  %v206_v48 = vpack.c.bf16 %v110_v46, %v110_v46  ;;  %v205_v52 = vpack.c.bf16 %v109_v50, %v109_v50 }
 0x16a   :  { %9526 = vmatpush3.bf16.msra.mxu1 %v10487_v53  ;;  %9505 = vmatprep.subr.bf16.mxu0 %v10488_v54  ;;  %v207_v53 = vpack.c.bf16 %v111_v51, %v111_v51  ;;  %v10524_v54 = vld [vmem:[#allocation6 + $0xa40] sm:$0xff]   ;;  %v10529_v59 = vld [vmem:[#allocation6 + $0xac8] sm:$0xff]   ;;  %v10564_v50 = vld [vmem:[#allocation6 + $0xb50] sm:$0xff]  }
 0x16b   :  { %9527 = vmatprep.subr.bf16.mxu1 %v10489_v55  ;;  %7128 = vmatprep.mubr.bf16.mxu1 %v204_v62  ;;  %v10525_v55 = vld [vmem:[#allocation6 + $0xac0] sm:$0xff]   ;;  %v10532_v62 = vld [vmem:[#allocation6 + $0xa50] sm:$0xff]   ;;  %v10560_v46 = vld [vmem:[#allocation6 + $0xb48] sm:$0xff]  }
 0x16c   :  { %v10561_v47 = vld [vmem:[#allocation6 + $0xbc8] sm:$0xff]   ;;  %v10565_v51 = vld [vmem:[#allocation6 + $0xbd0] sm:$0xff]  }
 0x16d   :  { %9506 = vmatpush3.bf16.msra.mxu0 %v10490_v56  ;;  %v10526_v56 = vld [vmem:[#allocation6 + $0xa00] sm:$0xff]  }
 0x16e   :  { %9528 = vmatpush3.bf16.msra.mxu1 %v10491_v57  ;;  %9535 = vmatprep.subr.bf16.mxu0 %v10492_v2  ;;  %v10527_v57 = vld [vmem:[#allocation6 + $0xa80] sm:$0xff]   ;;  %v10536_v2 = vld [vmem:[#allocation6 + $0xa58] sm:$0xff]  }
 0x16f   :  { %9557 = vmatprep.subr.bf16.mxu1 %v10493_v3  ;;  %v10537_v3 = vld [vmem:[#allocation6 + $0xad8] sm:$0xff]  }
 0x170   :  { %7089 = vmatmul.mubr.bf16.vlgmr.msra.gmra.mrb[32].mxu0 %v201_v63  ;;  %v10533_v63 = vld [vmem:[#allocation6 + $0xad0] sm:$0xff]  }
 0x171   :  { %7129 = vmatmul.mubr.bf16.vlgmr.msra.gmra.mrb[32].mxu1 %v203_v1  ;;  %9536 = vmatpush3.bf16.msra.mxu0 %v10494_v4  ;;  %v10535_v1 = vld [vmem:[#allocation6 + $0xa90] sm:$0xff]  }
 0x172   :  { %9558 = vmatpush3.bf16.msra.mxu1 %v10495_v5  ;;  %9537 = vmatprep.subr.bf16.mxu0 %v10496_v6  ;;  %v10538_v5 = vld [vmem:[#allocation6 + $0xa18] sm:$0xff]  }
 0x173   :  { %9559 = vmatprep.subr.bf16.mxu1 %v10497_v7  ;;  %7168 = vmatprep.mubr.bf16.mxu0 %v206_v48  ;;  %v10539_v7 = vld [vmem:[#allocation6 + $0xa98] sm:$0xff]   ;;  %v10562_v48 = vld [vmem:[#allocation6 + $0xb08] sm:$0xff]  }
 0x174   :  { %7208 = vmatprep.mubr.bf16.mxu1 %v208_v49  ;;  %v10563_v49 = vld [vmem:[#allocation6 + $0xb88] sm:$0xff]  }
 0x175   :  { %9538 = vmatpush3.bf16.msra.mxu0 %v10498_v8 }
 0x176   :  { %9560 = vmatpush3.bf16.msra.mxu1 %v10499_v9  ;;  %9539 = vmatprep.subr.bf16.mxu0 %v10500_v10  ;;  %v10540_v9 = vld [vmem:[#allocation6 + $0xa60] sm:$0xff]  }
 0x177   :  { %9561 = vmatprep.subr.bf16.mxu1 %v10501_v11 }
 0x179   :  { %9540 = vmatpush3.bf16.msra.mxu0 %v10502_v12  ;;  %v10541_v12 = vld [vmem:[#allocation6 + $0xae0] sm:$0xff]  }
 0x17a   :  { %9562 = vmatpush3.bf16.msra.mxu1 %v10503_v13  ;;  %9541 = vmatprep.subr.bf16.mxu0 %v10504_v14 }
 0x17b   :  { %9563 = vmatprep.subr.bf16.mxu1 %v10505_v16 }
 0x17d   :  { %9542 = vmatpush3.bf16.msra.mxu0 %v10506_v18  ;;  %v10543_v18 = vld [vmem:[#allocation6 + $0xaa0] sm:$0xff]  }
 0x17e   :  { %9564 = vmatpush3.bf16.msra.mxu1 %v10507_v20  ;;  %9543 = vmatprep.subr.bf16.mxu0 %v10508_v23  ;;  %v10545_v23 = vld [vmem:[#allocation6 + $0xae8] sm:$0xff]  }
 0x17f   :  { %9565 = vmatprep.subr.bf16.mxu1 %v10509_v26  ;;  %v10548_v26 = vld [vmem:[#allocation6 + $0xa70] sm:$0xff]  }
 0x181   :  { %9544 = vmatpush3.bf16.msra.mxu0 %v10510_v29  ;;  %v10551_v29 = vld [vmem:[#allocation6 + $0xab0] sm:$0xff]  }
 0x182   :  { %9566 = vmatpush3.bf16.msra.mxu1 %v10511_v31  ;;  %9545 = vmatprep.subr.bf16.mxu0 %v10512_v34  ;;  %v10553_v31 = vld [vmem:[#allocation6 + $0xaf8] sm:$0xff]   ;;  %v114_v34 = vld [vmem:[#allocation3 + $0x148] sm:$0xff] }
 0x183   :  { %v9243_v15 = vpop.f32.mrb[8].mxu0  ;;  %9567 = vmatprep.subr.bf16.mxu1 %v10513_v35  ;;  %v210_v35 = vpack.c.bf16 %v114_v34, %v114_v34  ;;  %v10592_v34 = vld [vmem:[#allocation6 + $0xc48] sm:$0xff]  }
 0x184   :  { %v9265_v17 = vpop.f32.mrb[8].mxu1  ;;  %v9244_v19 = vpop.f32.mrb[9].mxu0 }
 0x185   :  { %v9245_v21 = vadd.f32 %v9244_v19, %v9243_v15  ;;  %v9266_v22 = vpop.f32.mrb[9].mxu1  ;;  %v9246_v25 = vpop.f32.mrb[10].mxu0  ;;  %9546 = vmatpush3.bf16.msra.mxu0 %v10514_v36  ;;  %v10542_v15 = vld [vmem:[#allocation6 + $0xa20] sm:$0xff]   ;;  %v116_v36 = vld [vmem:[#allocation3 + $0x158] sm:$0xff] }
 0x186   :  { %v9267_v24 = vadd.f32 %v9266_v22, %v9265_v17  ;;  %v9268_v28 = vpop.f32.mrb[10].mxu1  ;;  %v9247_v30 = vpop.f32.mrb[11].mxu0  ;;  %9568 = vmatpush3.bf16.msra.mxu1 %v10515_v37  ;;  %9547 = vmatprep.subr.bf16.mxu0 %v10516_v38  ;;  %v10547_v25 = vld [vmem:[#allocation6 + $0xaa8] sm:$0xff]   ;;  %v113_v37 = vld [vmem:[#allocation3 + $0x140] sm:$0xff]  ;;  %v115_v38 = vld [vmem:[#allocation3 + $0x150] sm:$0xff] }
 0x187   :  { %v6611_v27 = vadd.f32 %v9245_v21, %v11181_v44  ;;  %v9269_v33 = vpop.f32.mrb[11].mxu1  ;;  %9569 = vmatprep.subr.bf16.mxu1 %v10517_v39  ;;  %v10522_v44 = vld [vmem:[#allocation6 + $0x938] sm:$0xff]   ;;  %v10544_v21 = vld [vmem:[#allocation6 + $0xa68] sm:$0xff]   ;;  %v10550_v28 = vld [vmem:[#allocation6 + $0xa30] sm:$0xff]   ;;  %v212_v39 = vpack.c.bf16 %v116_v36, %v116_v36 }
 0x188   :  { %v10552_v30 = vld [vmem:[#allocation6 + $0xa78] sm:$0xff]   ;;  %v10594_v36 = vld [vmem:[#allocation6 + $0xc08] sm:$0xff]  }
 0x189   :  { %v11184_v32 = vadd.f32 %v9267_v24, %v6611_v27  ;;  %9548 = vmatpush3.bf16.msra.mxu0 %v10518_v40  ;;  %v10546_v24 = vld [vmem:[#allocation6 + $0xa28] sm:$0xff]   ;;  %v10549_v27 = vld [vmem:[#allocation6 + $0xaf0] sm:$0xff]   ;;  %v10555_v33 = vld [vmem:[#allocation6 + $0xab8] sm:$0xff]   ;;  %v209_v40 = vpack.c.bf16 %v113_v37, %v113_v37 }
 0x18a   :  { %9570 = vmatpush3.bf16.msra.mxu1 %v10519_v41  ;;  %9549 = vmatprep.subr.bf16.mxu0 %v10520_v42  ;;  %v211_v41 = vpack.c.bf16 %v115_v38, %v115_v38  ;;  %v10556_v42 = vld [vmem:[#allocation6 + $0xb40] sm:$0xff]   ;;  %v10595_v37 = vld [vmem:[#allocation6 + $0xc88] sm:$0xff]   ;;  %v10596_v38 = vld [vmem:[#allocation6 + $0xc50] sm:$0xff]  }
 0x18b   :  { %9571 = vmatprep.subr.bf16.mxu1 %v10521_v43  ;;  %v10557_v43 = vld [vmem:[#allocation6 + $0xbc0] sm:$0xff]  }
 0x18d   :  { %9550 = vmatpush3.bf16.msra.mxu0 %v10522_v44  ;;  %v10558_v44 = vld [vmem:[#allocation6 + $0xb00] sm:$0xff]  }
 0x18e   :  { %9572 = vmatpush3.bf16.msra.mxu1 %v10523_v45  ;;  %9579 = vmatprep.subr.bf16.mxu0 %v10524_v54  ;;  %v10559_v45 = vld [vmem:[#allocation6 + $0xb80] sm:$0xff]   ;;  %v10568_v54 = vld [vmem:[#allocation6 + $0xb58] sm:$0xff]  }
 0x18f   :  { %9601 = vmatprep.subr.bf16.mxu1 %v10525_v55  ;;  %v10569_v55 = vld [vmem:[#allocation6 + $0xbd8] sm:$0xff]  }
 0x190   :  { %7169 = vmatmul.mubr.bf16.vlgmr.msra.gmra.mrb[36].mxu0 %v205_v52  ;;  %v10566_v52 = vld [vmem:[#allocation6 + $0xb10] sm:$0xff]  }
 0x191   :  { %7209 = vmatmul.mubr.bf16.vlgmr.msra.gmra.mrb[36].mxu1 %v207_v53  ;;  %9580 = vmatpush3.bf16.msra.mxu0 %v10526_v56  ;;  %v10567_v53 = vld [vmem:[#allocation6 + $0xb90] sm:$0xff]  }
 0x192   :  { %9602 = vmatpush3.bf16.msra.mxu1 %v10527_v57  ;;  %9581 = vmatprep.subr.bf16.mxu0 %v10528_v58  ;;  %v10570_v57 = vld [vmem:[#allocation6 + $0xb18] sm:$0xff]  }
 0x193   :  { %9603 = vmatprep.subr.bf16.mxu1 %v10529_v59  ;;  %7248 = vmatprep.mubr.bf16.mxu0 %v210_v35  ;;  %v10571_v59 = vld [vmem:[#allocation6 + $0xb98] sm:$0xff]   ;;  %v10593_v35 = vld [vmem:[#allocation6 + $0xcc8] sm:$0xff]  }
 0x194   :  { %7288 = vmatprep.mubr.bf16.mxu1 %v212_v39  ;;  %v10597_v39 = vld [vmem:[#allocation6 + $0xcd0] sm:$0xff]  }
 0x195   :  { %9582 = vmatpush3.bf16.msra.mxu0 %v10530_v60 }
 0x196   :  { %9604 = vmatpush3.bf16.msra.mxu1 %v10531_v61  ;;  %9583 = vmatprep.subr.bf16.mxu0 %v10532_v62  ;;  %v10572_v61 = vld [vmem:[#allocation6 + $0xb60] sm:$0xff]  }
 0x197   :  { %9605 = vmatprep.subr.bf16.mxu1 %v10533_v63 }
 0x199   :  { %9584 = vmatpush3.bf16.msra.mxu0 %v10534_v0  ;;  %v10573_v0 = vld [vmem:[#allocation6 + $0xbe0] sm:$0xff]  }
 0x19a   :  { %9606 = vmatpush3.bf16.msra.mxu1 %v10535_v1  ;;  %9585 = vmatprep.subr.bf16.mxu0 %v10536_v2 }
 0x19b   :  { %9607 = vmatprep.subr.bf16.mxu1 %v10537_v3  ;;  %v10574_v3 = vld [vmem:[#allocation6 + $0xb20] sm:$0xff]  }
 0x19d   :  { %9586 = vmatpush3.bf16.msra.mxu0 %v10538_v5 }
 0x19e   :  { %9608 = vmatpush3.bf16.msra.mxu1 %v10539_v7  ;;  %9587 = vmatprep.subr.bf16.mxu0 %v10540_v9  ;;  %v10576_v9 = vld [vmem:[#allocation6 + $0xb68] sm:$0xff]  }
 0x19f   :  { %9609 = vmatprep.subr.bf16.mxu1 %v10541_v12  ;;  %v10578_v12 = vld [vmem:[#allocation6 + $0xb28] sm:$0xff]  }
 0x1a1   :  { %9588 = vmatpush3.bf16.msra.mxu0 %v10542_v15  ;;  %v10581_v15 = vld [vmem:[#allocation6 + $0xbf0] sm:$0xff]  }
 0x1a2   :  { %9610 = vmatpush3.bf16.msra.mxu1 %v10543_v18  ;;  %9589 = vmatprep.subr.bf16.mxu0 %v10544_v21  ;;  %v10584_v18 = vld [vmem:[#allocation6 + $0xb78] sm:$0xff]  }
 0x1a3   :  { %v9287_v4 = vpop.f32.mrb[12].mxu0  ;;  %9611 = vmatprep.subr.bf16.mxu1 %v10545_v23  ;;  %v10587_v21 = vld [vmem:[#allocation6 + $0xbb8] sm:$0xff]  }
 0x1a4   :  { %v9309_v6 = vpop.f32.mrb[12].mxu1  ;;  %v9288_v8 = vpop.f32.mrb[13].mxu0  ;;  %v120_v23 = vld [vmem:[#allocation3 + $0x178] sm:$0xff] }
 0x1a5   :  { %v9289_v10 = vadd.f32 %v9288_v8, %v9287_v4  ;;  %v9310_v11 = vpop.f32.mrb[13].mxu1  ;;  %v9290_v14 = vpop.f32.mrb[14].mxu0  ;;  %9590 = vmatpush3.bf16.msra.mxu0 %v10546_v24  ;;  %v117_v24 = vld [vmem:[#allocation3 + $0x160] sm:$0xff] }
 0x1a6   :  { %v9311_v13 = vadd.f32 %v9310_v11, %v9309_v6  ;;  %v9312_v17 = vpop.f32.mrb[14].mxu1  ;;  %v9291_v19 = vpop.f32.mrb[15].mxu0  ;;  %9612 = vmatpush3.bf16.msra.mxu1 %v10547_v25  ;;  %9591 = vmatprep.subr.bf16.mxu0 %v10548_v26  ;;  %v10575_v6 = vld [vmem:[#allocation6 + $0xba0] sm:$0xff]   ;;  %v10577_v11 = vld [vmem:[#allocation6 + $0xbe8] sm:$0xff]   ;;  %v10580_v14 = vld [vmem:[#allocation6 + $0xb70] sm:$0xff]   ;;  %v216_v26 = vpack.c.bf16 %v120_v23, %v120_v23 }
 0x1a7   :  { %v6691_v16 = vadd.f32 %v9289_v10, %v11184_v32  ;;  %v9313_v22 = vpop.f32.mrb[15].mxu1  ;;  %9613 = vmatprep.subr.bf16.mxu1 %v10549_v27  ;;  %v10554_v32 = vld [vmem:[#allocation6 + $0xa38] sm:$0xff]   ;;  %v10583_v17 = vld [vmem:[#allocation6 + $0xbb0] sm:$0xff]   ;;  %v213_v27 = vpack.c.bf16 %v117_v24, %v117_v24  ;;  %v10625_v23 = vld [vmem:[#allocation6 + $0xdc8] sm:$0xff]  }
 0x1a8   :  { %v10585_v19 = vld [vmem:[#allocation6 + $0xbf8] sm:$0xff]   ;;  %v118_v22 = vld [vmem:[#allocation3 + $0x168] sm:$0xff] }
 0x1a9   :  { %v11187_v20 = vadd.f32 %v9311_v13, %v6691_v16  ;;  %9592 = vmatpush3.bf16.msra.mxu0 %v10550_v28  ;;  %v10579_v13 = vld [vmem:[#allocation6 + $0xba8] sm:$0xff]   ;;  %v10582_v16 = vld [vmem:[#allocation6 + $0xb30] sm:$0xff]   ;;  %v214_v25 = vpack.c.bf16 %v118_v22, %v118_v22 }
 0x1aa   :  { %9614 = vmatpush3.bf16.msra.mxu1 %v10551_v29  ;;  %9593 = vmatprep.subr.bf16.mxu0 %v10552_v30  ;;  %v119_v28 = vld [vmem:[#allocation3 + $0x170] sm:$0xff]  ;;  %v10588_v30 = vld [vmem:[#allocation6 + $0xc40] sm:$0xff]   ;;  %v10624_v22 = vld [vmem:[#allocation6 + $0xd48] sm:$0xff]  }
 0x1ab   :  { %9615 = vmatprep.subr.bf16.mxu1 %v10553_v31  ;;  %v215_v29 = vpack.c.bf16 %v119_v28, %v119_v28  ;;  %v10589_v31 = vld [vmem:[#allocation6 + $0xcc0] sm:$0xff]   ;;  %v10626_v24 = vld [vmem:[#allocation6 + $0xd08] sm:$0xff]   ;;  %v10630_v28 = vld [vmem:[#allocation6 + $0xd10] sm:$0xff]  }
 0x1ad   :  { %9594 = vmatpush3.bf16.msra.mxu0 %v10554_v32  ;;  %v10590_v32 = vld [vmem:[#allocation6 + $0xc00] sm:$0xff]  }
 0x1ae   :  { %9616 = vmatpush3.bf16.msra.mxu1 %v10555_v33  ;;  %9623 = vmatprep.subr.bf16.mxu0 %v10556_v42  ;;  %v10591_v33 = vld [vmem:[#allocation6 + $0xc80] sm:$0xff]   ;;  %v10600_v42 = vld [vmem:[#allocation6 + $0xc58] sm:$0xff]  }
 0x1af   :  { %9645 = vmatprep.subr.bf16.mxu1 %v10557_v43 }
 0x1b0   :  { %7249 = vmatmul.mubr.bf16.vlgmr.msra.gmra.mrb[40].mxu0 %v209_v40  ;;  %v10598_v40 = vld [vmem:[#allocation6 + $0xc10] sm:$0xff]  }
 0x1b1   :  { %7289 = vmatmul.mubr.bf16.vlgmr.msra.gmra.mrb[40].mxu1 %v211_v41  ;;  %9624 = vmatpush3.bf16.msra.mxu0 %v10558_v44  ;;  %v10599_v41 = vld [vmem:[#allocation6 + $0xc90] sm:$0xff]   ;;  %v10601_v44 = vld [vmem:[#allocation6 + $0xcd8] sm:$0xff]  }
 0x1b2   :  { %9646 = vmatpush3.bf16.msra.mxu1 %v10559_v45  ;;  %9625 = vmatprep.subr.bf16.mxu0 %v10560_v46  ;;  %v10602_v46 = vld [vmem:[#allocation6 + $0xc18] sm:$0xff]  }
 0x1b3   :  { %9647 = vmatprep.subr.bf16.mxu1 %v10561_v47  ;;  %7328 = vmatprep.mubr.bf16.mxu0 %v214_v25  ;;  %v10627_v25 = vld [vmem:[#allocation6 + $0xd88] sm:$0xff]  }
 0x1b4   :  { %7368 = vmatprep.mubr.bf16.mxu1 %v216_v26  ;;  %v10628_v26 = vld [vmem:[#allocation6 + $0xd50] sm:$0xff]  }
 0x1b5   :  { %9626 = vmatpush3.bf16.msra.mxu0 %v10562_v48  ;;  %v10603_v48 = vld [vmem:[#allocation6 + $0xc98] sm:$0xff]  }
 0x1b6   :  { %9648 = vmatpush3.bf16.msra.mxu1 %v10563_v49  ;;  %9627 = vmatprep.subr.bf16.mxu0 %v10564_v50 }
 0x1b7   :  { %9649 = vmatprep.subr.bf16.mxu1 %v10565_v51  ;;  %v10604_v51 = vld [vmem:[#allocation6 + $0xc60] sm:$0xff]  }
 0x1b9   :  { %9628 = vmatpush3.bf16.msra.mxu0 %v10566_v52 }
 0x1ba   :  { %9650 = vmatpush3.bf16.msra.mxu1 %v10567_v53  ;;  %9629 = vmatprep.subr.bf16.mxu0 %v10568_v54  ;;  %v10605_v54 = vld [vmem:[#allocation6 + $0xce0] sm:$0xff]  }
 0x1bb   :  { %9651 = vmatprep.subr.bf16.mxu1 %v10569_v55 }
 0x1bd   :  { %9630 = vmatpush3.bf16.msra.mxu0 %v10570_v57  ;;  %v10606_v57 = vld [vmem:[#allocation6 + $0xc20] sm:$0xff]  }
 0x1be   :  { %9652 = vmatpush3.bf16.msra.mxu1 %v10571_v59  ;;  %9631 = vmatprep.subr.bf16.mxu0 %v10572_v61  ;;  %v10607_v59 = vld [vmem:[#allocation6 + $0xca0] sm:$0xff]  }
 0x1bf   :  { %9653 = vmatprep.subr.bf16.mxu1 %v10573_v0  ;;  %v10610_v0 = vld [vmem:[#allocation6 + $0xc28] sm:$0xff]  }
 0x1c1   :  { %9632 = vmatpush3.bf16.msra.mxu0 %v10574_v3  ;;  %v10613_v3 = vld [vmem:[#allocation6 + $0xcf0] sm:$0xff]  }
 0x1c2   :  { %9654 = vmatpush3.bf16.msra.mxu1 %v10575_v6  ;;  %9633 = vmatprep.subr.bf16.mxu0 %v10576_v9  ;;  %v10616_v6 = vld [vmem:[#allocation6 + $0xc78] sm:$0xff]  }
 0x1c3   :  { %v9331_v56 = vpop.f32.mrb[16].mxu0  ;;  %9655 = vmatprep.subr.bf16.mxu1 %v10577_v11  ;;  %v10619_v9 = vld [vmem:[#allocation6 + $0xcb8] sm:$0xff]  }
 0x1c4   :  { %v9353_v58 = vpop.f32.mrb[16].mxu1  ;;  %v9332_v60 = vpop.f32.mrb[17].mxu0  ;;  %v124_v11 = vld [vmem:[#allocation3 + $0x198] sm:$0xff] }
 0x1c5   :  { %v9333_v62 = vadd.f32 %v9332_v60, %v9331_v56  ;;  %v9354_v63 = vpop.f32.mrb[17].mxu1  ;;  %v9334_v2 = vpop.f32.mrb[18].mxu0  ;;  %9634 = vmatpush3.bf16.msra.mxu0 %v10578_v12 }
 0x1c6   :  { %v9355_v1 = vadd.f32 %v9354_v63, %v9353_v58  ;;  %v9356_v5 = vpop.f32.mrb[18].mxu1  ;;  %v9335_v7 = vpop.f32.mrb[19].mxu0  ;;  %9656 = vmatpush3.bf16.msra.mxu1 %v10579_v13  ;;  %9635 = vmatprep.subr.bf16.mxu0 %v10580_v14  ;;  %v10609_v63 = vld [vmem:[#allocation6 + $0xce8] sm:$0xff]   ;;  %v10612_v2 = vld [vmem:[#allocation6 + $0xc70] sm:$0xff]   ;;  %v220_v13 = vpack.c.bf16 %v124_v11, %v124_v11  ;;  %v121_v14 = vld [vmem:[#allocation3 + $0x180] sm:$0xff] }
 0x1c7   :  { %v6771_v4 = vadd.f32 %v9333_v62, %v11187_v20  ;;  %v9357_v10 = vpop.f32.mrb[19].mxu1  ;;  %9657 = vmatprep.subr.bf16.mxu1 %v10581_v15  ;;  %v10586_v20 = vld [vmem:[#allocation6 + $0xb38] sm:$0xff]   ;;  %v10608_v62 = vld [vmem:[#allocation6 + $0xc68] sm:$0xff]   ;;  %v10615_v5 = vld [vmem:[#allocation6 + $0xcb0] sm:$0xff]  }
 0x1c8   :  { %v10617_v7 = vld [vmem:[#allocation6 + $0xcf8] sm:$0xff]   ;;  %v122_v10 = vld [vmem:[#allocation3 + $0x188] sm:$0xff]  ;;  %v123_v15 = vld [vmem:[#allocation3 + $0x190] sm:$0xff] }
 0x1c9   :  { %v11190_v8 = vadd.f32 %v9355_v1, %v6771_v4  ;;  %9636 = vmatpush3.bf16.msra.mxu0 %v10582_v16  ;;  %v10611_v1 = vld [vmem:[#allocation6 + $0xca8] sm:$0xff]   ;;  %v10614_v4 = vld [vmem:[#allocation6 + $0xc30] sm:$0xff]   ;;  %v218_v12 = vpack.c.bf16 %v122_v10, %v122_v10  ;;  %v217_v16 = vpack.c.bf16 %v121_v14, %v121_v14 }
 0x1ca   :  { %9658 = vmatpush3.bf16.msra.mxu1 %v10583_v17  ;;  %9637 = vmatprep.subr.bf16.mxu0 %v10584_v18  ;;  %v219_v17 = vpack.c.bf16 %v123_v15, %v123_v15  ;;  %v10620_v18 = vld [vmem:[#allocation6 + $0xd40] sm:$0xff]   ;;  %v10656_v10 = vld [vmem:[#allocation6 + $0xe48] sm:$0xff]   ;;  %v10660_v14 = vld [vmem:[#allocation6 + $0xe50] sm:$0xff]  }
 0x1cb   :  { %9659 = vmatprep.subr.bf16.mxu1 %v10585_v19  ;;  %v10621_v19 = vld [vmem:[#allocation6 + $0xdc0] sm:$0xff]   ;;  %v10657_v11 = vld [vmem:[#allocation6 + $0xec8] sm:$0xff]   ;;  %v10661_v15 = vld [vmem:[#allocation6 + $0xed0] sm:$0xff]  }
 0x1cd   :  { %9638 = vmatpush3.bf16.msra.mxu0 %v10586_v20  ;;  %v10622_v20 = vld [vmem:[#allocation6 + $0xd00] sm:$0xff]  }
 0x1ce   :  { %9660 = vmatpush3.bf16.msra.mxu1 %v10587_v21  ;;  %9667 = vmatprep.subr.bf16.mxu0 %v10588_v30  ;;  %v10623_v21 = vld [vmem:[#allocation6 + $0xd80] sm:$0xff]   ;;  %v10632_v30 = vld [vmem:[#allocation6 + $0xd58] sm:$0xff]  }
 0x1cf   :  { %9689 = vmatprep.subr.bf16.mxu1 %v10589_v31  ;;  %v10633_v31 = vld [vmem:[#allocation6 + $0xdd8] sm:$0xff]  }
 0x1d0   :  { %7329 = vmatmul.mubr.bf16.vlgmr.msra.gmra.mrb[44].mxu0 %v213_v27  ;;  %v10629_v27 = vld [vmem:[#allocation6 + $0xdd0] sm:$0xff]  }
 0x1d1   :  { %7369 = vmatmul.mubr.bf16.vlgmr.msra.gmra.mrb[44].mxu1 %v215_v29  ;;  %9668 = vmatpush3.bf16.msra.mxu0 %v10590_v32  ;;  %v10631_v29 = vld [vmem:[#allocation6 + $0xd90] sm:$0xff]  }
 0x1d2   :  { %9690 = vmatpush3.bf16.msra.mxu1 %v10591_v33  ;;  %9669 = vmatprep.subr.bf16.mxu0 %v10592_v34  ;;  %v10634_v33 = vld [vmem:[#allocation6 + $0xd18] sm:$0xff]  }
 0x1d3   :  { %9691 = vmatprep.subr.bf16.mxu1 %v10593_v35  ;;  %7408 = vmatprep.mubr.bf16.mxu0 %v218_v12  ;;  %v10635_v35 = vld [vmem:[#allocation6 + $0xd98] sm:$0xff]   ;;  %v10658_v12 = vld [vmem:[#allocation6 + $0xe08] sm:$0xff]  }
 0x1d4   :  { %7448 = vmatprep.mubr.bf16.mxu1 %v220_v13  ;;  %v10659_v13 = vld [vmem:[#allocation6 + $0xe88] sm:$0xff]  }
 0x1d5   :  { %9670 = vmatpush3.bf16.msra.mxu0 %v10594_v36 }
 0x1d6   :  { %9692 = vmatpush3.bf16.msra.mxu1 %v10595_v37  ;;  %9671 = vmatprep.subr.bf16.mxu0 %v10596_v38  ;;  %v10636_v37 = vld [vmem:[#allocation6 + $0xd60] sm:$0xff]  }
 0x1d7   :  { %9693 = vmatprep.subr.bf16.mxu1 %v10597_v39 }
 0x1d9   :  { %9672 = vmatpush3.bf16.msra.mxu0 %v10598_v40  ;;  %v10637_v40 = vld [vmem:[#allocation6 + $0xde0] sm:$0xff]  }
 0x1da   :  { %9694 = vmatpush3.bf16.msra.mxu1 %v10599_v41  ;;  %9673 = vmatprep.subr.bf16.mxu0 %v10600_v42 }
 0x1db   :  { %9695 = vmatprep.subr.bf16.mxu1 %v10601_v44 }
 0x1dd   :  { %9674 = vmatpush3.bf16.msra.mxu0 %v10602_v46  ;;  %v10639_v46 = vld [vmem:[#allocation6 + $0xda0] sm:$0xff]  }
 0x1de   :  { %9696 = vmatpush3.bf16.msra.mxu1 %v10603_v48  ;;  %9675 = vmatprep.subr.bf16.mxu0 %v10604_v51  ;;  %v10641_v51 = vld [vmem:[#allocation6 + $0xde8] sm:$0xff]  }
 0x1df   :  { %9697 = vmatprep.subr.bf16.mxu1 %v10605_v54  ;;  %v10644_v54 = vld [vmem:[#allocation6 + $0xd70] sm:$0xff]  }
 0x1e1   :  { %9676 = vmatpush3.bf16.msra.mxu0 %v10606_v57  ;;  %v10647_v57 = vld [vmem:[#allocation6 + $0xdb0] sm:$0xff]  }
 0x1e2   :  { %9698 = vmatpush3.bf16.msra.mxu1 %v10607_v59  ;;  %9677 = vmatprep.subr.bf16.mxu0 %v10608_v62  ;;  %v10649_v59 = vld [vmem:[#allocation6 + $0xdf8] sm:$0xff]   ;;  %v126_v62 = vld [vmem:[#allocation3 + $0x1a8] sm:$0xff] }
 0x1e3   :  { %v9375_v43 = vpop.f32.mrb[20].mxu0  ;;  %9699 = vmatprep.subr.bf16.mxu1 %v10609_v63  ;;  %v222_v63 = vpack.c.bf16 %v126_v62, %v126_v62  ;;  %v10688_v62 = vld [vmem:[#allocation6 + $0xf48] sm:$0xff]  }
 0x1e4   :  { %v9397_v45 = vpop.f32.mrb[20].mxu1  ;;  %v9376_v47 = vpop.f32.mrb[21].mxu0 }
 0x1e5   :  { %v9377_v49 = vadd.f32 %v9376_v47, %v9375_v43  ;;  %v9398_v50 = vpop.f32.mrb[21].mxu1  ;;  %v9378_v53 = vpop.f32.mrb[22].mxu0  ;;  %9678 = vmatpush3.bf16.msra.mxu0 %v10610_v0  ;;  %v10638_v43 = vld [vmem:[#allocation6 + $0xd20] sm:$0xff]   ;;  %v128_v0 = vld [vmem:[#allocation3 + $0x1b8] sm:$0xff] }
 0x1e6   :  { %v9399_v52 = vadd.f32 %v9398_v50, %v9397_v45  ;;  %v9400_v56 = vpop.f32.mrb[22].mxu1  ;;  %v9379_v58 = vpop.f32.mrb[23].mxu0  ;;  %9700 = vmatpush3.bf16.msra.mxu1 %v10611_v1  ;;  %9679 = vmatprep.subr.bf16.mxu0 %v10612_v2  ;;  %v10643_v53 = vld [vmem:[#allocation6 + $0xda8] sm:$0xff]   ;;  %v125_v1 = vld [vmem:[#allocation3 + $0x1a0] sm:$0xff]  ;;  %v127_v2 = vld [vmem:[#allocation3 + $0x1b0] sm:$0xff] }
 0x1e7   :  { %v6851_v55 = vadd.f32 %v9377_v49, %v11190_v8  ;;  %v9401_v61 = vpop.f32.mrb[23].mxu1  ;;  %9701 = vmatprep.subr.bf16.mxu1 %v10613_v3  ;;  %v10618_v8 = vld [vmem:[#allocation6 + $0xc38] sm:$0xff]   ;;  %v10640_v49 = vld [vmem:[#allocation6 + $0xd68] sm:$0xff]   ;;  %v10646_v56 = vld [vmem:[#allocation6 + $0xd30] sm:$0xff]   ;;  %v224_v3 = vpack.c.bf16 %v128_v0, %v128_v0 }
 0x1e8   :  { %v10648_v58 = vld [vmem:[#allocation6 + $0xd78] sm:$0xff]   ;;  %v10690_v0 = vld [vmem:[#allocation6 + $0xf08] sm:$0xff]  }
 0x1e9   :  { %v11193_v60 = vadd.f32 %v9399_v52, %v6851_v55  ;;  %9680 = vmatpush3.bf16.msra.mxu0 %v10614_v4  ;;  %v10642_v52 = vld [vmem:[#allocation6 + $0xd28] sm:$0xff]   ;;  %v10645_v55 = vld [vmem:[#allocation6 + $0xdf0] sm:$0xff]   ;;  %v10651_v61 = vld [vmem:[#allocation6 + $0xdb8] sm:$0xff]   ;;  %v221_v4 = vpack.c.bf16 %v125_v1, %v125_v1 }
 0x1ea   :  { %9702 = vmatpush3.bf16.msra.mxu1 %v10615_v5  ;;  %9681 = vmatprep.subr.bf16.mxu0 %v10616_v6  ;;  %v223_v5 = vpack.c.bf16 %v127_v2, %v127_v2  ;;  %v10652_v6 = vld [vmem:[#allocation6 + $0xe40] sm:$0xff]   ;;  %v10691_v1 = vld [vmem:[#allocation6 + $0xf88] sm:$0xff]   ;;  %v10692_v2 = vld [vmem:[#allocation6 + $0xf50] sm:$0xff]  }
 0x1eb   :  { %9703 = vmatprep.subr.bf16.mxu1 %v10617_v7  ;;  %v10653_v7 = vld [vmem:[#allocation6 + $0xec0] sm:$0xff]  }
 0x1ed   :  { %9682 = vmatpush3.bf16.msra.mxu0 %v10618_v8  ;;  %v10654_v8 = vld [vmem:[#allocation6 + $0xe00] sm:$0xff]  }
 0x1ee   :  { %9704 = vmatpush3.bf16.msra.mxu1 %v10619_v9  ;;  %9711 = vmatprep.subr.bf16.mxu0 %v10620_v18  ;;  %v10655_v9 = vld [vmem:[#allocation6 + $0xe80] sm:$0xff]   ;;  %v10664_v18 = vld [vmem:[#allocation6 + $0xe58] sm:$0xff]  }
 0x1ef   :  { %9733 = vmatprep.subr.bf16.mxu1 %v10621_v19  ;;  %v10665_v19 = vld [vmem:[#allocation6 + $0xed8] sm:$0xff]  }
 0x1f0   :  { %7409 = vmatmul.mubr.bf16.vlgmr.msra.gmra.mrb[48].mxu0 %v217_v16  ;;  %v10662_v16 = vld [vmem:[#allocation6 + $0xe10] sm:$0xff]  }
 0x1f1   :  { %7449 = vmatmul.mubr.bf16.vlgmr.msra.gmra.mrb[48].mxu1 %v219_v17  ;;  %9712 = vmatpush3.bf16.msra.mxu0 %v10622_v20  ;;  %v10663_v17 = vld [vmem:[#allocation6 + $0xe90] sm:$0xff]  }
 0x1f2   :  { %9734 = vmatpush3.bf16.msra.mxu1 %v10623_v21  ;;  %9713 = vmatprep.subr.bf16.mxu0 %v10624_v22  ;;  %v10666_v21 = vld [vmem:[#allocation6 + $0xe18] sm:$0xff]  }
 0x1f3   :  { %9735 = vmatprep.subr.bf16.mxu1 %v10625_v23  ;;  %7488 = vmatprep.mubr.bf16.mxu0 %v222_v63  ;;  %v10667_v23 = vld [vmem:[#allocation6 + $0xe98] sm:$0xff]   ;;  %v10689_v63 = vld [vmem:[#allocation6 + $0xfc8] sm:$0xff]  }
 0x1f4   :  { %7528 = vmatprep.mubr.bf16.mxu1 %v224_v3  ;;  %v10693_v3 = vld [vmem:[#allocation6 + $0xfd0] sm:$0xff]  }
 0x1f5   :  { %9714 = vmatpush3.bf16.msra.mxu0 %v10626_v24 }
 0x1f6   :  { %9736 = vmatpush3.bf16.msra.mxu1 %v10627_v25  ;;  %9715 = vmatprep.subr.bf16.mxu0 %v10628_v26  ;;  %v10668_v25 = vld [vmem:[#allocation6 + $0xe60] sm:$0xff]  }
 0x1f7   :  { %9737 = vmatprep.subr.bf16.mxu1 %v10629_v27 }
 0x1f9   :  { %9716 = vmatpush3.bf16.msra.mxu0 %v10630_v28  ;;  %v10669_v28 = vld [vmem:[#allocation6 + $0xee0] sm:$0xff]  }
 0x1fa   :  { %9738 = vmatpush3.bf16.msra.mxu1 %v10631_v29  ;;  %9717 = vmatprep.subr.bf16.mxu0 %v10632_v30 }
 0x1fb   :  { %9739 = vmatprep.subr.bf16.mxu1 %v10633_v31  ;;  %v10670_v31 = vld [vmem:[#allocation6 + $0xe20] sm:$0xff]  }
 0x1fd   :  { %9718 = vmatpush3.bf16.msra.mxu0 %v10634_v33 }
 0x1fe   :  { %9740 = vmatpush3.bf16.msra.mxu1 %v10635_v35  ;;  %9719 = vmatprep.subr.bf16.mxu0 %v10636_v37  ;;  %v10672_v37 = vld [vmem:[#allocation6 + $0xe68] sm:$0xff]  }
 0x1ff   :  { %9741 = vmatprep.subr.bf16.mxu1 %v10637_v40  ;;  %v10674_v40 = vld [vmem:[#allocation6 + $0xe28] sm:$0xff]  }
 0x201   :  { %9720 = vmatpush3.bf16.msra.mxu0 %v10638_v43  ;;  %v10677_v43 = vld [vmem:[#allocation6 + $0xef0] sm:$0xff]  }
 0x202   :  { %9742 = vmatpush3.bf16.msra.mxu1 %v10639_v46  ;;  %9721 = vmatprep.subr.bf16.mxu0 %v10640_v49  ;;  %v10680_v46 = vld [vmem:[#allocation6 + $0xe78] sm:$0xff]  }
 0x203   :  { %v9419_v32 = vpop.f32.mrb[24].mxu0  ;;  %9743 = vmatprep.subr.bf16.mxu1 %v10641_v51  ;;  %v10683_v49 = vld [vmem:[#allocation6 + $0xeb8] sm:$0xff]  }
 0x204   :  { %v9441_v34 = vpop.f32.mrb[24].mxu1  ;;  %v9420_v36 = vpop.f32.mrb[25].mxu0  ;;  %v132_v51 = vld [vmem:[#allocation3 + $0x1d8] sm:$0xff] }
 0x205   :  { %v9421_v38 = vadd.f32 %v9420_v36, %v9419_v32  ;;  %v9442_v39 = vpop.f32.mrb[25].mxu1  ;;  %v9422_v42 = vpop.f32.mrb[26].mxu0  ;;  %9722 = vmatpush3.bf16.msra.mxu0 %v10642_v52  ;;  %v129_v52 = vld [vmem:[#allocation3 + $0x1c0] sm:$0xff] }
 0x206   :  { %v9443_v41 = vadd.f32 %v9442_v39, %v9441_v34  ;;  %v9444_v45 = vpop.f32.mrb[26].mxu1  ;;  %v9423_v47 = vpop.f32.mrb[27].mxu0  ;;  %9744 = vmatpush3.bf16.msra.mxu1 %v10643_v53  ;;  %9723 = vmatprep.subr.bf16.mxu0 %v10644_v54  ;;  %v10671_v34 = vld [vmem:[#allocation6 + $0xea0] sm:$0xff]   ;;  %v10673_v39 = vld [vmem:[#allocation6 + $0xee8] sm:$0xff]   ;;  %v10676_v42 = vld [vmem:[#allocation6 + $0xe70] sm:$0xff]   ;;  %v228_v54 = vpack.c.bf16 %v132_v51, %v132_v51 }
 0x207   :  { %v6931_v44 = vadd.f32 %v9421_v38, %v11193_v60  ;;  %v9445_v50 = vpop.f32.mrb[27].mxu1  ;;  %9745 = vmatprep.subr.bf16.mxu1 %v10645_v55  ;;  %v10650_v60 = vld [vmem:[#allocation6 + $0xd38] sm:$0xff]   ;;  %v10679_v45 = vld [vmem:[#allocation6 + $0xeb0] sm:$0xff]   ;;  %v225_v55 = vpack.c.bf16 %v129_v52, %v129_v52  ;;  %v10721_v51 = vld [vmem:[#allocation6 + $0x10c8] sm:$0xff]  }
 0x208   :  { %v10681_v47 = vld [vmem:[#allocation6 + $0xef8] sm:$0xff]   ;;  %v130_v50 = vld [vmem:[#allocation3 + $0x1c8] sm:$0xff] }
 0x209   :  { %v11196_v48 = vadd.f32 %v9443_v41, %v6931_v44  ;;  %9724 = vmatpush3.bf16.msra.mxu0 %v10646_v56  ;;  %v10675_v41 = vld [vmem:[#allocation6 + $0xea8] sm:$0xff]   ;;  %v10678_v44 = vld [vmem:[#allocation6 + $0xe30] sm:$0xff]   ;;  %v226_v53 = vpack.c.bf16 %v130_v50, %v130_v50 }
 0x20a   :  { %9746 = vmatpush3.bf16.msra.mxu1 %v10647_v57  ;;  %9725 = vmatprep.subr.bf16.mxu0 %v10648_v58  ;;  %v131_v56 = vld [vmem:[#allocation3 + $0x1d0] sm:$0xff]  ;;  %v10684_v58 = vld [vmem:[#allocation6 + $0xf40] sm:$0xff]   ;;  %v10720_v50 = vld [vmem:[#allocation6 + $0x1048] sm:$0xff]  }
 0x20b   :  { %9747 = vmatprep.subr.bf16.mxu1 %v10649_v59  ;;  %v227_v57 = vpack.c.bf16 %v131_v56, %v131_v56  ;;  %v10685_v59 = vld [vmem:[#allocation6 + $0xfc0] sm:$0xff]   ;;  %v10722_v52 = vld [vmem:[#allocation6 + $0x1008] sm:$0xff]   ;;  %v10726_v56 = vld [vmem:[#allocation6 + $0x1010] sm:$0xff]  }
 0x20d   :  { %9726 = vmatpush3.bf16.msra.mxu0 %v10650_v60  ;;  %v10686_v60 = vld [vmem:[#allocation6 + $0xf00] sm:$0xff]  }
 0x20e   :  { %9748 = vmatpush3.bf16.msra.mxu1 %v10651_v61  ;;  %9755 = vmatprep.subr.bf16.mxu0 %v10652_v6  ;;  %v10687_v61 = vld [vmem:[#allocation6 + $0xf80] sm:$0xff]   ;;  %v10696_v6 = vld [vmem:[#allocation6 + $0xf58] sm:$0xff]  }
 0x20f   :  { %9777 = vmatprep.subr.bf16.mxu1 %v10653_v7  ;;  %v10697_v7 = vld [vmem:[#allocation6 + $0xfd8] sm:$0xff]  }
 0x210   :  { %7489 = vmatmul.mubr.bf16.vlgmr.msra.gmra.mrb[52].mxu0 %v221_v4  ;;  %v10694_v4 = vld [vmem:[#allocation6 + $0xf10] sm:$0xff]  }
 0x211   :  { %7529 = vmatmul.mubr.bf16.vlgmr.msra.gmra.mrb[52].mxu1 %v223_v5  ;;  %9756 = vmatpush3.bf16.msra.mxu0 %v10654_v8  ;;  %v10695_v5 = vld [vmem:[#allocation6 + $0xf90] sm:$0xff]  }
 0x212   :  { %9778 = vmatpush3.bf16.msra.mxu1 %v10655_v9  ;;  %9757 = vmatprep.subr.bf16.mxu0 %v10656_v10  ;;  %v10698_v9 = vld [vmem:[#allocation6 + $0xf18] sm:$0xff]  }
 0x213   :  { %9779 = vmatprep.subr.bf16.mxu1 %v10657_v11  ;;  %7568 = vmatprep.mubr.bf16.mxu0 %v226_v53  ;;  %v10699_v11 = vld [vmem:[#allocation6 + $0xf98] sm:$0xff]   ;;  %v10723_v53 = vld [vmem:[#allocation6 + $0x1088] sm:$0xff]  }
 0x214   :  { %7608 = vmatprep.mubr.bf16.mxu1 %v228_v54  ;;  %v10724_v54 = vld [vmem:[#allocation6 + $0x1050] sm:$0xff]  }
 0x215   :  { %9758 = vmatpush3.bf16.msra.mxu0 %v10658_v12 }
 0x216   :  { %9780 = vmatpush3.bf16.msra.mxu1 %v10659_v13  ;;  %9759 = vmatprep.subr.bf16.mxu0 %v10660_v14  ;;  %v10700_v13 = vld [vmem:[#allocation6 + $0xf60] sm:$0xff]  }
 0x217   :  { %9781 = vmatprep.subr.bf16.mxu1 %v10661_v15 }
 0x219   :  { %9760 = vmatpush3.bf16.msra.mxu0 %v10662_v16  ;;  %v10701_v16 = vld [vmem:[#allocation6 + $0xfe0] sm:$0xff]  }
 0x21a   :  { %9782 = vmatpush3.bf16.msra.mxu1 %v10663_v17  ;;  %9761 = vmatprep.subr.bf16.mxu0 %v10664_v18 }
 0x21b   :  { %9783 = vmatprep.subr.bf16.mxu1 %v10665_v19  ;;  %v10702_v19 = vld [vmem:[#allocation6 + $0xf20] sm:$0xff]  }
 0x21d   :  { %9762 = vmatpush3.bf16.msra.mxu0 %v10666_v21 }
 0x21e   :  { %9784 = vmatpush3.bf16.msra.mxu1 %v10667_v23  ;;  %9763 = vmatprep.subr.bf16.mxu0 %v10668_v25  ;;  %v10704_v25 = vld [vmem:[#allocation6 + $0xf68] sm:$0xff]  }
 0x21f   :  { %9785 = vmatprep.subr.bf16.mxu1 %v10669_v28  ;;  %v10706_v28 = vld [vmem:[#allocation6 + $0xf28] sm:$0xff]  }
 0x221   :  { %9764 = vmatpush3.bf16.msra.mxu0 %v10670_v31  ;;  %v10709_v31 = vld [vmem:[#allocation6 + $0xff0] sm:$0xff]  }
 0x222   :  { %9786 = vmatpush3.bf16.msra.mxu1 %v10671_v34  ;;  %9765 = vmatprep.subr.bf16.mxu0 %v10672_v37  ;;  %v10712_v34 = vld [vmem:[#allocation6 + $0xf78] sm:$0xff]  }
 0x223   :  { %v9463_v20 = vpop.f32.mrb[28].mxu0  ;;  %9787 = vmatprep.subr.bf16.mxu1 %v10673_v39  ;;  %v10715_v37 = vld [vmem:[#allocation6 + $0xfb8] sm:$0xff]  }
 0x224   :  { %v9485_v22 = vpop.f32.mrb[28].mxu1  ;;  %v9464_v24 = vpop.f32.mrb[29].mxu0  ;;  %v136_v39 = vld [vmem:[#allocation3 + $0x1f8] sm:$0xff] }
 0x225   :  { %v9465_v26 = vadd.f32 %v9464_v24, %v9463_v20  ;;  %v9486_v27 = vpop.f32.mrb[29].mxu1  ;;  %v9466_v30 = vpop.f32.mrb[30].mxu0  ;;  %9766 = vmatpush3.bf16.msra.mxu0 %v10674_v40 }
 0x226   :  { %v9487_v29 = vadd.f32 %v9486_v27, %v9485_v22  ;;  %v9488_v33 = vpop.f32.mrb[30].mxu1  ;;  %v9467_v35 = vpop.f32.mrb[31].mxu0  ;;  %9788 = vmatpush3.bf16.msra.mxu1 %v10675_v41  ;;  %9767 = vmatprep.subr.bf16.mxu0 %v10676_v42  ;;  %v10703_v22 = vld [vmem:[#allocation6 + $0xfa0] sm:$0xff]   ;;  %v10705_v27 = vld [vmem:[#allocation6 + $0xfe8] sm:$0xff]   ;;  %v10708_v30 = vld [vmem:[#allocation6 + $0xf70] sm:$0xff]   ;;  %v232_v41 = vpack.c.bf16 %v136_v39, %v136_v39 }
 0x227   :  { %v7011_v32 = vadd.f32 %v9465_v26, %v11196_v48  ;;  %v9489_v38 = vpop.f32.mrb[31].mxu1  ;;  %9789 = vmatprep.subr.bf16.mxu1 %v10677_v43  ;;  %v10682_v48 = vld [vmem:[#allocation6 + $0xe38] sm:$0xff]   ;;  %v10711_v33 = vld [vmem:[#allocation6 + $0xfb0] sm:$0xff]   ;;  %v133_v42 = vld [vmem:[#allocation3 + $0x1e0] sm:$0xff] }
 0x228   :  { %v10713_v35 = vld [vmem:[#allocation6 + $0xff8] sm:$0xff]   ;;  %v134_v38 = vld [vmem:[#allocation3 + $0x1e8] sm:$0xff]  ;;  %v135_v43 = vld [vmem:[#allocation3 + $0x1f0] sm:$0xff] }
 0x229   :  { %v11199_v36 = vadd.f32 %v9487_v29, %v7011_v32  ;;  %9768 = vmatpush3.bf16.msra.mxu0 %v10678_v44  ;;  %v10707_v29 = vld [vmem:[#allocation6 + $0xfa8] sm:$0xff]   ;;  %v10710_v32 = vld [vmem:[#allocation6 + $0xf30] sm:$0xff]   ;;  %v230_v40 = vpack.c.bf16 %v134_v38, %v134_v38  ;;  %v229_v44 = vpack.c.bf16 %v133_v42, %v133_v42 }
 0x22a   :  { %9790 = vmatpush3.bf16.msra.mxu1 %v10679_v45  ;;  %9769 = vmatprep.subr.bf16.mxu0 %v10680_v46  ;;  %v231_v45 = vpack.c.bf16 %v135_v43, %v135_v43  ;;  %v10716_v46 = vld [vmem:[#allocation6 + $0x1040] sm:$0xff]   ;;  %v10752_v38 = vld [vmem:[#allocation6 + $0x1148] sm:$0xff]   ;;  %v10756_v42 = vld [vmem:[#allocation6 + $0x1150] sm:$0xff]  }
 0x22b   :  { %9791 = vmatprep.subr.bf16.mxu1 %v10681_v47  ;;  %v10717_v47 = vld [vmem:[#allocation6 + $0x10c0] sm:$0xff]   ;;  %v10753_v39 = vld [vmem:[#allocation6 + $0x11c8] sm:$0xff]   ;;  %v10757_v43 = vld [vmem:[#allocation6 + $0x11d0] sm:$0xff]  }
 0x22d   :  { %9770 = vmatpush3.bf16.msra.mxu0 %v10682_v48  ;;  %v10718_v48 = vld [vmem:[#allocation6 + $0x1000] sm:$0xff]  }
 0x22e   :  { %9792 = vmatpush3.bf16.msra.mxu1 %v10683_v49  ;;  %9799 = vmatprep.subr.bf16.mxu0 %v10684_v58  ;;  %v10719_v49 = vld [vmem:[#allocation6 + $0x1080] sm:$0xff]   ;;  %v10728_v58 = vld [vmem:[#allocation6 + $0x1058] sm:$0xff]  }
 0x22f   :  { %9821 = vmatprep.subr.bf16.mxu1 %v10685_v59  ;;  %v10729_v59 = vld [vmem:[#allocation6 + $0x10d8] sm:$0xff]  }
 0x230   :  { %7569 = vmatmul.mubr.bf16.vlgmr.msra.gmra.mrb[56].mxu0 %v225_v55  ;;  %v10725_v55 = vld [vmem:[#allocation6 + $0x10d0] sm:$0xff]  }
 0x231   :  { %7609 = vmatmul.mubr.bf16.vlgmr.msra.gmra.mrb[56].mxu1 %v227_v57  ;;  %9800 = vmatpush3.bf16.msra.mxu0 %v10686_v60  ;;  %v10727_v57 = vld [vmem:[#allocation6 + $0x1090] sm:$0xff]  }
 0x232   :  { %9822 = vmatpush3.bf16.msra.mxu1 %v10687_v61  ;;  %9801 = vmatprep.subr.bf16.mxu0 %v10688_v62  ;;  %v10730_v61 = vld [vmem:[#allocation6 + $0x1018] sm:$0xff]  }
 0x233   :  { %9823 = vmatprep.subr.bf16.mxu1 %v10689_v63  ;;  %7648 = vmatprep.mubr.bf16.mxu0 %v230_v40  ;;  %v10731_v63 = vld [vmem:[#allocation6 + $0x1098] sm:$0xff]   ;;  %v10754_v40 = vld [vmem:[#allocation6 + $0x1108] sm:$0xff]  }
 0x234   :  { %7688 = vmatprep.mubr.bf16.mxu1 %v232_v41  ;;  %v10755_v41 = vld [vmem:[#allocation6 + $0x1188] sm:$0xff]  }
 0x235   :  { %9802 = vmatpush3.bf16.msra.mxu0 %v10690_v0 }
 0x236   :  { %9824 = vmatpush3.bf16.msra.mxu1 %v10691_v1  ;;  %9803 = vmatprep.subr.bf16.mxu0 %v10692_v2  ;;  %v10732_v1 = vld [vmem:[#allocation6 + $0x1060] sm:$0xff]  }
 0x237   :  { %9825 = vmatprep.subr.bf16.mxu1 %v10693_v3 }
 0x239   :  { %9804 = vmatpush3.bf16.msra.mxu0 %v10694_v4  ;;  %v10733_v4 = vld [vmem:[#allocation6 + $0x10e0] sm:$0xff]  }
 0x23a   :  { %9826 = vmatpush3.bf16.msra.mxu1 %v10695_v5  ;;  %9805 = vmatprep.subr.bf16.mxu0 %v10696_v6 }
 0x23b   :  { %9827 = vmatprep.subr.bf16.mxu1 %v10697_v7  ;;  %v10734_v7 = vld [vmem:[#allocation6 + $0x1020] sm:$0xff]  }
 0x23d   :  { %9806 = vmatpush3.bf16.msra.mxu0 %v10698_v9 }
 0x23e   :  { %9828 = vmatpush3.bf16.msra.mxu1 %v10699_v11  ;;  %9807 = vmatprep.subr.bf16.mxu0 %v10700_v13  ;;  %v10736_v13 = vld [vmem:[#allocation6 + $0x1068] sm:$0xff]  }
 0x23f   :  { %9829 = vmatprep.subr.bf16.mxu1 %v10701_v16  ;;  %v10738_v16 = vld [vmem:[#allocation6 + $0x1028] sm:$0xff]  }
 0x241   :  { %9808 = vmatpush3.bf16.msra.mxu0 %v10702_v19  ;;  %v10741_v19 = vld [vmem:[#allocation6 + $0x10f0] sm:$0xff]  }
 0x242   :  { %9830 = vmatpush3.bf16.msra.mxu1 %v10703_v22  ;;  %9809 = vmatprep.subr.bf16.mxu0 %v10704_v25  ;;  %v10744_v22 = vld [vmem:[#allocation6 + $0x1078] sm:$0xff]  }
 0x243   :  { %v9507_v8 = vpop.f32.mrb[32].mxu0  ;;  %9831 = vmatprep.subr.bf16.mxu1 %v10705_v27  ;;  %v10747_v25 = vld [vmem:[#allocation6 + $0x10b8] sm:$0xff]  }
 0x244   :  { %v9529_v10 = vpop.f32.mrb[32].mxu1  ;;  %v9508_v12 = vpop.f32.mrb[33].mxu0 }
 0x245   :  { %v9509_v14 = vadd.f32 %v9508_v12, %v9507_v8  ;;  %v9530_v15 = vpop.f32.mrb[33].mxu1  ;;  %v9510_v18 = vpop.f32.mrb[34].mxu0  ;;  %9810 = vmatpush3.bf16.msra.mxu0 %v10706_v28  ;;  %v140_v28 = vld [vmem:[#allocation3 + $0x218] sm:$0xff] }
 0x246   :  { %v9531_v17 = vadd.f32 %v9530_v15, %v9529_v10  ;;  %v9532_v21 = vpop.f32.mrb[34].mxu1  ;;  %v9511_v23 = vpop.f32.mrb[35].mxu0  ;;  %9832 = vmatpush3.bf16.msra.mxu1 %v10707_v29  ;;  %9811 = vmatprep.subr.bf16.mxu0 %v10708_v30  ;;  %v10735_v10 = vld [vmem:[#allocation6 + $0x10a0] sm:$0xff]   ;;  %v10737_v15 = vld [vmem:[#allocation6 + $0x10e8] sm:$0xff]   ;;  %v10740_v18 = vld [vmem:[#allocation6 + $0x1070] sm:$0xff]  }
 0x247   :  { %v7091_v20 = vadd.f32 %v9509_v14, %v11199_v36  ;;  %v9533_v26 = vpop.f32.mrb[35].mxu1  ;;  %9833 = vmatprep.subr.bf16.mxu1 %v10709_v31  ;;  %v10714_v36 = vld [vmem:[#allocation6 + $0xf38] sm:$0xff]   ;;  %v10743_v21 = vld [vmem:[#allocation6 + $0x10b0] sm:$0xff]   ;;  %v137_v29 = vld [vmem:[#allocation3 + $0x200] sm:$0xff]  ;;  %v236_v31 = vpack.c.bf16 %v140_v28, %v140_v28 }
 0x248   :  { %v10745_v23 = vld [vmem:[#allocation6 + $0x10f8] sm:$0xff]   ;;  %v138_v26 = vld [vmem:[#allocation3 + $0x208] sm:$0xff]  ;;  %v139_v30 = vld [vmem:[#allocation3 + $0x210] sm:$0xff] }
 0x249   :  { %v11202_v24 = vadd.f32 %v9531_v17, %v7091_v20  ;;  %9812 = vmatpush3.bf16.msra.mxu0 %v10710_v32  ;;  %v10739_v17 = vld [vmem:[#allocation6 + $0x10a8] sm:$0xff]   ;;  %v10742_v20 = vld [vmem:[#allocation6 + $0x1030] sm:$0xff]   ;;  %v234_v27 = vpack.c.bf16 %v138_v26, %v138_v26  ;;  %v233_v32 = vpack.c.bf16 %v137_v29, %v137_v29 }
 0x24a   :  { %9834 = vmatpush3.bf16.msra.mxu1 %v10711_v33  ;;  %9813 = vmatprep.subr.bf16.mxu0 %v10712_v34  ;;  %v235_v33 = vpack.c.bf16 %v139_v30, %v139_v30  ;;  %v10748_v34 = vld [vmem:[#allocation6 + $0x1140] sm:$0xff]   ;;  %v10784_v26 = vld [vmem:[#allocation6 + $0x1248] sm:$0xff]   ;;  %v10788_v30 = vld [vmem:[#allocation6 + $0x1250] sm:$0xff]  }
 0x24b   :  { %9835 = vmatprep.subr.bf16.mxu1 %v10713_v35  ;;  %v10749_v35 = vld [vmem:[#allocation6 + $0x11c0] sm:$0xff]   ;;  %v10786_v28 = vld [vmem:[#allocation6 + $0x1208] sm:$0xff]  }
 0x24c   :  { %v10787_v29 = vld [vmem:[#allocation6 + $0x1288] sm:$0xff]  }
 0x24d   :  { %9814 = vmatpush3.bf16.msra.mxu0 %v10714_v36  ;;  %v10750_v36 = vld [vmem:[#allocation6 + $0x1100] sm:$0xff]  }
 0x24e   :  { %9836 = vmatpush3.bf16.msra.mxu1 %v10715_v37  ;;  %9843 = vmatprep.subr.bf16.mxu0 %v10716_v46  ;;  %v10751_v37 = vld [vmem:[#allocation6 + $0x1180] sm:$0xff]   ;;  %v10760_v46 = vld [vmem:[#allocation6 + $0x1158] sm:$0xff]  }
 0x24f   :  { %9865 = vmatprep.subr.bf16.mxu1 %v10717_v47  ;;  %v10761_v47 = vld [vmem:[#allocation6 + $0x11d8] sm:$0xff]  }
 0x250   :  { %7649 = vmatmul.mubr.bf16.vlgmr.msra.gmra.mrb[60].mxu0 %v229_v44  ;;  %v10758_v44 = vld [vmem:[#allocation6 + $0x1110] sm:$0xff]  }
 0x251   :  { %7689 = vmatmul.mubr.bf16.vlgmr.msra.gmra.mrb[60].mxu1 %v231_v45  ;;  %9844 = vmatpush3.bf16.msra.mxu0 %v10718_v48  ;;  %v10759_v45 = vld [vmem:[#allocation6 + $0x1190] sm:$0xff]  }
 0x252   :  { %9866 = vmatpush3.bf16.msra.mxu1 %v10719_v49  ;;  %9845 = vmatprep.subr.bf16.mxu0 %v10720_v50  ;;  %v10762_v49 = vld [vmem:[#allocation6 + $0x1118] sm:$0xff]  }
 0x253   :  { %9867 = vmatprep.subr.bf16.mxu1 %v10721_v51  ;;  %7728 = vmatprep.mubr.bf16.mxu0 %v234_v27  ;;  %v10763_v51 = vld [vmem:[#allocation6 + $0x1198] sm:$0xff]   ;;  %v10785_v27 = vld [vmem:[#allocation6 + $0x12c8] sm:$0xff]  }
 0x254   :  { %7768 = vmatprep.mubr.bf16.mxu1 %v236_v31  ;;  %v10789_v31 = vld [vmem:[#allocation6 + $0x12d0] sm:$0xff]  }
 0x255   :  { %9846 = vmatpush3.bf16.msra.mxu0 %v10722_v52 }
 0x256   :  { %9868 = vmatpush3.bf16.msra.mxu1 %v10723_v53  ;;  %9847 = vmatprep.subr.bf16.mxu0 %v10724_v54  ;;  %v10764_v53 = vld [vmem:[#allocation6 + $0x1160] sm:$0xff]  }
 0x257   :  { %9869 = vmatprep.subr.bf16.mxu1 %v10725_v55 }
 0x259   :  { %9848 = vmatpush3.bf16.msra.mxu0 %v10726_v56  ;;  %v10765_v56 = vld [vmem:[#allocation6 + $0x11e0] sm:$0xff]  }
 0x25a   :  { %9870 = vmatpush3.bf16.msra.mxu1 %v10727_v57  ;;  %9849 = vmatprep.subr.bf16.mxu0 %v10728_v58 }
 0x25b   :  { %9871 = vmatprep.subr.bf16.mxu1 %v10729_v59  ;;  %v10766_v59 = vld [vmem:[#allocation6 + $0x1120] sm:$0xff]  }
 0x25d   :  { %9850 = vmatpush3.bf16.msra.mxu0 %v10730_v61 }
 0x25e   :  { %9872 = vmatpush3.bf16.msra.mxu1 %v10731_v63  ;;  %9851 = vmatprep.subr.bf16.mxu0 %v10732_v1  ;;  %v10768_v1 = vld [vmem:[#allocation6 + $0x1168] sm:$0xff]  }
 0x25f   :  { %9873 = vmatprep.subr.bf16.mxu1 %v10733_v4  ;;  %v10770_v4 = vld [vmem:[#allocation6 + $0x1128] sm:$0xff]  }
 0x261   :  { %9852 = vmatpush3.bf16.msra.mxu0 %v10734_v7  ;;  %v10773_v7 = vld [vmem:[#allocation6 + $0x11f0] sm:$0xff]  }
 0x262   :  { %9874 = vmatpush3.bf16.msra.mxu1 %v10735_v10  ;;  %9853 = vmatprep.subr.bf16.mxu0 %v10736_v13  ;;  %v10776_v10 = vld [vmem:[#allocation6 + $0x1178] sm:$0xff]  }
 0x263   :  { %v9551_v60 = vpop.f32.mrb[36].mxu0  ;;  %9875 = vmatprep.subr.bf16.mxu1 %v10737_v15  ;;  %v10779_v13 = vld [vmem:[#allocation6 + $0x11b8] sm:$0xff]  }
 0x264   :  { %v9573_v62 = vpop.f32.mrb[36].mxu1  ;;  %v9552_v0 = vpop.f32.mrb[37].mxu0  ;;  %v144_v15 = vld [vmem:[#allocation3 + $0x238] sm:$0xff] }
 0x265   :  { %v9553_v2 = vadd.f32 %v9552_v0, %v9551_v60  ;;  %v9574_v3 = vpop.f32.mrb[37].mxu1  ;;  %v9554_v6 = vpop.f32.mrb[38].mxu0  ;;  %9854 = vmatpush3.bf16.msra.mxu0 %v10738_v16  ;;  %v141_v16 = vld [vmem:[#allocation3 + $0x220] sm:$0xff] }
 0x266   :  { %v9575_v5 = vadd.f32 %v9574_v3, %v9573_v62  ;;  %v9576_v9 = vpop.f32.mrb[38].mxu1  ;;  %v9555_v11 = vpop.f32.mrb[39].mxu0  ;;  %9876 = vmatpush3.bf16.msra.mxu1 %v10739_v17  ;;  %9855 = vmatprep.subr.bf16.mxu0 %v10740_v18  ;;  %v10767_v62 = vld [vmem:[#allocation6 + $0x11a0] sm:$0xff]   ;;  %v10769_v3 = vld [vmem:[#allocation6 + $0x11e8] sm:$0xff]   ;;  %v10772_v6 = vld [vmem:[#allocation6 + $0x1170] sm:$0xff]   ;;  %v240_v18 = vpack.c.bf16 %v144_v15, %v144_v15 }
 0x267   :  { %v7171_v8 = vadd.f32 %v9553_v2, %v11202_v24  ;;  %v9577_v14 = vpop.f32.mrb[39].mxu1  ;;  %9877 = vmatprep.subr.bf16.mxu1 %v10741_v19  ;;  %v10746_v24 = vld [vmem:[#allocation6 + $0x1038] sm:$0xff]   ;;  %v10775_v9 = vld [vmem:[#allocation6 + $0x11b0] sm:$0xff]   ;;  %v237_v19 = vpack.c.bf16 %v141_v16, %v141_v16  ;;  %v10817_v15 = vld [vmem:[#allocation6 + $0x13c8] sm:$0xff]  }
 0x268   :  { %v10777_v11 = vld [vmem:[#allocation6 + $0x11f8] sm:$0xff]   ;;  %v142_v14 = vld [vmem:[#allocation3 + $0x228] sm:$0xff] }
 0x269   :  { %v11205_v12 = vadd.f32 %v9575_v5, %v7171_v8  ;;  %9856 = vmatpush3.bf16.msra.mxu0 %v10742_v20  ;;  %v10771_v5 = vld [vmem:[#allocation6 + $0x11a8] sm:$0xff]   ;;  %v10774_v8 = vld [vmem:[#allocation6 + $0x1130] sm:$0xff]   ;;  %v238_v17 = vpack.c.bf16 %v142_v14, %v142_v14 }
 0x26a   :  { %9878 = vmatpush3.bf16.msra.mxu1 %v10743_v21  ;;  %9857 = vmatprep.subr.bf16.mxu0 %v10744_v22  ;;  %v143_v20 = vld [vmem:[#allocation3 + $0x230] sm:$0xff]  ;;  %v10780_v22 = vld [vmem:[#allocation6 + $0x1240] sm:$0xff]   ;;  %v10816_v14 = vld [vmem:[#allocation6 + $0x1348] sm:$0xff]  }
 0x26b   :  { %9879 = vmatprep.subr.bf16.mxu1 %v10745_v23  ;;  %v239_v21 = vpack.c.bf16 %v143_v20, %v143_v20  ;;  %v10781_v23 = vld [vmem:[#allocation6 + $0x12c0] sm:$0xff]   ;;  %v10818_v16 = vld [vmem:[#allocation6 + $0x1308] sm:$0xff]   ;;  %v10822_v20 = vld [vmem:[#allocation6 + $0x1310] sm:$0xff]  }
 0x26d   :  { %9858 = vmatpush3.bf16.msra.mxu0 %v10746_v24  ;;  %v10782_v24 = vld [vmem:[#allocation6 + $0x1200] sm:$0xff]  }
 0x26e   :  { %9880 = vmatpush3.bf16.msra.mxu1 %v10747_v25  ;;  %9887 = vmatprep.subr.bf16.mxu0 %v10748_v34  ;;  %v10783_v25 = vld [vmem:[#allocation6 + $0x1280] sm:$0xff]   ;;  %v10792_v34 = vld [vmem:[#allocation6 + $0x1258] sm:$0xff]  }
 0x26f   :  { %9909 = vmatprep.subr.bf16.mxu1 %v10749_v35  ;;  %v10793_v35 = vld [vmem:[#allocation6 + $0x12d8] sm:$0xff]  }
 0x270   :  { %7729 = vmatmul.mubr.bf16.vlgmr.msra.gmra.mrb[64].mxu0 %v233_v32  ;;  %v10790_v32 = vld [vmem:[#allocation6 + $0x1210] sm:$0xff]  }
 0x271   :  { %7769 = vmatmul.mubr.bf16.vlgmr.msra.gmra.mrb[64].mxu1 %v235_v33  ;;  %9888 = vmatpush3.bf16.msra.mxu0 %v10750_v36  ;;  %v10791_v33 = vld [vmem:[#allocation6 + $0x1290] sm:$0xff]  }
 0x272   :  { %9910 = vmatpush3.bf16.msra.mxu1 %v10751_v37  ;;  %9889 = vmatprep.subr.bf16.mxu0 %v10752_v38  ;;  %v10794_v37 = vld [vmem:[#allocation6 + $0x1218] sm:$0xff]  }
 0x273   :  { %9911 = vmatprep.subr.bf16.mxu1 %v10753_v39  ;;  %7808 = vmatprep.mubr.bf16.mxu0 %v238_v17  ;;  %v10795_v39 = vld [vmem:[#allocation6 + $0x1298] sm:$0xff]   ;;  %v10819_v17 = vld [vmem:[#allocation6 + $0x1388] sm:$0xff]  }
 0x274   :  { %7848 = vmatprep.mubr.bf16.mxu1 %v240_v18  ;;  %v10820_v18 = vld [vmem:[#allocation6 + $0x1350] sm:$0xff]  }
 0x275   :  { %9890 = vmatpush3.bf16.msra.mxu0 %v10754_v40 }
 0x276   :  { %9912 = vmatpush3.bf16.msra.mxu1 %v10755_v41  ;;  %9891 = vmatprep.subr.bf16.mxu0 %v10756_v42  ;;  %v10796_v41 = vld [vmem:[#allocation6 + $0x1260] sm:$0xff]  }
 0x277   :  { %9913 = vmatprep.subr.bf16.mxu1 %v10757_v43 }
 0x279   :  { %9892 = vmatpush3.bf16.msra.mxu0 %v10758_v44  ;;  %v10797_v44 = vld [vmem:[#allocation6 + $0x12e0] sm:$0xff]  }
 0x27a   :  { %9914 = vmatpush3.bf16.msra.mxu1 %v10759_v45  ;;  %9893 = vmatprep.subr.bf16.mxu0 %v10760_v46 }
 0x27b   :  { %9915 = vmatprep.subr.bf16.mxu1 %v10761_v47  ;;  %v10798_v47 = vld [vmem:[#allocation6 + $0x1220] sm:$0xff]  }
 0x27d   :  { %9894 = vmatpush3.bf16.msra.mxu0 %v10762_v49 }
 0x27e   :  { %9916 = vmatpush3.bf16.msra.mxu1 %v10763_v51  ;;  %9895 = vmatprep.subr.bf16.mxu0 %v10764_v53  ;;  %v10800_v53 = vld [vmem:[#allocation6 + $0x1268] sm:$0xff]  }
 0x27f   :  { %9917 = vmatprep.subr.bf16.mxu1 %v10765_v56  ;;  %v10802_v56 = vld [vmem:[#allocation6 + $0x1228] sm:$0xff]  }
 0x281   :  { %9896 = vmatpush3.bf16.msra.mxu0 %v10766_v59  ;;  %v10805_v59 = vld [vmem:[#allocation6 + $0x12f0] sm:$0xff]  }
 0x282   :  { %9918 = vmatpush3.bf16.msra.mxu1 %v10767_v62  ;;  %9897 = vmatprep.subr.bf16.mxu0 %v10768_v1  ;;  %v10808_v62 = vld [vmem:[#allocation6 + $0x1278] sm:$0xff]  }
 0x283   :  { %v9595_v48 = vpop.f32.mrb[40].mxu0  ;;  %9919 = vmatprep.subr.bf16.mxu1 %v10769_v3  ;;  %v10811_v1 = vld [vmem:[#allocation6 + $0x12b8] sm:$0xff]  }
 0x284   :  { %v9617_v50 = vpop.f32.mrb[40].mxu1  ;;  %v9596_v52 = vpop.f32.mrb[41].mxu0  ;;  %v148_v3 = vld [vmem:[#allocation3 + $0x258] sm:$0xff] }
 0x285   :  { %v9597_v54 = vadd.f32 %v9596_v52, %v9595_v48  ;;  %v9618_v55 = vpop.f32.mrb[41].mxu1  ;;  %v9598_v58 = vpop.f32.mrb[42].mxu0  ;;  %9898 = vmatpush3.bf16.msra.mxu0 %v10770_v4 }
 0x286   :  { %v9619_v57 = vadd.f32 %v9618_v55, %v9617_v50  ;;  %v9620_v61 = vpop.f32.mrb[42].mxu1  ;;  %v9599_v63 = vpop.f32.mrb[43].mxu0  ;;  %9920 = vmatpush3.bf16.msra.mxu1 %v10771_v5  ;;  %9899 = vmatprep.subr.bf16.mxu0 %v10772_v6  ;;  %v10799_v50 = vld [vmem:[#allocation6 + $0x12a0] sm:$0xff]   ;;  %v10801_v55 = vld [vmem:[#allocation6 + $0x12e8] sm:$0xff]   ;;  %v10804_v58 = vld [vmem:[#allocation6 + $0x1270] sm:$0xff]   ;;  %v244_v5 = vpack.c.bf16 %v148_v3, %v148_v3 }
 0x287   :  { %v7251_v60 = vadd.f32 %v9597_v54, %v11205_v12  ;;  %v9621_v2 = vpop.f32.mrb[43].mxu1  ;;  %9921 = vmatprep.subr.bf16.mxu1 %v10773_v7  ;;  %v10778_v12 = vld [vmem:[#allocation6 + $0x1138] sm:$0xff]   ;;  %v10807_v61 = vld [vmem:[#allocation6 + $0x12b0] sm:$0xff]   ;;  %v145_v6 = vld [vmem:[#allocation3 + $0x240] sm:$0xff] }
 0x288   :  { %v10809_v63 = vld [vmem:[#allocation6 + $0x12f8] sm:$0xff]   ;;  %v146_v2 = vld [vmem:[#allocation3 + $0x248] sm:$0xff]  ;;  %v147_v7 = vld [vmem:[#allocation3 + $0x250] sm:$0xff] }
 0x289   :  { %v11208_v0 = vadd.f32 %v9619_v57, %v7251_v60  ;;  %9900 = vmatpush3.bf16.msra.mxu0 %v10774_v8  ;;  %v10803_v57 = vld [vmem:[#allocation6 + $0x12a8] sm:$0xff]   ;;  %v10806_v60 = vld [vmem:[#allocation6 + $0x1230] sm:$0xff]   ;;  %v242_v4 = vpack.c.bf16 %v146_v2, %v146_v2  ;;  %v241_v8 = vpack.c.bf16 %v145_v6, %v145_v6 }
 0x28a   :  { %9922 = vmatpush3.bf16.msra.mxu1 %v10775_v9  ;;  %9901 = vmatprep.subr.bf16.mxu0 %v10776_v10  ;;  %v243_v9 = vpack.c.bf16 %v147_v7, %v147_v7  ;;  %v10812_v10 = vld [vmem:[#allocation6 + $0x1340] sm:$0xff]   ;;  %v10848_v2 = vld [vmem:[#allocation6 + $0x1448] sm:$0xff]   ;;  %v10852_v6 = vld [vmem:[#allocation6 + $0x1450] sm:$0xff]  }
 0x28b   :  { %9923 = vmatprep.subr.bf16.mxu1 %v10777_v11  ;;  %v10813_v11 = vld [vmem:[#allocation6 + $0x13c0] sm:$0xff]   ;;  %v10849_v3 = vld [vmem:[#allocation6 + $0x14c8] sm:$0xff]   ;;  %v10853_v7 = vld [vmem:[#allocation6 + $0x14d0] sm:$0xff]  }
 0x28d   :  { %9902 = vmatpush3.bf16.msra.mxu0 %v10778_v12  ;;  %v10814_v12 = vld [vmem:[#allocation6 + $0x1300] sm:$0xff]  }
 0x28e   :  { %9924 = vmatpush3.bf16.msra.mxu1 %v10779_v13  ;;  %9931 = vmatprep.subr.bf16.mxu0 %v10780_v22  ;;  %v10815_v13 = vld [vmem:[#allocation6 + $0x1380] sm:$0xff]   ;;  %v10824_v22 = vld [vmem:[#allocation6 + $0x1358] sm:$0xff]  }
 0x28f   :  { %9953 = vmatprep.subr.bf16.mxu1 %v10781_v23  ;;  %v10825_v23 = vld [vmem:[#allocation6 + $0x13d8] sm:$0xff]  }
 0x290   :  { %7809 = vmatmul.mubr.bf16.vlgmr.msra.gmra.mrb[68].mxu0 %v237_v19  ;;  %v10821_v19 = vld [vmem:[#allocation6 + $0x13d0] sm:$0xff]  }
 0x291   :  { %7849 = vmatmul.mubr.bf16.vlgmr.msra.gmra.mrb[68].mxu1 %v239_v21  ;;  %9932 = vmatpush3.bf16.msra.mxu0 %v10782_v24  ;;  %v10823_v21 = vld [vmem:[#allocation6 + $0x1390] sm:$0xff]  }
 0x292   :  { %9954 = vmatpush3.bf16.msra.mxu1 %v10783_v25  ;;  %9933 = vmatprep.subr.bf16.mxu0 %v10784_v26  ;;  %v10826_v25 = vld [vmem:[#allocation6 + $0x1318] sm:$0xff]  }
 0x293   :  { %9955 = vmatprep.subr.bf16.mxu1 %v10785_v27  ;;  %7888 = vmatprep.mubr.bf16.mxu0 %v242_v4  ;;  %v10827_v27 = vld [vmem:[#allocation6 + $0x1398] sm:$0xff]   ;;  %v10850_v4 = vld [vmem:[#allocation6 + $0x1408] sm:$0xff]  }
 0x294   :  { %7928 = vmatprep.mubr.bf16.mxu1 %v244_v5  ;;  %v10851_v5 = vld [vmem:[#allocation6 + $0x1488] sm:$0xff]  }
 0x295   :  { %9934 = vmatpush3.bf16.msra.mxu0 %v10786_v28 }
 0x296   :  { %9956 = vmatpush3.bf16.msra.mxu1 %v10787_v29  ;;  %9935 = vmatprep.subr.bf16.mxu0 %v10788_v30  ;;  %v10828_v29 = vld [vmem:[#allocation6 + $0x1360] sm:$0xff]  }
 0x297   :  { %9957 = vmatprep.subr.bf16.mxu1 %v10789_v31 }
 0x299   :  { %9936 = vmatpush3.bf16.msra.mxu0 %v10790_v32  ;;  %v10829_v32 = vld [vmem:[#allocation6 + $0x13e0] sm:$0xff]  }
 0x29a   :  { %9958 = vmatpush3.bf16.msra.mxu1 %v10791_v33  ;;  %9937 = vmatprep.subr.bf16.mxu0 %v10792_v34 }
 0x29b   :  { %9959 = vmatprep.subr.bf16.mxu1 %v10793_v35  ;;  %v10830_v35 = vld [vmem:[#allocation6 + $0x1320] sm:$0xff]  }
 0x29d   :  { %9938 = vmatpush3.bf16.msra.mxu0 %v10794_v37 }
 0x29e   :  { %9960 = vmatpush3.bf16.msra.mxu1 %v10795_v39  ;;  %9939 = vmatprep.subr.bf16.mxu0 %v10796_v41  ;;  %v10832_v41 = vld [vmem:[#allocation6 + $0x1368] sm:$0xff]  }
 0x29f   :  { %9961 = vmatprep.subr.bf16.mxu1 %v10797_v44  ;;  %v10834_v44 = vld [vmem:[#allocation6 + $0x1328] sm:$0xff]  }
 0x2a1   :  { %9940 = vmatpush3.bf16.msra.mxu0 %v10798_v47  ;;  %v10837_v47 = vld [vmem:[#allocation6 + $0x13f0] sm:$0xff]  }
 0x2a2   :  { %9962 = vmatpush3.bf16.msra.mxu1 %v10799_v50  ;;  %9941 = vmatprep.subr.bf16.mxu0 %v10800_v53  ;;  %v10840_v50 = vld [vmem:[#allocation6 + $0x1378] sm:$0xff]  }
 0x2a3   :  { %v9639_v36 = vpop.f32.mrb[44].mxu0  ;;  %9963 = vmatprep.subr.bf16.mxu1 %v10801_v55  ;;  %v10843_v53 = vld [vmem:[#allocation6 + $0x13b8] sm:$0xff]  }
 0x2a4   :  { %v9661_v38 = vpop.f32.mrb[44].mxu1  ;;  %v9640_v40 = vpop.f32.mrb[45].mxu0 }
 0x2a5   :  { %v9641_v42 = vadd.f32 %v9640_v40, %v9639_v36  ;;  %v9662_v43 = vpop.f32.mrb[45].mxu1  ;;  %v9642_v46 = vpop.f32.mrb[46].mxu0  ;;  %9942 = vmatpush3.bf16.msra.mxu0 %v10802_v56  ;;  %v152_v56 = vld [vmem:[#allocation3 + $0x278] sm:$0xff] }
 0x2a6   :  { %v9663_v45 = vadd.f32 %v9662_v43, %v9661_v38  ;;  %v9664_v49 = vpop.f32.mrb[46].mxu1  ;;  %v9643_v51 = vpop.f32.mrb[47].mxu0  ;;  %9964 = vmatpush3.bf16.msra.mxu1 %v10803_v57  ;;  %9943 = vmatprep.subr.bf16.mxu0 %v10804_v58  ;;  %v10831_v38 = vld [vmem:[#allocation6 + $0x13a0] sm:$0xff]   ;;  %v10833_v43 = vld [vmem:[#allocation6 + $0x13e8] sm:$0xff]   ;;  %v10836_v46 = vld [vmem:[#allocation6 + $0x1370] sm:$0xff]  }
 0x2a7   :  { %v7331_v48 = vadd.f32 %v9641_v42, %v11208_v0  ;;  %v9665_v54 = vpop.f32.mrb[47].mxu1  ;;  %9965 = vmatprep.subr.bf16.mxu1 %v10805_v59  ;;  %v10810_v0 = vld [vmem:[#allocation6 + $0x1238] sm:$0xff]   ;;  %v10839_v49 = vld [vmem:[#allocation6 + $0x13b0] sm:$0xff]   ;;  %v149_v57 = vld [vmem:[#allocation3 + $0x260] sm:$0xff]  ;;  %v248_v59 = vpack.c.bf16 %v152_v56, %v152_v56 }
 0x2a8   :  { %v10841_v51 = vld [vmem:[#allocation6 + $0x13f8] sm:$0xff]   ;;  %v150_v54 = vld [vmem:[#allocation3 + $0x268] sm:$0xff]  ;;  %v151_v58 = vld [vmem:[#allocation3 + $0x270] sm:$0xff] }
 0x2a9   :  { %v11211_v52 = vadd.f32 %v9663_v45, %v7331_v48  ;;  %9944 = vmatpush3.bf16.msra.mxu0 %v10806_v60  ;;  %v10835_v45 = vld [vmem:[#allocation6 + $0x13a8] sm:$0xff]   ;;  %v10838_v48 = vld [vmem:[#allocation6 + $0x1330] sm:$0xff]   ;;  %v246_v55 = vpack.c.bf16 %v150_v54, %v150_v54  ;;  %v245_v60 = vpack.c.bf16 %v149_v57, %v149_v57 }
 0x2aa   :  { %9966 = vmatpush3.bf16.msra.mxu1 %v10807_v61  ;;  %9945 = vmatprep.subr.bf16.mxu0 %v10808_v62  ;;  %v247_v61 = vpack.c.bf16 %v151_v58, %v151_v58  ;;  %v10844_v62 = vld [vmem:[#allocation6 + $0x1440] sm:$0xff]   ;;  %v10880_v54 = vld [vmem:[#allocation6 + $0x1548] sm:$0xff]   ;;  %v10884_v58 = vld [vmem:[#allocation6 + $0x1550] sm:$0xff]  }
 0x2ab   :  { %9967 = vmatprep.subr.bf16.mxu1 %v10809_v63  ;;  %v10845_v63 = vld [vmem:[#allocation6 + $0x14c0] sm:$0xff]   ;;  %v10882_v56 = vld [vmem:[#allocation6 + $0x1508] sm:$0xff]  }
 0x2ac   :  { %v10883_v57 = vld [vmem:[#allocation6 + $0x1588] sm:$0xff]  }
 0x2ad   :  { %9946 = vmatpush3.bf16.msra.mxu0 %v10810_v0  ;;  %v10846_v0 = vld [vmem:[#allocation6 + $0x1400] sm:$0xff]  }
 0x2ae   :  { %9968 = vmatpush3.bf16.msra.mxu1 %v10811_v1  ;;  %9975 = vmatprep.subr.bf16.mxu0 %v10812_v10  ;;  %v10847_v1 = vld [vmem:[#allocation6 + $0x1480] sm:$0xff]   ;;  %v10856_v10 = vld [vmem:[#allocation6 + $0x1458] sm:$0xff]  }
 0x2af   :  { %9997 = vmatprep.subr.bf16.mxu1 %v10813_v11  ;;  %v10857_v11 = vld [vmem:[#allocation6 + $0x14d8] sm:$0xff]  }
 0x2b0   :  { %7889 = vmatmul.mubr.bf16.vlgmr.msra.gmra.mrb[72].mxu0 %v241_v8  ;;  %v10854_v8 = vld [vmem:[#allocation6 + $0x1410] sm:$0xff]  }
 0x2b1   :  { %7929 = vmatmul.mubr.bf16.vlgmr.msra.gmra.mrb[72].mxu1 %v243_v9  ;;  %9976 = vmatpush3.bf16.msra.mxu0 %v10814_v12  ;;  %v10855_v9 = vld [vmem:[#allocation6 + $0x1490] sm:$0xff]  }
 0x2b2   :  { %9998 = vmatpush3.bf16.msra.mxu1 %v10815_v13  ;;  %9977 = vmatprep.subr.bf16.mxu0 %v10816_v14  ;;  %v10858_v13 = vld [vmem:[#allocation6 + $0x1418] sm:$0xff]  }
 0x2b3   :  { %9999 = vmatprep.subr.bf16.mxu1 %v10817_v15  ;;  %7968 = vmatprep.mubr.bf16.mxu0 %v246_v55  ;;  %v10859_v15 = vld [vmem:[#allocation6 + $0x1498] sm:$0xff]   ;;  %v10881_v55 = vld [vmem:[#allocation6 + $0x15c8] sm:$0xff]  }
 0x2b4   :  { %8008 = vmatprep.mubr.bf16.mxu1 %v248_v59  ;;  %v10885_v59 = vld [vmem:[#allocation6 + $0x15d0] sm:$0xff]  }
 0x2b5   :  { %9978 = vmatpush3.bf16.msra.mxu0 %v10818_v16 }
 0x2b6   :  { %10000 = vmatpush3.bf16.msra.mxu1 %v10819_v17  ;;  %9979 = vmatprep.subr.bf16.mxu0 %v10820_v18  ;;  %v10860_v17 = vld [vmem:[#allocation6 + $0x1460] sm:$0xff]  }
 0x2b7   :  { %10001 = vmatprep.subr.bf16.mxu1 %v10821_v19 }
 0x2b9   :  { %9980 = vmatpush3.bf16.msra.mxu0 %v10822_v20  ;;  %v10861_v20 = vld [vmem:[#allocation6 + $0x14e0] sm:$0xff]  }
 0x2ba   :  { %10002 = vmatpush3.bf16.msra.mxu1 %v10823_v21  ;;  %9981 = vmatprep.subr.bf16.mxu0 %v10824_v22 }
 0x2bb   :  { %10003 = vmatprep.subr.bf16.mxu1 %v10825_v23  ;;  %v10862_v23 = vld [vmem:[#allocation6 + $0x1420] sm:$0xff]  }
 0x2bd   :  { %9982 = vmatpush3.bf16.msra.mxu0 %v10826_v25 }
 0x2be   :  { %10004 = vmatpush3.bf16.msra.mxu1 %v10827_v27  ;;  %9983 = vmatprep.subr.bf16.mxu0 %v10828_v29  ;;  %v10864_v29 = vld [vmem:[#allocation6 + $0x1468] sm:$0xff]  }
 0x2bf   :  { %10005 = vmatprep.subr.bf16.mxu1 %v10829_v32  ;;  %v10866_v32 = vld [vmem:[#allocation6 + $0x1428] sm:$0xff]  }
 0x2c1   :  { %9984 = vmatpush3.bf16.msra.mxu0 %v10830_v35  ;;  %v10869_v35 = vld [vmem:[#allocation6 + $0x14f0] sm:$0xff]  }
 0x2c2   :  { %10006 = vmatpush3.bf16.msra.mxu1 %v10831_v38  ;;  %9985 = vmatprep.subr.bf16.mxu0 %v10832_v41  ;;  %v10872_v38 = vld [vmem:[#allocation6 + $0x1478] sm:$0xff]  }
 0x2c3   :  { %v9683_v24 = vpop.f32.mrb[48].mxu0  ;;  %10007 = vmatprep.subr.bf16.mxu1 %v10833_v43  ;;  %v10875_v41 = vld [vmem:[#allocation6 + $0x14b8] sm:$0xff]  }
 0x2c4   :  { %v9705_v26 = vpop.f32.mrb[48].mxu1  ;;  %v9684_v28 = vpop.f32.mrb[49].mxu0  ;;  %v156_v43 = vld [vmem:[#allocation3 + $0x298] sm:$0xff] }
 0x2c5   :  { %v9685_v30 = vadd.f32 %v9684_v28, %v9683_v24  ;;  %v9706_v31 = vpop.f32.mrb[49].mxu1  ;;  %v9686_v34 = vpop.f32.mrb[50].mxu0  ;;  %9986 = vmatpush3.bf16.msra.mxu0 %v10834_v44  ;;  %v153_v44 = vld [vmem:[#allocation3 + $0x280] sm:$0xff] }
 0x2c6   :  { %v9707_v33 = vadd.f32 %v9706_v31, %v9705_v26  ;;  %v9708_v37 = vpop.f32.mrb[50].mxu1  ;;  %v9687_v39 = vpop.f32.mrb[51].mxu0  ;;  %10008 = vmatpush3.bf16.msra.mxu1 %v10835_v45  ;;  %9987 = vmatprep.subr.bf16.mxu0 %v10836_v46  ;;  %v10863_v26 = vld [vmem:[#allocation6 + $0x14a0] sm:$0xff]   ;;  %v10865_v31 = vld [vmem:[#allocation6 + $0x14e8] sm:$0xff]   ;;  %v10868_v34 = vld [vmem:[#allocation6 + $0x1470] sm:$0xff]   ;;  %v252_v46 = vpack.c.bf16 %v156_v43, %v156_v43 }
 0x2c7   :  { %v7411_v36 = vadd.f32 %v9685_v30, %v11211_v52  ;;  %v9709_v42 = vpop.f32.mrb[51].mxu1  ;;  %10009 = vmatprep.subr.bf16.mxu1 %v10837_v47  ;;  %v10842_v52 = vld [vmem:[#allocation6 + $0x1338] sm:$0xff]   ;;  %v10871_v37 = vld [vmem:[#allocation6 + $0x14b0] sm:$0xff]   ;;  %v249_v47 = vpack.c.bf16 %v153_v44, %v153_v44  ;;  %v10913_v43 = vld [vmem:[#allocation6 + $0x16c8] sm:$0xff]  }
 0x2c8   :  { %v10873_v39 = vld [vmem:[#allocation6 + $0x14f8] sm:$0xff]   ;;  %v154_v42 = vld [vmem:[#allocation3 + $0x288] sm:$0xff] }
 0x2c9   :  { %v11214_v40 = vadd.f32 %v9707_v33, %v7411_v36  ;;  %9988 = vmatpush3.bf16.msra.mxu0 %v10838_v48  ;;  %v10867_v33 = vld [vmem:[#allocation6 + $0x14a8] sm:$0xff]   ;;  %v10870_v36 = vld [vmem:[#allocation6 + $0x1430] sm:$0xff]   ;;  %v250_v45 = vpack.c.bf16 %v154_v42, %v154_v42 }
 0x2ca   :  { %10010 = vmatpush3.bf16.msra.mxu1 %v10839_v49  ;;  %9989 = vmatprep.subr.bf16.mxu0 %v10840_v50  ;;  %v155_v48 = vld [vmem:[#allocation3 + $0x290] sm:$0xff]  ;;  %v10876_v50 = vld [vmem:[#allocation6 + $0x1540] sm:$0xff]   ;;  %v10912_v42 = vld [vmem:[#allocation6 + $0x1648] sm:$0xff]  }
 0x2cb   :  { %10011 = vmatprep.subr.bf16.mxu1 %v10841_v51  ;;  %v251_v49 = vpack.c.bf16 %v155_v48, %v155_v48  ;;  %v10877_v51 = vld [vmem:[#allocation6 + $0x15c0] sm:$0xff]   ;;  %v10914_v44 = vld [vmem:[#allocation6 + $0x1608] sm:$0xff]   ;;  %v10918_v48 = vld [vmem:[#allocation6 + $0x1610] sm:$0xff]  }
 0x2cd   :  { %9990 = vmatpush3.bf16.msra.mxu0 %v10842_v52  ;;  %v10878_v52 = vld [vmem:[#allocation6 + $0x1500] sm:$0xff]  }
 0x2ce   :  { %10012 = vmatpush3.bf16.msra.mxu1 %v10843_v53  ;;  %10019 = vmatprep.subr.bf16.mxu0 %v10844_v62  ;;  %v10879_v53 = vld [vmem:[#allocation6 + $0x1580] sm:$0xff]   ;;  %v10888_v62 = vld [vmem:[#allocation6 + $0x1558] sm:$0xff]  }
 0x2cf   :  { %10041 = vmatprep.subr.bf16.mxu1 %v10845_v63  ;;  %v10889_v63 = vld [vmem:[#allocation6 + $0x15d8] sm:$0xff]  }
 0x2d0   :  { %7969 = vmatmul.mubr.bf16.vlgmr.msra.gmra.mrb[76].mxu0 %v245_v60  ;;  %v10886_v60 = vld [vmem:[#allocation6 + $0x1510] sm:$0xff]  }
 0x2d1   :  { %8009 = vmatmul.mubr.bf16.vlgmr.msra.gmra.mrb[76].mxu1 %v247_v61  ;;  %10020 = vmatpush3.bf16.msra.mxu0 %v10846_v0  ;;  %v10887_v61 = vld [vmem:[#allocation6 + $0x1590] sm:$0xff]  }
 0x2d2   :  { %10042 = vmatpush3.bf16.msra.mxu1 %v10847_v1  ;;  %10021 = vmatprep.subr.bf16.mxu0 %v10848_v2  ;;  %v10890_v1 = vld [vmem:[#allocation6 + $0x1518] sm:$0xff]  }
 0x2d3   :  { %10043 = vmatprep.subr.bf16.mxu1 %v10849_v3  ;;  %8048 = vmatprep.mubr.bf16.mxu0 %v250_v45  ;;  %v10891_v3 = vld [vmem:[#allocation6 + $0x1598] sm:$0xff]   ;;  %v10915_v45 = vld [vmem:[#allocation6 + $0x1688] sm:$0xff]  }
 0x2d4   :  { %8088 = vmatprep.mubr.bf16.mxu1 %v252_v46  ;;  %v10916_v46 = vld [vmem:[#allocation6 + $0x1650] sm:$0xff]  }
 0x2d5   :  { %10022 = vmatpush3.bf16.msra.mxu0 %v10850_v4 }
 0x2d6   :  { %10044 = vmatpush3.bf16.msra.mxu1 %v10851_v5  ;;  %10023 = vmatprep.subr.bf16.mxu0 %v10852_v6  ;;  %v10892_v5 = vld [vmem:[#allocation6 + $0x1560] sm:$0xff]  }
 0x2d7   :  { %10045 = vmatprep.subr.bf16.mxu1 %v10853_v7 }
 0x2d9   :  { %10024 = vmatpush3.bf16.msra.mxu0 %v10854_v8  ;;  %v10893_v8 = vld [vmem:[#allocation6 + $0x15e0] sm:$0xff]  }
 0x2da   :  { %10046 = vmatpush3.bf16.msra.mxu1 %v10855_v9  ;;  %10025 = vmatprep.subr.bf16.mxu0 %v10856_v10 }
 0x2db   :  { %10047 = vmatprep.subr.bf16.mxu1 %v10857_v11  ;;  %v10894_v11 = vld [vmem:[#allocation6 + $0x1520] sm:$0xff]  }
 0x2dd   :  { %10026 = vmatpush3.bf16.msra.mxu0 %v10858_v13 }
 0x2de   :  { %10048 = vmatpush3.bf16.msra.mxu1 %v10859_v15  ;;  %10027 = vmatprep.subr.bf16.mxu0 %v10860_v17  ;;  %v10896_v17 = vld [vmem:[#allocation6 + $0x1568] sm:$0xff]  }
 0x2df   :  { %10049 = vmatprep.subr.bf16.mxu1 %v10861_v20  ;;  %v10898_v20 = vld [vmem:[#allocation6 + $0x1528] sm:$0xff]  }
 0x2e1   :  { %10028 = vmatpush3.bf16.msra.mxu0 %v10862_v23  ;;  %v10901_v23 = vld [vmem:[#allocation6 + $0x15f0] sm:$0xff]  }
 0x2e2   :  { %10050 = vmatpush3.bf16.msra.mxu1 %v10863_v26  ;;  %10029 = vmatprep.subr.bf16.mxu0 %v10864_v29  ;;  %v10904_v26 = vld [vmem:[#allocation6 + $0x1578] sm:$0xff]  }
 0x2e3   :  { %v9727_v12 = vpop.f32.mrb[52].mxu0  ;;  %10051 = vmatprep.subr.bf16.mxu1 %v10865_v31  ;;  %v10907_v29 = vld [vmem:[#allocation6 + $0x15b8] sm:$0xff]  }
 0x2e4   :  { %v9749_v14 = vpop.f32.mrb[52].mxu1  ;;  %v9728_v16 = vpop.f32.mrb[53].mxu0  ;;  %v160_v31 = vld [vmem:[#allocation3 + $0x2b8] sm:$0xff] }
 0x2e5   :  { %v9729_v18 = vadd.f32 %v9728_v16, %v9727_v12  ;;  %v9750_v19 = vpop.f32.mrb[53].mxu1  ;;  %v9730_v22 = vpop.f32.mrb[54].mxu0  ;;  %10030 = vmatpush3.bf16.msra.mxu0 %v10866_v32 }
 0x2e6   :  { %v9751_v21 = vadd.f32 %v9750_v19, %v9749_v14  ;;  %v9752_v25 = vpop.f32.mrb[54].mxu1  ;;  %v9731_v27 = vpop.f32.mrb[55].mxu0  ;;  %10052 = vmatpush3.bf16.msra.mxu1 %v10867_v33  ;;  %10031 = vmatprep.subr.bf16.mxu0 %v10868_v34  ;;  %v10895_v14 = vld [vmem:[#allocation6 + $0x15a0] sm:$0xff]   ;;  %v10897_v19 = vld [vmem:[#allocation6 + $0x15e8] sm:$0xff]   ;;  %v10900_v22 = vld [vmem:[#allocation6 + $0x1570] sm:$0xff]   ;;  %v256_v33 = vpack.c.bf16 %v160_v31, %v160_v31 }
 0x2e7   :  { %v7491_v24 = vadd.f32 %v9729_v18, %v11214_v40  ;;  %v9753_v30 = vpop.f32.mrb[55].mxu1  ;;  %10053 = vmatprep.subr.bf16.mxu1 %v10869_v35  ;;  %v10874_v40 = vld [vmem:[#allocation6 + $0x1438] sm:$0xff]   ;;  %v10903_v25 = vld [vmem:[#allocation6 + $0x15b0] sm:$0xff]   ;;  %v157_v34 = vld [vmem:[#allocation3 + $0x2a0] sm:$0xff] }
 0x2e8   :  { %v10905_v27 = vld [vmem:[#allocation6 + $0x15f8] sm:$0xff]   ;;  %v158_v30 = vld [vmem:[#allocation3 + $0x2a8] sm:$0xff]  ;;  %v159_v35 = vld [vmem:[#allocation3 + $0x2b0] sm:$0xff] }
 0x2e9   :  { %v11217_v28 = vadd.f32 %v9751_v21, %v7491_v24  ;;  %10032 = vmatpush3.bf16.msra.mxu0 %v10870_v36  ;;  %v10899_v21 = vld [vmem:[#allocation6 + $0x15a8] sm:$0xff]   ;;  %v10902_v24 = vld [vmem:[#allocation6 + $0x1530] sm:$0xff]   ;;  %v254_v32 = vpack.c.bf16 %v158_v30, %v158_v30  ;;  %v253_v36 = vpack.c.bf16 %v157_v34, %v157_v34 }
 0x2ea   :  { %10054 = vmatpush3.bf16.msra.mxu1 %v10871_v37  ;;  %10033 = vmatprep.subr.bf16.mxu0 %v10872_v38  ;;  %v255_v37 = vpack.c.bf16 %v159_v35, %v159_v35  ;;  %v10908_v38 = vld [vmem:[#allocation6 + $0x1640] sm:$0xff]   ;;  %v10944_v30 = vld [vmem:[#allocation6 + $0x1748] sm:$0xff]   ;;  %v10948_v34 = vld [vmem:[#allocation6 + $0x1750] sm:$0xff]  }
 0x2eb   :  { %10055 = vmatprep.subr.bf16.mxu1 %v10873_v39  ;;  %v10909_v39 = vld [vmem:[#allocation6 + $0x16c0] sm:$0xff]   ;;  %v10945_v31 = vld [vmem:[#allocation6 + $0x17c8] sm:$0xff]   ;;  %v10949_v35 = vld [vmem:[#allocation6 + $0x17d0] sm:$0xff]  }
 0x2ed   :  { %10034 = vmatpush3.bf16.msra.mxu0 %v10874_v40  ;;  %v10910_v40 = vld [vmem:[#allocation6 + $0x1600] sm:$0xff]  }
 0x2ee   :  { %10056 = vmatpush3.bf16.msra.mxu1 %v10875_v41  ;;  %10063 = vmatprep.subr.bf16.mxu0 %v10876_v50  ;;  %v10911_v41 = vld [vmem:[#allocation6 + $0x1680] sm:$0xff]   ;;  %v10920_v50 = vld [vmem:[#allocation6 + $0x1658] sm:$0xff]  }
 0x2ef   :  { %10085 = vmatprep.subr.bf16.mxu1 %v10877_v51  ;;  %v10921_v51 = vld [vmem:[#allocation6 + $0x16d8] sm:$0xff]  }
 0x2f0   :  { %8049 = vmatmul.mubr.bf16.vlgmr.msra.gmra.mrb[80].mxu0 %v249_v47  ;;  %v10917_v47 = vld [vmem:[#allocation6 + $0x16d0] sm:$0xff]  }
 0x2f1   :  { %8089 = vmatmul.mubr.bf16.vlgmr.msra.gmra.mrb[80].mxu1 %v251_v49  ;;  %10064 = vmatpush3.bf16.msra.mxu0 %v10878_v52  ;;  %v10919_v49 = vld [vmem:[#allocation6 + $0x1690] sm:$0xff]  }
 0x2f2   :  { %10086 = vmatpush3.bf16.msra.mxu1 %v10879_v53  ;;  %10065 = vmatprep.subr.bf16.mxu0 %v10880_v54  ;;  %v10922_v53 = vld [vmem:[#allocation6 + $0x1618] sm:$0xff]  }
 0x2f3   :  { %10087 = vmatprep.subr.bf16.mxu1 %v10881_v55  ;;  %8128 = vmatprep.mubr.bf16.mxu0 %v254_v32  ;;  %v10923_v55 = vld [vmem:[#allocation6 + $0x1698] sm:$0xff]   ;;  %v10946_v32 = vld [vmem:[#allocation6 + $0x1708] sm:$0xff]  }
 0x2f4   :  { %8168 = vmatprep.mubr.bf16.mxu1 %v256_v33  ;;  %v10947_v33 = vld [vmem:[#allocation6 + $0x1788] sm:$0xff]  }
 0x2f5   :  { %10066 = vmatpush3.bf16.msra.mxu0 %v10882_v56 }
 0x2f6   :  { %10088 = vmatpush3.bf16.msra.mxu1 %v10883_v57  ;;  %10067 = vmatprep.subr.bf16.mxu0 %v10884_v58  ;;  %v10924_v57 = vld [vmem:[#allocation6 + $0x1660] sm:$0xff]  }
 0x2f7   :  { %10089 = vmatprep.subr.bf16.mxu1 %v10885_v59 }
 0x2f9   :  { %10068 = vmatpush3.bf16.msra.mxu0 %v10886_v60  ;;  %v10925_v60 = vld [vmem:[#allocation6 + $0x16e0] sm:$0xff]  }
 0x2fa   :  { %10090 = vmatpush3.bf16.msra.mxu1 %v10887_v61  ;;  %10069 = vmatprep.subr.bf16.mxu0 %v10888_v62 }
 0x2fb   :  { %10091 = vmatprep.subr.bf16.mxu1 %v10889_v63  ;;  %v10926_v63 = vld [vmem:[#allocation6 + $0x1620] sm:$0xff]  }
 0x2fd   :  { %10070 = vmatpush3.bf16.msra.mxu0 %v10890_v1 }
 0x2fe   :  { %10092 = vmatpush3.bf16.msra.mxu1 %v10891_v3  ;;  %10071 = vmatprep.subr.bf16.mxu0 %v10892_v5  ;;  %v10928_v5 = vld [vmem:[#allocation6 + $0x1668] sm:$0xff]  }
 0x2ff   :  { %10093 = vmatprep.subr.bf16.mxu1 %v10893_v8  ;;  %v10930_v8 = vld [vmem:[#allocation6 + $0x1628] sm:$0xff]  }
 0x301   :  { %10072 = vmatpush3.bf16.msra.mxu0 %v10894_v11  ;;  %v10933_v11 = vld [vmem:[#allocation6 + $0x16f0] sm:$0xff]  }
 0x302   :  { %10094 = vmatpush3.bf16.msra.mxu1 %v10895_v14  ;;  %10073 = vmatprep.subr.bf16.mxu0 %v10896_v17  ;;  %v10936_v14 = vld [vmem:[#allocation6 + $0x1678] sm:$0xff]  }
 0x303   :  { %v9771_v0 = vpop.f32.mrb[56].mxu0  ;;  %10095 = vmatprep.subr.bf16.mxu1 %v10897_v19  ;;  %v10939_v17 = vld [vmem:[#allocation6 + $0x16b8] sm:$0xff]  }
 0x304   :  { %v9793_v2 = vpop.f32.mrb[56].mxu1  ;;  %v9772_v4 = vpop.f32.mrb[57].mxu0 }
 0x305   :  { %v9773_v6 = vadd.f32 %v9772_v4, %v9771_v0  ;;  %v9794_v7 = vpop.f32.mrb[57].mxu1  ;;  %v9774_v10 = vpop.f32.mrb[58].mxu0  ;;  %10074 = vmatpush3.bf16.msra.mxu0 %v10898_v20  ;;  %v164_v20 = vld [vmem:[#allocation3 + $0x2d8] sm:$0xff] }
 0x306   :  { %v9795_v9 = vadd.f32 %v9794_v7, %v9793_v2  ;;  %v9796_v13 = vpop.f32.mrb[58].mxu1  ;;  %v9775_v15 = vpop.f32.mrb[59].mxu0  ;;  %10096 = vmatpush3.bf16.msra.mxu1 %v10899_v21  ;;  %10075 = vmatprep.subr.bf16.mxu0 %v10900_v22  ;;  %v10927_v2 = vld [vmem:[#allocation6 + $0x16a0] sm:$0xff]   ;;  %v10929_v7 = vld [vmem:[#allocation6 + $0x16e8] sm:$0xff]   ;;  %v10932_v10 = vld [vmem:[#allocation6 + $0x1670] sm:$0xff]  }
 0x307   :  { %v7571_v12 = vadd.f32 %v9773_v6, %v11217_v28  ;;  %v9797_v18 = vpop.f32.mrb[59].mxu1  ;;  %10097 = vmatprep.subr.bf16.mxu1 %v10901_v23  ;;  %v10906_v28 = vld [vmem:[#allocation6 + $0x1538] sm:$0xff]   ;;  %v10935_v13 = vld [vmem:[#allocation6 + $0x16b0] sm:$0xff]   ;;  %v161_v21 = vld [vmem:[#allocation3 + $0x2c0] sm:$0xff]  ;;  %v260_v23 = vpack.c.bf16 %v164_v20, %v164_v20 }
 0x308   :  { %v10937_v15 = vld [vmem:[#allocation6 + $0x16f8] sm:$0xff]   ;;  %v162_v18 = vld [vmem:[#allocation3 + $0x2c8] sm:$0xff]  ;;  %v163_v22 = vld [vmem:[#allocation3 + $0x2d0] sm:$0xff] }
 0x309   :  { %v11220_v16 = vadd.f32 %v9795_v9, %v7571_v12  ;;  %10076 = vmatpush3.bf16.msra.mxu0 %v10902_v24  ;;  %v10931_v9 = vld [vmem:[#allocation6 + $0x16a8] sm:$0xff]   ;;  %v10934_v12 = vld [vmem:[#allocation6 + $0x1630] sm:$0xff]   ;;  %v258_v19 = vpack.c.bf16 %v162_v18, %v162_v18  ;;  %v257_v24 = vpack.c.bf16 %v161_v21, %v161_v21 }
 0x30a   :  { %10098 = vmatpush3.bf16.msra.mxu1 %v10903_v25  ;;  %10077 = vmatprep.subr.bf16.mxu0 %v10904_v26  ;;  %v259_v25 = vpack.c.bf16 %v163_v22, %v163_v22  ;;  %v10940_v26 = vld [vmem:[#allocation6 + $0x1740] sm:$0xff]  }
 0x30b   :  { %10099 = vmatprep.subr.bf16.mxu1 %v10905_v27  ;;  %v10941_v27 = vld [vmem:[#allocation6 + $0x17c0] sm:$0xff]  }
 0x30d   :  { %10078 = vmatpush3.bf16.msra.mxu0 %v10906_v28  ;;  %v10942_v28 = vld [vmem:[#allocation6 + $0x1700] sm:$0xff]  }
 0x30e   :  { %10100 = vmatpush3.bf16.msra.mxu1 %v10907_v29  ;;  %10107 = vmatprep.subr.bf16.mxu0 %v10908_v38  ;;  %v10943_v29 = vld [vmem:[#allocation6 + $0x1780] sm:$0xff]   ;;  %v10952_v38 = vld [vmem:[#allocation6 + $0x1758] sm:$0xff]  }
 0x30f   :  { %10129 = vmatprep.subr.bf16.mxu1 %v10909_v39  ;;  %v10953_v39 = vld [vmem:[#allocation6 + $0x17d8] sm:$0xff]  }
 0x310   :  { %8129 = vmatmul.mubr.bf16.vlgmr.msra.gmra.mrb[84].mxu0 %v253_v36  ;;  %v10950_v36 = vld [vmem:[#allocation6 + $0x1710] sm:$0xff]  }
 0x311   :  { %8169 = vmatmul.mubr.bf16.vlgmr.msra.gmra.mrb[84].mxu1 %v255_v37  ;;  %10108 = vmatpush3.bf16.msra.mxu0 %v10910_v40  ;;  %v10951_v37 = vld [vmem:[#allocation6 + $0x1790] sm:$0xff]  }
 0x312   :  { %10130 = vmatpush3.bf16.msra.mxu1 %v10911_v41  ;;  %10109 = vmatprep.subr.bf16.mxu0 %v10912_v42  ;;  %v10954_v41 = vld [vmem:[#allocation6 + $0x1718] sm:$0xff]  }
 0x313   :  { %10131 = vmatprep.subr.bf16.mxu1 %v10913_v43  ;;  %8208 = vmatprep.mubr.bf16.mxu0 %v258_v19  ;;  %v10955_v43 = vld [vmem:[#allocation6 + $0x1798] sm:$0xff]  }
 0x314   :  { %8248 = vmatprep.mubr.bf16.mxu1 %v260_v23 }
 0x315   :  { %10110 = vmatpush3.bf16.msra.mxu0 %v10914_v44 }
 0x316   :  { %10132 = vmatpush3.bf16.msra.mxu1 %v10915_v45  ;;  %10111 = vmatprep.subr.bf16.mxu0 %v10916_v46  ;;  %v10956_v45 = vld [vmem:[#allocation6 + $0x1760] sm:$0xff]  }
 0x317   :  { %10133 = vmatprep.subr.bf16.mxu1 %v10917_v47 }
 0x319   :  { %10112 = vmatpush3.bf16.msra.mxu0 %v10918_v48  ;;  %v10957_v48 = vld [vmem:[#allocation6 + $0x17e0] sm:$0xff]  }
 0x31a   :  { %10134 = vmatpush3.bf16.msra.mxu1 %v10919_v49  ;;  %10113 = vmatprep.subr.bf16.mxu0 %v10920_v50 }
 0x31b   :  { %10135 = vmatprep.subr.bf16.mxu1 %v10921_v51  ;;  %v10958_v51 = vld [vmem:[#allocation6 + $0x1720] sm:$0xff]  }
 0x31d   :  { %10114 = vmatpush3.bf16.msra.mxu0 %v10922_v53 }
 0x31e   :  { %10136 = vmatpush3.bf16.msra.mxu1 %v10923_v55  ;;  %10115 = vmatprep.subr.bf16.mxu0 %v10924_v57  ;;  %v10960_v57 = vld [vmem:[#allocation6 + $0x1768] sm:$0xff]  }
 0x31f   :  { %10137 = vmatprep.subr.bf16.mxu1 %v10925_v60  ;;  %v10962_v60 = vld [vmem:[#allocation6 + $0x1728] sm:$0xff]  }
 0x321   :  { %10116 = vmatpush3.bf16.msra.mxu0 %v10926_v63  ;;  %v10965_v63 = vld [vmem:[#allocation6 + $0x17f0] sm:$0xff]  }
 0x322   :  { %10138 = vmatpush3.bf16.msra.mxu1 %v10927_v2  ;;  %10117 = vmatprep.subr.bf16.mxu0 %v10928_v5  ;;  %v10968_v2 = vld [vmem:[#allocation6 + $0x1778] sm:$0xff]  }
 0x323   :  { %v9815_v52 = vpop.f32.mrb[60].mxu0  ;;  %10139 = vmatprep.subr.bf16.mxu1 %v10929_v7  ;;  %v10971_v5 = vld [vmem:[#allocation6 + $0x17b8] sm:$0xff]  }
 0x324   :  { %v9837_v54 = vpop.f32.mrb[60].mxu1  ;;  %v9816_v56 = vpop.f32.mrb[61].mxu0  ;;  %v168_v7 = vld [vmem:[#allocation3 + $0x2f8] sm:$0xff] }
 0x325   :  { %v9817_v58 = vadd.f32 %v9816_v56, %v9815_v52  ;;  %v9838_v59 = vpop.f32.mrb[61].mxu1  ;;  %v9818_v62 = vpop.f32.mrb[62].mxu0  ;;  %10118 = vmatpush3.bf16.msra.mxu0 %v10930_v8  ;;  %v165_v8 = vld [vmem:[#allocation3 + $0x2e0] sm:$0xff] }
 0x326   :  { %v9839_v61 = vadd.f32 %v9838_v59, %v9837_v54  ;;  %v9840_v1 = vpop.f32.mrb[62].mxu1  ;;  %v9819_v3 = vpop.f32.mrb[63].mxu0  ;;  %10140 = vmatpush3.bf16.msra.mxu1 %v10931_v9  ;;  %10119 = vmatprep.subr.bf16.mxu0 %v10932_v10  ;;  %v10959_v54 = vld [vmem:[#allocation6 + $0x17a0] sm:$0xff]   ;;  %v10961_v59 = vld [vmem:[#allocation6 + $0x17e8] sm:$0xff]   ;;  %v10964_v62 = vld [vmem:[#allocation6 + $0x1770] sm:$0xff]   ;;  %v264_v10 = vpack.c.bf16 %v168_v7, %v168_v7 }
 0x327   :  { %v7651_v0 = vadd.f32 %v9817_v58, %v11220_v16  ;;  %v9841_v6 = vpop.f32.mrb[63].mxu1  ;;  %10141 = vmatprep.subr.bf16.mxu1 %v10933_v11  ;;  %v10938_v16 = vld [vmem:[#allocation6 + $0x1638] sm:$0xff]   ;;  %v10967_v1 = vld [vmem:[#allocation6 + $0x17b0] sm:$0xff]   ;;  %v261_v11 = vpack.c.bf16 %v165_v8, %v165_v8 }
 0x328   :  { %v10969_v3 = vld [vmem:[#allocation6 + $0x17f8] sm:$0xff]   ;;  %v166_v6 = vld [vmem:[#allocation3 + $0x2e8] sm:$0xff] }
 0x329   :  { %v11223_v4 = vadd.f32 %v9839_v61, %v7651_v0  ;;  %10120 = vmatpush3.bf16.msra.mxu0 %v10934_v12  ;;  %v10963_v61 = vld [vmem:[#allocation6 + $0x17a8] sm:$0xff]   ;;  %v10966_v0 = vld [vmem:[#allocation6 + $0x1730] sm:$0xff]   ;;  %v262_v9 = vpack.c.bf16 %v166_v6, %v166_v6 }
 0x32a   :  { %10142 = vmatpush3.bf16.msra.mxu1 %v10935_v13  ;;  %10121 = vmatprep.subr.bf16.mxu0 %v10936_v14  ;;  %v167_v12 = vld [vmem:[#allocation3 + $0x2f0] sm:$0xff] }
 0x32b   :  { %10143 = vmatprep.subr.bf16.mxu1 %v10937_v15  ;;  %v263_v13 = vpack.c.bf16 %v167_v12, %v167_v12 }
 0x32d   :  { %10122 = vmatpush3.bf16.msra.mxu0 %v10938_v16 }
 0x32e   :  { %10144 = vmatpush3.bf16.msra.mxu1 %v10939_v17  ;;  %10151 = vmatprep.subr.bf16.mxu0 %v10940_v26 }
 0x32f   :  { %10173 = vmatprep.subr.bf16.mxu1 %v10941_v27 }
 0x330   :  { %8209 = vmatmul.mubr.bf16.vlgmr.msra.gmra.mrb[88].mxu0 %v257_v24 }
 0x331   :  { %8249 = vmatmul.mubr.bf16.vlgmr.msra.gmra.mrb[88].mxu1 %v259_v25  ;;  %10152 = vmatpush3.bf16.msra.mxu0 %v10942_v28 }
 0x332   :  { %10174 = vmatpush3.bf16.msra.mxu1 %v10943_v29  ;;  %10153 = vmatprep.subr.bf16.mxu0 %v10944_v30 }
 0x333   :  { %10175 = vmatprep.subr.bf16.mxu1 %v10945_v31  ;;  %8288 = vmatprep.mubr.bf16.mxu0 %v262_v9 }
 0x334   :  { %8328 = vmatprep.mubr.bf16.mxu1 %v264_v10 }
 0x335   :  { %10154 = vmatpush3.bf16.msra.mxu0 %v10946_v32 }
 0x336   :  { %10176 = vmatpush3.bf16.msra.mxu1 %v10947_v33  ;;  %10155 = vmatprep.subr.bf16.mxu0 %v10948_v34 }
 0x337   :  { %10177 = vmatprep.subr.bf16.mxu1 %v10949_v35 }
 0x339   :  { %10156 = vmatpush3.bf16.msra.mxu0 %v10950_v36 }
 0x33a   :  { %10178 = vmatpush3.bf16.msra.mxu1 %v10951_v37  ;;  %10157 = vmatprep.subr.bf16.mxu0 %v10952_v38 }
 0x33b   :  { %10179 = vmatprep.subr.bf16.mxu1 %v10953_v39 }
 0x33d   :  { %10158 = vmatpush3.bf16.msra.mxu0 %v10954_v41 }
 0x33e   :  { %10180 = vmatpush3.bf16.msra.mxu1 %v10955_v43  ;;  %10159 = vmatprep.subr.bf16.mxu0 %v10956_v45 }
 0x33f   :  { %10181 = vmatprep.subr.bf16.mxu1 %v10957_v48 }
 0x341   :  { %10160 = vmatpush3.bf16.msra.mxu0 %v10958_v51 }
 0x342   :  { %10182 = vmatpush3.bf16.msra.mxu1 %v10959_v54  ;;  %10161 = vmatprep.subr.bf16.mxu0 %v10960_v57 }
 0x343   :  { %v9859_v40 = vpop.f32.mrb[64].mxu0  ;;  %10183 = vmatprep.subr.bf16.mxu1 %v10961_v59 }
 0x344   :  { %v9881_v42 = vpop.f32.mrb[64].mxu1  ;;  %v9860_v44 = vpop.f32.mrb[65].mxu0 }
 0x345   :  { %v9861_v46 = vadd.f32 %v9860_v44, %v9859_v40  ;;  %v9882_v47 = vpop.f32.mrb[65].mxu1  ;;  %v9862_v50 = vpop.f32.mrb[66].mxu0  ;;  %10162 = vmatpush3.bf16.msra.mxu0 %v10962_v60 }
 0x346   :  { %v9883_v49 = vadd.f32 %v9882_v47, %v9881_v42  ;;  %v9884_v53 = vpop.f32.mrb[66].mxu1  ;;  %v9863_v55 = vpop.f32.mrb[67].mxu0  ;;  %10184 = vmatpush3.bf16.msra.mxu1 %v10963_v61  ;;  %10163 = vmatprep.subr.bf16.mxu0 %v10964_v62  ;;  %v8347_v50 = vld [vmem:[#allocation2] sm:$0x1] }
 0x347   :  { %v7731_v52 = vadd.f32 %v9861_v46, %v11223_v4  ;;  %v9885_v58 = vpop.f32.mrb[67].mxu1  ;;  %10185 = vmatprep.subr.bf16.mxu1 %v10965_v63  ;;  %v10970_v4 = vld [vmem:[#allocation6 + $0x1738] sm:$0xff]   ;;  %10195 = vpush %v8347_v50 }
 0x349   :  { %v7771_v56 = vadd.f32 %v9883_v49, %v7731_v52  ;;  %10164 = vmatpush3.bf16.msra.mxu0 %v10966_v0 }
 0x34a   :  { %10186 = vmatpush3.bf16.msra.mxu1 %v10967_v1  ;;  %10165 = vmatprep.subr.bf16.mxu0 %v10968_v2 }
 0x34b   :  { %10187 = vmatprep.subr.bf16.mxu1 %v10969_v3 }
 0x34d   :  { %10166 = vmatpush3.bf16.msra.mxu0 %v10970_v4 }
 0x34e   :  { %10188 = vmatpush3.bf16.msra.mxu1 %v10971_v5 }
 0x350   :  { %8289 = vmatmul.mubr.bf16.vlgmr.msra.gmra.mrb[92].mxu0 %v261_v11 }
 0x351   :  { %8329 = vmatmul.mubr.bf16.vlgmr.msra.gmra.mrb[92].mxu1 %v263_v13 }
 0x363   :  { %v9903_v14 = vpop.f32.mrb[68].mxu0 }
 0x364   :  { %v9925_v15 = vpop.f32.mrb[68].mxu1  ;;  %v9904_v16 = vpop.f32.mrb[69].mxu0 }
 0x365   :  { %v9926_v17 = vpop.f32.mrb[69].mxu1  ;;  %v9905_v18 = vadd.f32 %v9904_v16, %v9903_v14  ;;  %v9906_v20 = vpop.f32.mrb[70].mxu0 }
 0x366   :  { %v9927_v19 = vadd.f32 %v9926_v17, %v9925_v15  ;;  %v9928_v21 = vpop.f32.mrb[70].mxu1  ;;  %v9907_v22 = vpop.f32.mrb[71].mxu0 }
 0x367   :  { %v9929_v23 = vpop.f32.mrb[71].mxu1  ;;  %v7811_v24 = vadd.f32 %v9905_v18, %v7771_v56 }
 0x369   :  { %v7851_v25 = vadd.f32 %v9927_v19, %v7811_v24 }
 0x378   :  { %s10196_s3 = spop %10195 }
 0x383   :  { %v9947_v26 = vpop.f32.mrb[72].mxu0 }
 0x384   :  { %v9969_v27 = vpop.f32.mrb[72].mxu1  ;;  %v9948_v28 = vpop.f32.mrb[73].mxu0 }
 0x385   :  { %v9949_v29 = vadd.f32 %v9948_v28, %v9947_v26  ;;  %v9970_v30 = vpop.f32.mrb[73].mxu1  ;;  %v9950_v31 = vpop.f32.mrb[74].mxu0 }
 0x386   :  { %v9971_v32 = vadd.f32 %v9970_v30, %v9969_v27  ;;  %v9972_v33 = vpop.f32.mrb[74].mxu1  ;;  %v9951_v34 = vpop.f32.mrb[75].mxu0 }
 0x387   :  { %v7891_v35 = vadd.f32 %v9949_v29, %v7851_v25  ;;  %v9973_v36 = vpop.f32.mrb[75].mxu1 }
 0x389   :  { %v7931_v37 = vadd.f32 %v9971_v32, %v7891_v35  ;;  %v9138_v35 = vld [vmem:[#allocation9] ss:$0 sm:$0xff] }
 0x3a3   :  { %v9991_v38 = vpop.f32.mrb[76].mxu0 }
 0x3a4   :  { %v10013_v39 = vpop.f32.mrb[76].mxu1  ;;  %v9992_v40 = vpop.f32.mrb[77].mxu0 }
 0x3a5   :  { %v9993_v41 = vadd.f32 %v9992_v40, %v9991_v38  ;;  %v10014_v42 = vpop.f32.mrb[77].mxu1  ;;  %v9994_v43 = vpop.f32.mrb[78].mxu0  ;;  %v8349_v38 = vstv %s10196_s3 }
 0x3a6   :  { %v10015_v44 = vadd.f32 %v10014_v42, %v10013_v39  ;;  %v10016_v45 = vpop.f32.mrb[78].mxu1  ;;  %v9995_v46 = vpop.f32.mrb[79].mxu0 }
 0x3a7   :  { %v7971_v47 = vadd.f32 %v9993_v41, %v7931_v37  ;;  %v10017_v48 = vpop.f32.mrb[79].mxu1 }
 0x3a9   :  { %v8011_v49 = vadd.f32 %v10015_v44, %v7971_v47 }
 0x3c3   :  { %v10035_v51 = vpop.f32.mrb[80].mxu0 }
 0x3c4   :  { %v10057_v52 = vpop.f32.mrb[80].mxu1  ;;  %v10036_v53 = vpop.f32.mrb[81].mxu0 }
 0x3c5   :  { %v10058_v54 = vpop.f32.mrb[81].mxu1  ;;  %v10037_v55 = vadd.f32 %v10036_v53, %v10035_v51  ;;  %v10038_v57 = vpop.f32.mrb[82].mxu0 }
 0x3c6   :  { %v10059_v56 = vadd.f32 %v10058_v54, %v10057_v52  ;;  %v10060_v58 = vpop.f32.mrb[82].mxu1  ;;  %v10039_v59 = vpop.f32.mrb[83].mxu0 }
 0x3c7   :  { %v10061_v60 = vpop.f32.mrb[83].mxu1  ;;  %v8051_v61 = vadd.f32 %v10037_v55, %v8011_v49 }
 0x3c9   :  { %v8091_v62 = vadd.f32 %v10059_v56, %v8051_v61 }
 0x3e3   :  { %v10079_v63 = vpop.f32.mrb[84].mxu0 }
 0x3e4   :  { %v10101_v0 = vpop.f32.mrb[84].mxu1  ;;  %v10080_v1 = vpop.f32.mrb[85].mxu0 }
 0x3e5   :  { %v10081_v2 = vadd.f32 %v10080_v1, %v10079_v63  ;;  %v10102_v3 = vpop.f32.mrb[85].mxu1  ;;  %v10082_v4 = vpop.f32.mrb[86].mxu0 }
 0x3e6   :  { %v10103_v5 = vadd.f32 %v10102_v3, %v10101_v0  ;;  %v10104_v6 = vpop.f32.mrb[86].mxu1  ;;  %v10083_v7 = vpop.f32.mrb[87].mxu0 }
 0x3e7   :  { %v8131_v8 = vadd.f32 %v10081_v2, %v8091_v62  ;;  %v10105_v9 = vpop.f32.mrb[87].mxu1 }
 0x3e9   :  { %v8171_v10 = vadd.f32 %v10103_v5, %v8131_v8 }
 0x403   :  { %v10123_v11 = vpop.f32.mrb[88].mxu0 }
 0x404   :  { %v10145_v12 = vpop.f32.mrb[88].mxu1  ;;  %v10124_v13 = vpop.f32.mrb[89].mxu0 }
 0x405   :  { %v10125_v14 = vadd.f32 %v10124_v13, %v10123_v11  ;;  %v10146_v15 = vpop.f32.mrb[89].mxu1  ;;  %v10126_v16 = vpop.f32.mrb[90].mxu0 }
 0x406   :  { %v10147_v17 = vadd.f32 %v10146_v15, %v10145_v12  ;;  %v10148_v18 = vpop.f32.mrb[90].mxu1  ;;  %v10127_v19 = vpop.f32.mrb[91].mxu0 }
 0x407   :  { %v8211_v20 = vadd.f32 %v10125_v14, %v8171_v10  ;;  %v10149_v21 = vpop.f32.mrb[91].mxu1 }
 0x409   :  { %v8251_v22 = vadd.f32 %v10147_v17, %v8211_v20 }
 0x423   :  { %v10167_v23 = vpop.f32.mrb[92].mxu0 }
 0x424   :  { %v10189_v24 = vpop.f32.mrb[92].mxu1  ;;  %v10168_v25 = vpop.f32.mrb[93].mxu0 }
 0x425   :  { %v10190_v26 = vpop.f32.mrb[93].mxu1  ;;  %v10169_v27 = vadd.f32 %v10168_v25, %v10167_v23  ;;  %v10170_v29 = vpop.f32.mrb[94].mxu0 }
 0x426   :  { %v10191_v28 = vadd.f32 %v10190_v26, %v10189_v24  ;;  %v10192_v30 = vpop.f32.mrb[94].mxu1  ;;  %v10171_v31 = vpop.f32.mrb[95].mxu0 }
 0x427   :  { %v10193_v32 = vpop.f32.mrb[95].mxu1  ;;  %v8291_v33 = vadd.f32 %v10169_v27, %v8251_v22 }
 0x429   :  { %v8331_v34 = vadd.f32 %v10191_v28, %v8291_v33 }
 0x42b   :  { %v8336_v36 = vmax.f32 %v8331_v34, 0.0 }
 0x42d   :  { %v8344_v37 = vmul.f32 %v9138_v35, %v8336_v36 }
 0x42f   :  { %8345 = vadd.xlane.f32.xlu0 %v8344_v37 }
 0x4bc   :  { %v8346_v39 = vpop.xlane.xlu0 %8345 }
 0x4bd   :  { %v8350_v40 = vadd.f32 %v8349_v38, %v8346_v39 }
 0x4bf   :  { %8351 = vst [vmem:[#allocation11] sm:$0xff] %v8350_v40 }
 0x4c0   :  { %11071 = shalt.err (!%p11068_p8)
}
 0x4c1   :  { %s11072_s21 = scalar_lea.hbm %s11243_s5, 128 }
 0x4c2   :  { %p11073_p9 = scmp.ne.s32.totalorder %s11243_s5, %s11072_s21  ;;  %p11076_p10 = scmp.lt.u32.totalorder %s11072_s21, %s11243_s5 }
 0x4c4   :  { %p11078_p11 = pnand %p11076_p10, %p11073_p9 }
 0x4c6   :  { %11081 = shalt.err (!%p11078_p11)
}
 0x4c7   :  { %8361 = dma.vmem_to_hbm [thread:$0]  %s8359_s18, 128, %s11243_s5, [#allocation5]  }
 0x4c8   :  { %11088 = dma.done.wait [#allocation5], 128  }
 0x4c9   :  { %11089 = vsyncadd [#allocation5], 4294967168 }
 0x4ca   :  { %8365 = vsyncpa [#allocation4], 1 }
 0x4cb   :  { %8366 = vsyncpa [#allocation7], 1 }
 0x4cc   :  { %8367 = vsyncpa [#allocation10], 1 }
 0x4cd   :  { %8368 = vsyncpa [#allocation5], 1 }

</bundles_post_ra>
